<compile_context>
chip_gen: v7x
topology: tpu7x:2x2x1
jax: 0.10.0
libtpu: 0.0.40
codegen_flags: <defaults>
</compile_context>

<pallas_src>
import math
import functools

import jax
import jax.numpy as jnp
from jax.experimental import pallas as pl
from jax.experimental.pallas import tpu as pltpu

NUM_HEADS = 16          # fixed in the PyTorch module
NEG_INF = -1e30


# --------------------------------------------------------------------------
# LSTM (spatial encoder) -- returns final hidden state h_n[-1]  (B, H)
# --------------------------------------------------------------------------
def lstm_kernel(x_ref, wih_ref, whh_ref, b_ref, h_out_ref, xg_scr):
    L, B, _ = x_ref.shape
    H = whh_ref.shape[0]

    # Input-gate term for ALL time steps at once, on the VPU (K=2 contraction
    # would waste the MXU): xg[t, b, :] = x[t, b, 0]*Wih[0] + x[t, b, 1]*Wih[1] + bias
    x = x_ref[...]                                    # (L, B, 2)
    w0 = wih_ref[0:1, :][None, :, :]                  # (1, 1, 4H)
    w1 = wih_ref[1:2, :][None, :, :]                  # (1, 1, 4H)
    b = b_ref[...][None, :, :]                        # (1, 1, 4H)
    xg_scr[...] = x[:, :, 0:1] * w0 + x[:, :, 1:2] * w1 + b   # (L, B, 4H)

    whh = whh_ref[...]                                # (H, 4H), resident in vregs

    def step(t, carry):
        h, c = carry
        gates = xg_scr[t] + jnp.dot(h, whh, preferred_element_type=jnp.float32)  # (B, 4H)
        i = jax.nn.sigmoid(gates[:, 0:H])             # PyTorch gate order i, f, g, o
        f = jax.nn.sigmoid(gates[:, H:2 * H])
        g = jnp.tanh(gates[:, 2 * H:3 * H])
        o = jax.nn.sigmoid(gates[:, 3 * H:4 * H])
        c_new = f * c + i * g
        h_new = o * jnp.tanh(c_new)
        return (h_new, c_new)

    h0 = jnp.zeros((B, H), jnp.float32)
    c0 = jnp.zeros((B, H), jnp.float32)
    h_final, _ = jax.lax.fori_loop(0, L, step, (h0, c0))
    h_out_ref[...] = h_final


def lstm_final_hidden(x_seq, wih_t, whh_t, bias):
    L, B, _ = x_seq.shape
    H = whh_t.shape[0]
    return pl.pallas_call(
        lstm_kernel,
        out_shape=jax.ShapeDtypeStruct((B, H), jnp.float32),
        scratch_shapes=[pltpu.VMEM((L, B, 4 * H), jnp.float32)],
    )(x_seq, wih_t, whh_t, bias)


# --------------------------------------------------------------------------
# Fused structure encoder: nlayer x MultiheadAttention (torch semantics,
# dropout=0, no residual/LN) + padding-masked mean + sigmoid(gamma) blend.
# grid=(B,) only.  Heads live in a block-diagonal layout:
#   rows [h*L + i] of the score matrix hold (head h, query i), so the softmax
#   is a plain last-axis softmax and all matmuls have K in {16, 32}.
# --------------------------------------------------------------------------
def attn_combine_kernel(x_ref, bias_ref, mask_ref, len_ref, coor_ref, gamma_ref,
                        hm_ref, win_ref, bin_ref, wout_ref, bout_ref, out_ref,
                        *, nh, nlayers, scale):
    L = x_ref.shape[1]
    E = x_ref.shape[2]
    x = x_ref[0]                                           # (L, E)
    hm = hm_ref[...]                                       # (nh*L, E) 0/1 head mask
    bias_blk = jnp.concatenate([bias_ref[0]] * nh, axis=0)  # (nh*L, L)

    for l in range(nlayers):                               # nlayers static (=2)
        # QKV for all heads in ONE matmul: (L,E)@(E,3E), K=E
        qkv = jnp.dot(x, win_ref[l], preferred_element_type=jnp.float32) + bin_ref[l]
        q = qkv[:, 0:E] * scale
        k = qkv[:, E:2 * E]
        v = qkv[:, 2 * E:3 * E]

        # scores: row h*L+i = query i restricted to head h's feature slice
        q_exp = jnp.concatenate([q] * nh, axis=0) * hm     # (nh*L, E)
        s = jax.lax.dot_general(q_exp, k, (((1,), (1,)), ((), ())),
                                preferred_element_type=jnp.float32)   # (nh*L, L)
        s = s + bias_blk                                   # attn_mask + key padding
        s = s - jnp.max(s, axis=-1, keepdims=True)
        p = jnp.exp(s)
        p = p / jnp.sum(p, axis=-1, keepdims=True)

        # per-head p @ V for all heads at once, then fold heads back to (L, E)
        o_exp = jnp.dot(p, v, preferred_element_type=jnp.float32)     # (nh*L, E)
        om = o_exp * hm
        o = om[0:L, :]
        for h in range(1, nh):
            o = o + om[h * L:(h + 1) * L, :]               # (L, E) concatenated heads

        # out projection: (L,E)@(E,E), K=E
        x = jnp.dot(o, wout_ref[l], preferred_element_type=jnp.float32) + bout_ref[l]

    # ---- padding-masked mean over sequence + sigmoid(gamma) blend ----
    m = mask_ref[0]                                        # (L, 1), 1 = valid
    cell_emb = jnp.sum(x * m, axis=0, keepdims=True) / len_ref[0]     # (1, E)
    g = jax.nn.sigmoid(gamma_ref[...])                     # (1, 1)
    out_ref[0] = g * coor_ref[0] + (1.0 - g) * cell_emb


def structure_encode_and_combine(x_ble, bias_bll, mask_bl1, lens_b11, coor_b1e,
                                 gamma_11, hm, wins, bins_, wouts, bouts):
    B, L, E = x_ble.shape
    nl = wins.shape[0]
    nh = NUM_HEADS
    hd = E // nh
    kernel = functools.partial(attn_combine_kernel, nh=nh, nlayers=nl,
                               scale=1.0 / math.sqrt(hd))
    out = pl.pallas_call(
        kernel,
        out_shape=jax.ShapeDtypeStruct((B, 1, E), jnp.float32),
        grid=(B,),
        in_specs=[
            pl.BlockSpec((1, L, E), lambda b: (b, 0, 0)),        # x (cell emb + PE)
            pl.BlockSpec((1, L, L), lambda b: (b, 0, 0)),        # additive attn bias
            pl.BlockSpec((1, L, 1), lambda b: (b, 0, 0)),        # valid mask
            pl.BlockSpec((1, 1, 1), lambda b: (b, 0, 0)),        # trajs_len
            pl.BlockSpec((1, 1, E), lambda b: (b, 0, 0)),        # coor_emb (LSTM)
            pl.BlockSpec((1, 1), lambda b: (0, 0)),              # gamma
            pl.BlockSpec((nh * L, E), lambda b: (0, 0)),         # head mask (const)
            pl.BlockSpec((nl, E, 3 * E), lambda b: (0, 0, 0)),   # stacked W_in^T
            pl.BlockSpec((nl, 1, 3 * E), lambda b: (0, 0, 0)),   # stacked b_in
            pl.BlockSpec((nl, E, E), lambda b: (0, 0, 0)),       # stacked W_out^T
            pl.BlockSpec((nl, 1, E), lambda b: (0, 0, 0)),       # stacked b_out
        ],
        out_specs=pl.BlockSpec((1, 1, E), lambda b: (b, 0, 0)),
        compiler_params=pltpu.CompilerParams(
            dimension_semantics=("parallel",)),
    )(x_ble, bias_bll, mask_bl1, lens_b11, coor_b1e, gamma_11, hm,
      wins, bins_, wouts, bouts)
    return out.reshape(B, E)


# --------------------------------------------------------------------------
# Glue: positional encoding table (precomputed once), jitted forward
# --------------------------------------------------------------------------
def positional_encoding(emb_size, maxlen=1601):
    den = jnp.exp(jnp.arange(0, emb_size, 2, dtype=jnp.float32)
                  * (-math.log(10000.0) / emb_size))
    pos = jnp.arange(0, maxlen, dtype=jnp.float32)[:, None]
    pe = jnp.zeros((maxlen, emb_size), jnp.float32)
    pe = pe.at[:, 0::2].set(jnp.sin(pos * den))
    pe = pe.at[:, 1::2].set(jnp.cos(pos * den))
    return pe[:, None, :]  # (maxlen, 1, E)


@jax.jit
def t3s_forward(params, trajs_coor, trajs_cell, attn_mask, padding_mask, trajs_len):
    E = params["emb"].shape[1]
    nh = NUM_HEADS
    hd = E // nh
    L, B = trajs_cell.shape

    # ---- spatial encoder (LSTM), h_n[-1] -> coor_emb (B, E) ----
    wih_t = params["lstm_wih"].T                           # (2, 4H)
    whh_t = params["lstm_whh"].T                           # (H, 4H)
    lstm_b = (params["lstm_bih"] + params["lstm_bhh"]).reshape(1, -1)
    coor_emb = lstm_final_hidden(trajs_coor, wih_t, whh_t, lstm_b)

    # ---- cell encoder: embedding lookup + cached positional encoding ----
    x = params["emb"][trajs_cell] + params["pos_emb"][:L]  # (L, B, E)
    # TODO(synk): nn.Dropout(0.1) in PositionalEncoding is stochastic; eval-mode identity here.
    x = jnp.transpose(x, (1, 0, 2)).astype(jnp.float32)    # (B, L, E)

    # ---- additive attention bias: attn_mask + key_padding_mask ----
    bias = (attn_mask[None, :, :]
            + jnp.where(padding_mask, NEG_INF, 0.0)[:, None, :]).astype(jnp.float32)

    # ---- stacked MHA weights, lane-dense layouts ----
    wins = jnp.stack([lp["in_proj_w"].T for lp in params["mha"]])            # (nl, E, 3E)
    bins_ = jnp.stack([lp["in_proj_b"].reshape(1, -1) for lp in params["mha"]])  # (nl, 1, 3E)
    wouts = jnp.stack([lp["out_w"].T for lp in params["mha"]])               # (nl, E, E)
    bouts = jnp.stack([lp["out_b"].reshape(1, -1) for lp in params["mha"]])  # (nl, 1, E)

    # block-diagonal head mask: hm[h*L + i, d] = 1 iff feature d belongs to head h
    hm = (jnp.repeat(jnp.arange(nh), L)[:, None]
          == (jnp.arange(E) // hd)[None, :]).astype(jnp.float32)             # (nh*L, E)

    mask = (1.0 - padding_mask.astype(jnp.float32))[:, :, None]              # (B, L, 1)
    lens = trajs_len.astype(jnp.float32).reshape(B, 1, 1)
    coor = coor_emb.reshape(B, 1, E)

    return structure_encode_and_combine(x, bias, mask, lens, coor,
                                        params["gamma"], hm,
                                        wins, bins_, wouts, bouts)


# --------------------------------------------------------------------------
if __name__ == "__main__":
    B, L, E, VOCAB = 8, 16, 32, 128   # ninput = nhidden = E = 32, 16 heads (hd=2)

    key = jax.random.PRNGKey(0)
    keys = jax.random.split(key, 16)
    s = 0.1
    params = {
        "lstm_wih": jax.random.normal(keys[0], (4 * E, 2), jnp.float32) * s,
        "lstm_whh": jax.random.normal(keys[1], (4 * E, E), jnp.float32) * s,
        "lstm_bih": jax.random.normal(keys[2], (4 * E,), jnp.float32) * s,
        "lstm_bhh": jax.random.normal(keys[3], (4 * E,), jnp.float32) * s,
        "emb": jax.random.normal(keys[4], (VOCAB, E), jnp.float32) * s,
        "mha": [
            dict(
                in_proj_w=jax.random.normal(keys[5 + 4 * l], (3 * E, E), jnp.float32) * s,
                in_proj_b=jax.random.normal(keys[6 + 4 * l], (3 * E,), jnp.float32) * s,
                out_w=jax.random.normal(keys[7 + 4 * l], (E, E), jnp.float32) * s,
                out_b=jax.random.normal(keys[8 + 4 * l], (E,), jnp.float32) * s,
            )
            for l in range(2)
        ],
        "gamma": jnp.full((1, 1), 0.3, jnp.float32),       # nn.Parameter(Tensor(1))
        "pos_emb": positional_encoding(E, 1601),           # cached PE table
    }

    trajs_coor = jax.random.normal(keys[13], (L, B, 2), jnp.float32)
    trajs_cell = jax.random.randint(keys[14], (L, B), 0, VOCAB)
    lengths = jax.random.randint(keys[15], (B,), L // 2, L + 1)
    traj_cell_padding_mask = jnp.arange(L)[None, :] >= lengths[:, None]  # (B, L), True = pad
    traj_cell_attn_mask = jnp.zeros((L, L), jnp.float32)
    trajs_len = lengths.astype(jnp.float32)

    embs = t3s_forward(params, trajs_coor, trajs_cell, traj_cell_attn_mask,
                       traj_cell_padding_mask, trajs_len)
    embs = jax.block_until_ready(embs)

    assert embs.shape == (B, E), embs.shape
    assert bool(jnp.all(jnp.isfinite(embs)))
    print("KERNEL_OK")
</pallas_src>

<mosaic_0001>
module attributes {stable_mosaic.version = 11 : i64} {
  func.func @lstm_kernel(%arg0: memref<16x8x2xf32, #tpu.memory_space<vmem>>, %arg1: memref<2x128xf32, #tpu.memory_space<vmem>>, %arg2: memref<32x128xf32, #tpu.memory_space<vmem>>, %arg3: memref<1x128xf32, #tpu.memory_space<vmem>>, %arg4: memref<8x32xf32, #tpu.memory_space<vmem>>, %arg5: memref<16x8x128xf32, #tpu.memory_space<vmem>>) attributes {dimension_semantics = [], scalar_prefetch = 0 : i64, scratch_operands = 1 : i64, tpu.core_type = #tpu.core_type<tc>} {
    %c0 = arith.constant 0 : index
    %c0_0 = arith.constant 0 : index
    %c0_1 = arith.constant 0 : index
    %0 = vector.load %arg0[%c0, %c0_0, %c0_1] : memref<16x8x2xf32, #tpu.memory_space<vmem>>, vector<16x8x2xf32>
    %c0_2 = arith.constant 0 : index
    %c0_3 = arith.constant 0 : index
    %1 = vector.load %arg1[%c0_2, %c0_3] : memref<2x128xf32, #tpu.memory_space<vmem>>, vector<1x128xf32>
    %2 = vector.shape_cast %1 : vector<1x128xf32> to vector<1x1x128xf32>
    %c1 = arith.constant 1 : index
    %c0_4 = arith.constant 0 : index
    %3 = vector.load %arg1[%c1, %c0_4] : memref<2x128xf32, #tpu.memory_space<vmem>>, vector<1x128xf32>
    %4 = vector.shape_cast %3 : vector<1x128xf32> to vector<1x1x128xf32>
    %c0_5 = arith.constant 0 : index
    %c0_6 = arith.constant 0 : index
    %5 = vector.load %arg3[%c0_5, %c0_6] : memref<1x128xf32, #tpu.memory_space<vmem>>, vector<1x128xf32>
    %6 = vector.shape_cast %5 : vector<1x128xf32> to vector<1x1x128xf32>
    %7 = vector.extract_strided_slice %0 {offsets = [0, 0, 0], sizes = [16, 8, 1], strides = [1, 1, 1]} : vector<16x8x2xf32> to vector<16x8x1xf32>
    %8 = vector.broadcast %7 : vector<16x8x1xf32> to vector<16x8x128xf32>
    %9 = vector.broadcast %2 : vector<1x1x128xf32> to vector<16x8x128xf32>
    %10 = arith.mulf %8, %9 : vector<16x8x128xf32>
    %11 = vector.extract_strided_slice %0 {offsets = [0, 0, 1], sizes = [16, 8, 1], strides = [1, 1, 1]} : vector<16x8x2xf32> to vector<16x8x1xf32>
    %12 = vector.broadcast %11 : vector<16x8x1xf32> to vector<16x8x128xf32>
    %13 = vector.broadcast %4 : vector<1x1x128xf32> to vector<16x8x128xf32>
    %14 = arith.mulf %12, %13 : vector<16x8x128xf32>
    %15 = arith.addf %10, %14 : vector<16x8x128xf32>
    %16 = vector.broadcast %6 : vector<1x1x128xf32> to vector<16x8x128xf32>
    %17 = arith.addf %15, %16 : vector<16x8x128xf32>
    %c0_7 = arith.constant 0 : index
    %c0_8 = arith.constant 0 : index
    %c0_9 = arith.constant 0 : index
    %18 = vector.load %arg5[%c0_7, %c0_8, %c0_9] : memref<16x8x128xf32, #tpu.memory_space<vmem>>, vector<16x8x128xf32>
    tpu.vector_store %arg5[%c0_7, %c0_8, %c0_9], %17 {strides = array<i32>} : memref<16x8x128xf32, #tpu.memory_space<vmem>>, vector<16x8x128xf32>,
    %c0_10 = arith.constant 0 : index
    %c0_11 = arith.constant 0 : index
    %19 = vector.load %arg2[%c0_10, %c0_11] : memref<32x128xf32, #tpu.memory_space<vmem>>, vector<32x128xf32>
    %cst = arith.constant 0.000000e+00 : f32
    %20 = vector.broadcast %cst : f32 to vector<8x32xf32>
    %cst_12 = arith.constant 0.000000e+00 : f32
    %21 = vector.broadcast %cst_12 : f32 to vector<8x32xf32>
    %c0_i32 = arith.constant 0 : i32
    %c16_i32 = arith.constant 16 : i32
    %22 = arith.addi %c0_i32, %c16_i32 : i32
    %c1_i32 = arith.constant 1 : i32
    %23:2 = scf.for %arg6 = %c0_i32 to %22 step %c1_i32 iter_args(%arg7 = %20, %arg8 = %21) -> (vector<8x32xf32>, vector<8x32xf32>)  : i32 {
      %25 = arith.index_cast %arg6 : i32 to index
      %c0_16 = arith.constant 0 : index
      %c0_17 = arith.constant 0 : index
      %26 = vector.load %arg5[%25, %c0_16, %c0_17] : memref<16x8x128xf32, #tpu.memory_space<vmem>>, vector<1x8x128xf32>
      %27 = vector.shape_cast %26 : vector<1x8x128xf32> to vector<8x128xf32>
      %cst_18 = arith.constant dense<0.000000e+00> : vector<8x128xf32>
      %28 = tpu.matmul %arg7, %19, %cst_18 {dimension_numbers = #tpu.dot_dimension_numbers<[1], [0], [0], [1], [0, 0, 1, 1], [], []>} : vector<8x32xf32>, vector<32x128xf32>, vector<8x128xf32> -> vector<8x128xf32>
      %29 = arith.addf %27, %28 : vector<8x128xf32>
      %30 = vector.extract_strided_slice %29 {offsets = [0, 0], sizes = [8, 32], strides = [1, 1]} : vector<8x128xf32> to vector<8x32xf32>
      %31 = arith.negf %30 : vector<8x32xf32>
      %32 = math.exp %31 : vector<8x32xf32>
      %cst_19 = arith.constant 1.000000e+00 : f32
      %33 = vector.broadcast %cst_19 : f32 to vector<8x32xf32>
      %34 = arith.addf %33, %32 : vector<8x32xf32>
      %35 = arith.divf %33, %34 : vector<8x32xf32>
      %36 = vector.extract_strided_slice %29 {offsets = [0, 32], sizes = [8, 32], strides = [1, 1]} : vector<8x128xf32> to vector<8x32xf32>
      %37 = arith.negf %36 : vector<8x32xf32>
      %38 = math.exp %37 : vector<8x32xf32>
      %cst_20 = arith.constant 1.000000e+00 : f32
      %39 = vector.broadcast %cst_20 : f32 to vector<8x32xf32>
      %40 = arith.addf %39, %38 : vector<8x32xf32>
      %41 = arith.divf %39, %40 : vector<8x32xf32>
      %42 = vector.extract_strided_slice %29 {offsets = [0, 64], sizes = [8, 32], strides = [1, 1]} : vector<8x128xf32> to vector<8x32xf32>
      %43 = math.tanh %42 : vector<8x32xf32>
      %44 = vector.extract_strided_slice %29 {offsets = [0, 96], sizes = [8, 32], strides = [1, 1]} : vector<8x128xf32> to vector<8x32xf32>
      %45 = arith.negf %44 : vector<8x32xf32>
      %46 = math.exp %45 : vector<8x32xf32>
      %cst_21 = arith.constant 1.000000e+00 : f32
      %47 = vector.broadcast %cst_21 : f32 to vector<8x32xf32>
      %48 = arith.addf %47, %46 : vector<8x32xf32>
      %49 = arith.divf %47, %48 : vector<8x32xf32>
      %50 = arith.mulf %41, %arg8 : vector<8x32xf32>
      %51 = arith.mulf %35, %43 : vector<8x32xf32>
      %52 = arith.addf %50, %51 : vector<8x32xf32>
      %53 = math.tanh %52 : vector<8x32xf32>
      %54 = arith.mulf %49, %53 : vector<8x32xf32>
      scf.yield %54, %52 : vector<8x32xf32>, vector<8x32xf32>
    }
    %c16_i32_13 = arith.constant 16 : i32
    %c0_14 = arith.constant 0 : index
    %c0_15 = arith.constant 0 : index
    %24 = vector.load %arg4[%c0_14, %c0_15] : memref<8x32xf32, #tpu.memory_space<vmem>>, vector<8x32xf32>
    tpu.vector_store %arg4[%c0_14, %c0_15], %23#0 {strides = array<i32>} : memref<8x32xf32, #tpu.memory_space<vmem>>, vector<8x32xf32>,
    return
  }
}

module attributes {stable_mosaic.version = 11 : i64} {
  func.func @attn_combine_kernel(%arg0: i32, %arg1: memref<1x16x32xf32, #tpu.memory_space<vmem>>, %arg2: memref<1x16x16xf32, #tpu.memory_space<vmem>>, %arg3: memref<1x16x1xf32, #tpu.memory_space<vmem>>, %arg4: memref<1x1x1xf32, #tpu.memory_space<vmem>>, %arg5: memref<1x1x32xf32, #tpu.memory_space<vmem>>, %arg6: memref<1x1xf32, #tpu.memory_space<vmem>>, %arg7: memref<256x32xf32, #tpu.memory_space<vmem>>, %arg8: memref<2x32x96xf32, #tpu.memory_space<vmem>>, %arg9: memref<2x1x96xf32, #tpu.memory_space<vmem>>, %arg10: memref<2x32x32xf32, #tpu.memory_space<vmem>>, %arg11: memref<2x1x32xf32, #tpu.memory_space<vmem>>, %arg12: memref<1x1x32xf32, #tpu.memory_space<vmem>>) attributes {dimension_semantics = [#tpu.dimension_semantics<parallel>], iteration_bounds = array<i64: 8>, scalar_prefetch = 0 : i64, scratch_operands = 0 : i64, tpu.core_type = #tpu.core_type<tc>, window_params = [{transform_indices = @transform_0, window_bounds = array<i64: 1, 16, 32>}, {transform_indices = @transform_1, window_bounds = array<i64: 1, 16, 16>}, {transform_indices = @transform_2, window_bounds = array<i64: 1, 16, 1>}, {transform_indices = @transform_3, window_bounds = array<i64: 1, 1, 1>}, {transform_indices = @transform_4, window_bounds = array<i64: 1, 1, 32>}, {pipeline_mode = #tpu.pipeline_mode<synchronous>, transform_indices = @transform_5, window_bounds = array<i64: 1, 1>}, {pipeline_mode = #tpu.pipeline_mode<synchronous>, transform_indices = @transform_6, window_bounds = array<i64: 256, 32>}, {pipeline_mode = #tpu.pipeline_mode<synchronous>, transform_indices = @transform_7, window_bounds = array<i64: 2, 32, 96>}, {pipeline_mode = #tpu.pipeline_mode<synchronous>, transform_indices = @transform_8, window_bounds = array<i64: 2, 1, 96>}, {pipeline_mode = #tpu.pipeline_mode<synchronous>, transform_indices = @transform_9, window_bounds = array<i64: 2, 32, 32>}, {pipeline_mode = #tpu.pipeline_mode<synchronous>, transform_indices = @transform_10, window_bounds = array<i64: 2, 1, 32>}, {transform_indices = @transform_11, window_bounds = array<i64: 1, 1, 32>}]} {
    %c0 = arith.constant 0 : index
    %c0_0 = arith.constant 0 : index
    %c0_1 = arith.constant 0 : index
    %0 = vector.load %arg1[%c0, %c0_0, %c0_1] : memref<1x16x32xf32, #tpu.memory_space<vmem>>, vector<1x16x32xf32>
    %1 = vector.shape_cast %0 : vector<1x16x32xf32> to vector<16x32xf32>
    %c0_2 = arith.constant 0 : index
    %c0_3 = arith.constant 0 : index
    %2 = vector.load %arg7[%c0_2, %c0_3] : memref<256x32xf32, #tpu.memory_space<vmem>>, vector<256x32xf32>
    %c0_4 = arith.constant 0 : index
    %c0_5 = arith.constant 0 : index
    %c0_6 = arith.constant 0 : index
    %3 = vector.load %arg2[%c0_4, %c0_5, %c0_6] : memref<1x16x16xf32, #tpu.memory_space<vmem>>, vector<1x16x16xf32>
    %4 = vector.shape_cast %3 : vector<1x16x16xf32> to vector<16x16xf32>
    %5 = tpu.concatenate %4, %4, %4, %4, %4, %4, %4, %4, %4, %4, %4, %4, %4, %4, %4, %4 in 0 : vector<16x16xf32>, vector<16x16xf32>, vector<16x16xf32>, vector<16x16xf32>, vector<16x16xf32>, vector<16x16xf32>, vector<16x16xf32>, vector<16x16xf32>, vector<16x16xf32>, vector<16x16xf32>, vector<16x16xf32>, vector<16x16xf32>, vector<16x16xf32>, vector<16x16xf32>, vector<16x16xf32>, vector<16x16xf32> -> vector<256x16xf32>
    %c0_7 = arith.constant 0 : index
    %c0_8 = arith.constant 0 : index
    %c0_9 = arith.constant 0 : index
    %6 = vector.load %arg8[%c0_7, %c0_8, %c0_9] : memref<2x32x96xf32, #tpu.memory_space<vmem>>, vector<1x32x96xf32>
    %7 = vector.shape_cast %6 : vector<1x32x96xf32> to vector<32x96xf32>
    %cst = arith.constant dense<0.000000e+00> : vector<16x96xf32>
    %8 = tpu.matmul %1, %7, %cst {dimension_numbers = #tpu.dot_dimension_numbers<[1], [0], [0], [1], [0, 0, 1, 1], [], []>} : vector<16x32xf32>, vector<32x96xf32>, vector<16x96xf32> -> vector<16x96xf32>
    %c0_10 = arith.constant 0 : index
    %c0_11 = arith.constant 0 : index
    %c0_12 = arith.constant 0 : index
    %9 = vector.load %arg9[%c0_10, %c0_11, %c0_12] : memref<2x1x96xf32, #tpu.memory_space<vmem>>, vector<1x1x96xf32>
    %10 = vector.shape_cast %9 : vector<1x1x96xf32> to vector<1x96xf32>
    %11 = vector.broadcast %10 : vector<1x96xf32> to vector<16x96xf32>
    %12 = arith.addf %8, %11 : vector<16x96xf32>
    %13 = vector.extract_strided_slice %12 {offsets = [0, 0], sizes = [16, 32], strides = [1, 1]} : vector<16x96xf32> to vector<16x32xf32>
    %cst_13 = arith.constant 0.707106769 : f32
    %14 = vector.broadcast %cst_13 : f32 to vector<16x32xf32>
    %15 = arith.mulf %13, %14 : vector<16x32xf32>
    %16 = vector.extract_strided_slice %12 {offsets = [0, 32], sizes = [16, 32], strides = [1, 1]} : vector<16x96xf32> to vector<16x32xf32>
    %17 = vector.extract_strided_slice %12 {offsets = [0, 64], sizes = [16, 32], strides = [1, 1]} : vector<16x96xf32> to vector<16x32xf32>
    %18 = tpu.concatenate %15, %15, %15, %15, %15, %15, %15, %15, %15, %15, %15, %15, %15, %15, %15, %15 in 0 : vector<16x32xf32>, vector<16x32xf32>, vector<16x32xf32>, vector<16x32xf32>, vector<16x32xf32>, vector<16x32xf32>, vector<16x32xf32>, vector<16x32xf32>, vector<16x32xf32>, vector<16x32xf32>, vector<16x32xf32>, vector<16x32xf32>, vector<16x32xf32>, vector<16x32xf32>, vector<16x32xf32>, vector<16x32xf32> -> vector<256x32xf32>
    %19 = arith.mulf %18, %2 : vector<256x32xf32>
    %cst_14 = arith.constant dense<0.000000e+00> : vector<256x16xf32>
    %20 = tpu.matmul %19, %16, %cst_14 {dimension_numbers = #tpu.dot_dimension_numbers<[1], [1], [0], [0], [0, 0, 1, 0], [], []>} : vector<256x32xf32>, vector<16x32xf32>, vector<256x16xf32> -> vector<256x16xf32>
    %21 = arith.addf %20, %5 : vector<256x16xf32>
    %cst_15 = arith.constant dense<0xFF800000> : vector<256xf32>
    %22 = vector.multi_reduction <maximumf>, %21, %cst_15 [1] : vector<256x16xf32> to vector<256xf32>
    %23 = vector.shape_cast %22 : vector<256xf32> to vector<256x1xf32>
    %24 = vector.broadcast %23 : vector<256x1xf32> to vector<256x16xf32>
    %25 = arith.subf %21, %24 : vector<256x16xf32>
    %26 = math.exp %25 : vector<256x16xf32>
    %cst_16 = arith.constant dense<0.000000e+00> : vector<256xf32>
    %27 = vector.multi_reduction <add>, %26, %cst_16 [1] : vector<256x16xf32> to vector<256xf32>
    %28 = vector.shape_cast %27 : vector<256xf32> to vector<256x1xf32>
    %29 = vector.broadcast %28 : vector<256x1xf32> to vector<256x16xf32>
    %30 = arith.divf %26, %29 : vector<256x16xf32>
    %cst_17 = arith.constant dense<0.000000e+00> : vector<256x32xf32>
    %31 = tpu.matmul %30, %17, %cst_17 {dimension_numbers = #tpu.dot_dimension_numbers<[1], [0], [0], [1], [0, 0, 1, 1], [], []>} : vector<256x16xf32>, vector<16x32xf32>, vector<256x32xf32> -> vector<256x32xf32>
    %32 = arith.mulf %31, %2 : vector<256x32xf32>
    %33 = vector.extract_strided_slice %32 {offsets = [0, 0], sizes = [16, 32], strides = [1, 1]} : vector<256x32xf32> to vector<16x32xf32>
    %34 = vector.extract_strided_slice %32 {offsets = [16, 0], sizes = [16, 32], strides = [1, 1]} : vector<256x32xf32> to vector<16x32xf32>
    %35 = arith.addf %33, %34 : vector<16x32xf32>
    %36 = vector.extract_strided_slice %32 {offsets = [32, 0], sizes = [16, 32], strides = [1, 1]} : vector<256x32xf32> to vector<16x32xf32>
    %37 = arith.addf %35, %36 : vector<16x32xf32>
    %38 = vector.extract_strided_slice %32 {offsets = [48, 0], sizes = [16, 32], strides = [1, 1]} : vector<256x32xf32> to vector<16x32xf32>
    %39 = arith.addf %37, %38 : vector<16x32xf32>
    %40 = vector.extract_strided_slice %32 {offsets = [64, 0], sizes = [16, 32], strides = [1, 1]} : vector<256x32xf32> to vector<16x32xf32>
    %41 = arith.addf %39, %40 : vector<16x32xf32>
    %42 = vector.extract_strided_slice %32 {offsets = [80, 0], sizes = [16, 32], strides = [1, 1]} : vector<256x32xf32> to vector<16x32xf32>
    %43 = arith.addf %41, %42 : vector<16x32xf32>
    %44 = vector.extract_strided_slice %32 {offsets = [96, 0], sizes = [16, 32], strides = [1, 1]} : vector<256x32xf32> to vector<16x32xf32>
    %45 = arith.addf %43, %44 : vector<16x32xf32>
    %46 = vector.extract_strided_slice %32 {offsets = [112, 0], sizes = [16, 32], strides = [1, 1]} : vector<256x32xf32> to vector<16x32xf32>
    %47 = arith.addf %45, %46 : vector<16x32xf32>
    %48 = vector.extract_strided_slice %32 {offsets = [128, 0], sizes = [16, 32], strides = [1, 1]} : vector<256x32xf32> to vector<16x32xf32>
    %49 = arith.addf %47, %48 : vector<16x32xf32>
    %50 = vector.extract_strided_slice %32 {offsets = [144, 0], sizes = [16, 32], strides = [1, 1]} : vector<256x32xf32> to vector<16x32xf32>
    %51 = arith.addf %49, %50 : vector<16x32xf32>
    %52 = vector.extract_strided_slice %32 {offsets = [160, 0], sizes = [16, 32], strides = [1, 1]} : vector<256x32xf32> to vector<16x32xf32>
    %53 = arith.addf %51, %52 : vector<16x32xf32>
    %54 = vector.extract_strided_slice %32 {offsets = [176, 0], sizes = [16, 32], strides = [1, 1]} : vector<256x32xf32> to vector<16x32xf32>
    %55 = arith.addf %53, %54 : vector<16x32xf32>
    %56 = vector.extract_strided_slice %32 {offsets = [192, 0], sizes = [16, 32], strides = [1, 1]} : vector<256x32xf32> to vector<16x32xf32>
    %57 = arith.addf %55, %56 : vector<16x32xf32>
    %58 = vector.extract_strided_slice %32 {offsets = [208, 0], sizes = [16, 32], strides = [1, 1]} : vector<256x32xf32> to vector<16x32xf32>
    %59 = arith.addf %57, %58 : vector<16x32xf32>
    %60 = vector.extract_strided_slice %32 {offsets = [224, 0], sizes = [16, 32], strides = [1, 1]} : vector<256x32xf32> to vector<16x32xf32>
    %61 = arith.addf %59, %60 : vector<16x32xf32>
    %62 = vector.extract_strided_slice %32 {offsets = [240, 0], sizes = [16, 32], strides = [1, 1]} : vector<256x32xf32> to vector<16x32xf32>
    %63 = arith.addf %61, %62 : vector<16x32xf32>
    %c0_18 = arith.constant 0 : index
    %c0_19 = arith.constant 0 : index
    %c0_20 = arith.constant 0 : index
    %64 = vector.load %arg10[%c0_18, %c0_19, %c0_20] : memref<2x32x32xf32, #tpu.memory_space<vmem>>, vector<1x32x32xf32>
    %65 = vector.shape_cast %64 : vector<1x32x32xf32> to vector<32x32xf32>
    %cst_21 = arith.constant dense<0.000000e+00> : vector<16x32xf32>
    %66 = tpu.matmul %63, %65, %cst_21 {dimension_numbers = #tpu.dot_dimension_numbers<[1], [0], [0], [1], [0, 0, 1, 1], [], []>} : vector<16x32xf32>, vector<32x32xf32>, vector<16x32xf32> -> vector<16x32xf32>
    %c0_22 = arith.constant 0 : index
    %c0_23 = arith.constant 0 : index
    %c0_24 = arith.constant 0 : index
    %67 = vector.load %arg11[%c0_22, %c0_23, %c0_24] : memref<2x1x32xf32, #tpu.memory_space<vmem>>, vector<1x1x32xf32>
    %68 = vector.shape_cast %67 : vector<1x1x32xf32> to vector<1x32xf32>
    %69 = vector.broadcast %68 : vector<1x32xf32> to vector<16x32xf32>
    %70 = arith.addf %66, %69 : vector<16x32xf32>
    %c1 = arith.constant 1 : index
    %c0_25 = arith.constant 0 : index
    %c0_26 = arith.constant 0 : index
    %71 = vector.load %arg8[%c1, %c0_25, %c0_26] : memref<2x32x96xf32, #tpu.memory_space<vmem>>, vector<1x32x96xf32>
    %72 = vector.shape_cast %71 : vector<1x32x96xf32> to vector<32x96xf32>
    %cst_27 = arith.constant dense<0.000000e+00> : vector<16x96xf32>
    %73 = tpu.matmul %70, %72, %cst_27 {dimension_numbers = #tpu.dot_dimension_numbers<[1], [0], [0], [1], [0, 0, 1, 1], [], []>} : vector<16x32xf32>, vector<32x96xf32>, vector<16x96xf32> -> vector<16x96xf32>
    %c1_28 = arith.constant 1 : index
    %c0_29 = arith.constant 0 : index
    %c0_30 = arith.constant 0 : index
    %74 = vector.load %arg9[%c1_28, %c0_29, %c0_30] : memref<2x1x96xf32, #tpu.memory_space<vmem>>, vector<1x1x96xf32>
    %75 = vector.shape_cast %74 : vector<1x1x96xf32> to vector<1x96xf32>
    %76 = vector.broadcast %75 : vector<1x96xf32> to vector<16x96xf32>
    %77 = arith.addf %73, %76 : vector<16x96xf32>
    %78 = vector.extract_strided_slice %77 {offsets = [0, 0], sizes = [16, 32], strides = [1, 1]} : vector<16x96xf32> to vector<16x32xf32>
    %cst_31 = arith.constant 0.707106769 : f32
    %79 = vector.broadcast %cst_31 : f32 to vector<16x32xf32>
    %80 = arith.mulf %78, %79 : vector<16x32xf32>
    %81 = vector.extract_strided_slice %77 {offsets = [0, 32], sizes = [16, 32], strides = [1, 1]} : vector<16x96xf32> to vector<16x32xf32>
    %82 = vector.extract_strided_slice %77 {offsets = [0, 64], sizes = [16, 32], strides = [1, 1]} : vector<16x96xf32> to vector<16x32xf32>
    %83 = tpu.concatenate %80, %80, %80, %80, %80, %80, %80, %80, %80, %80, %80, %80, %80, %80, %80, %80 in 0 : vector<16x32xf32>, vector<16x32xf32>, vector<16x32xf32>, vector<16x32xf32>, vector<16x32xf32>, vector<16x32xf32>, vector<16x32xf32>, vector<16x32xf32>, vector<16x32xf32>, vector<16x32xf32>, vector<16x32xf32>, vector<16x32xf32>, vector<16x32xf32>, vector<16x32xf32>, vector<16x32xf32>, vector<16x32xf32> -> vector<256x32xf32>
    %84 = arith.mulf %83, %2 : vector<256x32xf32>
    %cst_32 = arith.constant dense<0.000000e+00> : vector<256x16xf32>
    %85 = tpu.matmul %84, %81, %cst_32 {dimension_numbers = #tpu.dot_dimension_numbers<[1], [1], [0], [0], [0, 0, 1, 0], [], []>} : vector<256x32xf32>, vector<16x32xf32>, vector<256x16xf32> -> vector<256x16xf32>
    %86 = arith.addf %85, %5 : vector<256x16xf32>
    %cst_33 = arith.constant dense<0xFF800000> : vector<256xf32>
    %87 = vector.multi_reduction <maximumf>, %86, %cst_33 [1] : vector<256x16xf32> to vector<256xf32>
    %88 = vector.shape_cast %87 : vector<256xf32> to vector<256x1xf32>
    %89 = vector.broadcast %88 : vector<256x1xf32> to vector<256x16xf32>
    %90 = arith.subf %86, %89 : vector<256x16xf32>
    %91 = math.exp %90 : vector<256x16xf32>
    %cst_34 = arith.constant dense<0.000000e+00> : vector<256xf32>
    %92 = vector.multi_reduction <add>, %91, %cst_34 [1] : vector<256x16xf32> to vector<256xf32>
    %93 = vector.shape_cast %92 : vector<256xf32> to vector<256x1xf32>
    %94 = vector.broadcast %93 : vector<256x1xf32> to vector<256x16xf32>
    %95 = arith.divf %91, %94 : vector<256x16xf32>
    %cst_35 = arith.constant dense<0.000000e+00> : vector<256x32xf32>
    %96 = tpu.matmul %95, %82, %cst_35 {dimension_numbers = #tpu.dot_dimension_numbers<[1], [0], [0], [1], [0, 0, 1, 1], [], []>} : vector<256x16xf32>, vector<16x32xf32>, vector<256x32xf32> -> vector<256x32xf32>
    %97 = arith.mulf %96, %2 : vector<256x32xf32>
    %98 = vector.extract_strided_slice %97 {offsets = [0, 0], sizes = [16, 32], strides = [1, 1]} : vector<256x32xf32> to vector<16x32xf32>
    %99 = vector.extract_strided_slice %97 {offsets = [16, 0], sizes = [16, 32], strides = [1, 1]} : vector<256x32xf32> to vector<16x32xf32>
    %100 = arith.addf %98, %99 : vector<16x32xf32>
    %101 = vector.extract_strided_slice %97 {offsets = [32, 0], sizes = [16, 32], strides = [1, 1]} : vector<256x32xf32> to vector<16x32xf32>
    %102 = arith.addf %100, %101 : vector<16x32xf32>
    %103 = vector.extract_strided_slice %97 {offsets = [48, 0], sizes = [16, 32], strides = [1, 1]} : vector<256x32xf32> to vector<16x32xf32>
    %104 = arith.addf %102, %103 : vector<16x32xf32>
    %105 = vector.extract_strided_slice %97 {offsets = [64, 0], sizes = [16, 32], strides = [1, 1]} : vector<256x32xf32> to vector<16x32xf32>
    %106 = arith.addf %104, %105 : vector<16x32xf32>
    %107 = vector.extract_strided_slice %97 {offsets = [80, 0], sizes = [16, 32], strides = [1, 1]} : vector<256x32xf32> to vector<16x32xf32>
    %108 = arith.addf %106, %107 : vector<16x32xf32>
    %109 = vector.extract_strided_slice %97 {offsets = [96, 0], sizes = [16, 32], strides = [1, 1]} : vector<256x32xf32> to vector<16x32xf32>
    %110 = arith.addf %108, %109 : vector<16x32xf32>
    %111 = vector.extract_strided_slice %97 {offsets = [112, 0], sizes = [16, 32], strides = [1, 1]} : vector<256x32xf32> to vector<16x32xf32>
    %112 = arith.addf %110, %111 : vector<16x32xf32>
    %113 = vector.extract_strided_slice %97 {offsets = [128, 0], sizes = [16, 32], strides = [1, 1]} : vector<256x32xf32> to vector<16x32xf32>
    %114 = arith.addf %112, %113 : vector<16x32xf32>
    %115 = vector.extract_strided_slice %97 {offsets = [144, 0], sizes = [16, 32], strides = [1, 1]} : vector<256x32xf32> to vector<16x32xf32>
    %116 = arith.addf %114, %115 : vector<16x32xf32>
    %117 = vector.extract_strided_slice %97 {offsets = [160, 0], sizes = [16, 32], strides = [1, 1]} : vector<256x32xf32> to vector<16x32xf32>
    %118 = arith.addf %116, %117 : vector<16x32xf32>
    %119 = vector.extract_strided_slice %97 {offsets = [176, 0], sizes = [16, 32], strides = [1, 1]} : vector<256x32xf32> to vector<16x32xf32>
    %120 = arith.addf %118, %119 : vector<16x32xf32>
    %121 = vector.extract_strided_slice %97 {offsets = [192, 0], sizes = [16, 32], strides = [1, 1]} : vector<256x32xf32> to vector<16x32xf32>
    %122 = arith.addf %120, %121 : vector<16x32xf32>
    %123 = vector.extract_strided_slice %97 {offsets = [208, 0], sizes = [16, 32], strides = [1, 1]} : vector<256x32xf32> to vector<16x32xf32>
    %124 = arith.addf %122, %123 : vector<16x32xf32>
    %125 = vector.extract_strided_slice %97 {offsets = [224, 0], sizes = [16, 32], strides = [1, 1]} : vector<256x32xf32> to vector<16x32xf32>
    %126 = arith.addf %124, %125 : vector<16x32xf32>
    %127 = vector.extract_strided_slice %97 {offsets = [240, 0], sizes = [16, 32], strides = [1, 1]} : vector<256x32xf32> to vector<16x32xf32>
    %128 = arith.addf %126, %127 : vector<16x32xf32>
    %c1_36 = arith.constant 1 : index
    %c0_37 = arith.constant 0 : index
    %c0_38 = arith.constant 0 : index
    %129 = vector.load %arg10[%c1_36, %c0_37, %c0_38] : memref<2x32x32xf32, #tpu.memory_space<vmem>>, vector<1x32x32xf32>
    %130 = vector.shape_cast %129 : vector<1x32x32xf32> to vector<32x32xf32>
    %cst_39 = arith.constant dense<0.000000e+00> : vector<16x32xf32>
    %131 = tpu.matmul %128, %130, %cst_39 {dimension_numbers = #tpu.dot_dimension_numbers<[1], [0], [0], [1], [0, 0, 1, 1], [], []>} : vector<16x32xf32>, vector<32x32xf32>, vector<16x32xf32> -> vector<16x32xf32>
    %c1_40 = arith.constant 1 : index
    %c0_41 = arith.constant 0 : index
    %c0_42 = arith.constant 0 : index
    %132 = vector.load %arg11[%c1_40, %c0_41, %c0_42] : memref<2x1x32xf32, #tpu.memory_space<vmem>>, vector<1x1x32xf32>
    %133 = vector.shape_cast %132 : vector<1x1x32xf32> to vector<1x32xf32>
    %134 = vector.broadcast %133 : vector<1x32xf32> to vector<16x32xf32>
    %135 = arith.addf %131, %134 : vector<16x32xf32>
    %c0_43 = arith.constant 0 : index
    %c0_44 = arith.constant 0 : index
    %c0_45 = arith.constant 0 : index
    %136 = vector.load %arg3[%c0_43, %c0_44, %c0_45] : memref<1x16x1xf32, #tpu.memory_space<vmem>>, vector<1x16x1xf32>
    %137 = vector.shape_cast %136 : vector<1x16x1xf32> to vector<16x1xf32>
    %138 = vector.broadcast %137 : vector<16x1xf32> to vector<16x32xf32>
    %139 = arith.mulf %135, %138 : vector<16x32xf32>
    %cst_46 = arith.constant dense<0.000000e+00> : vector<32xf32>
    %140 = vector.multi_reduction <add>, %139, %cst_46 [0] : vector<16x32xf32> to vector<32xf32>
    %141 = vector.shape_cast %140 : vector<32xf32> to vector<1x32xf32>
    %c0_47 = arith.constant 0 : index
    %c0_48 = arith.constant 0 : index
    %c0_49 = arith.constant 0 : index
    %142 = vector.load %arg4[%c0_47, %c0_48, %c0_49] : memref<1x1x1xf32, #tpu.memory_space<vmem>>, vector<1x1x1xf32>
    %143 = vector.shape_cast %142 : vector<1x1x1xf32> to vector<1x1xf32>
    %144 = vector.broadcast %143 : vector<1x1xf32> to vector<1x32xf32>
    %145 = arith.divf %141, %144 : vector<1x32xf32>
    %c0_50 = arith.constant 0 : index
    %c0_51 = arith.constant 0 : index
    %146 = vector.load %arg6[%c0_50, %c0_51] : memref<1x1xf32, #tpu.memory_space<vmem>>, vector<1x1xf32>
    %147 = arith.negf %146 : vector<1x1xf32>
    %148 = math.exp %147 : vector<1x1xf32>
    %cst_52 = arith.constant 1.000000e+00 : f32
    %149 = vector.broadcast %cst_52 : f32 to vector<1x1xf32>
    %150 = arith.addf %149, %148 : vector<1x1xf32>
    %151 = arith.divf %149, %150 : vector<1x1xf32>
    %c0_53 = arith.constant 0 : index
    %c0_54 = arith.constant 0 : index
    %c0_55 = arith.constant 0 : index
    %152 = vector.load %arg5[%c0_53, %c0_54, %c0_55] : memref<1x1x32xf32, #tpu.memory_space<vmem>>, vector<1x1x32xf32>
    %153 = vector.shape_cast %152 : vector<1x1x32xf32> to vector<1x32xf32>
    %154 = vector.broadcast %151 : vector<1x1xf32> to vector<1x32xf32>
    %155 = arith.mulf %154, %153 : vector<1x32xf32>
    %cst_56 = arith.constant 1.000000e+00 : f32
    %156 = vector.broadcast %cst_56 : f32 to vector<1x1xf32>
    %157 = arith.subf %156, %151 : vector<1x1xf32>
    %158 = vector.broadcast %157 : vector<1x1xf32> to vector<1x32xf32>
    %159 = arith.mulf %158, %145 : vector<1x32xf32>
    %160 = arith.addf %155, %159 : vector<1x32xf32>
    %c0_57 = arith.constant 0 : index
    %c0_58 = arith.constant 0 : index
    %c0_59 = arith.constant 0 : index
    %161 = vector.load %arg12[%c0_57, %c0_58, %c0_59] : memref<1x1x32xf32, #tpu.memory_space<vmem>>, vector<1x1x32xf32>
    %162 = vector.shape_cast %161 : vector<1x1x32xf32> to vector<1x32xf32>
    %163 = vector.shape_cast %160 : vector<1x32xf32> to vector<1x1x32xf32>
    tpu.vector_store %arg12[%c0_57, %c0_58, %c0_59], %163 {strides = array<i32>} : memref<1x1x32xf32, #tpu.memory_space<vmem>>, vector<1x1x32xf32>,
    return
  }
  func.func @transform_0(%arg0: i32) -> (i32, i32, i32) {
    %c0_i32 = arith.constant 0 : i32
    %c0_i32_0 = arith.constant 0 : i32
    %c0_i32_1 = arith.constant 0 : i32
    return %arg0, %c0_i32, %c0_i32_0 : i32, i32, i32
  }
  func.func @transform_1(%arg0: i32) -> (i32, i32, i32) {
    %c0_i32 = arith.constant 0 : i32
    %c0_i32_0 = arith.constant 0 : i32
    %c0_i32_1 = arith.constant 0 : i32
    return %arg0, %c0_i32, %c0_i32_0 : i32, i32, i32
  }
  func.func @transform_2(%arg0: i32) -> (i32, i32, i32) {
    %c0_i32 = arith.constant 0 : i32
    %c0_i32_0 = arith.constant 0 : i32
    %c0_i32_1 = arith.constant 0 : i32
    return %arg0, %c0_i32, %c0_i32_0 : i32, i32, i32
  }
  func.func @transform_3(%arg0: i32) -> (i32, i32, i32) {
    %c0_i32 = arith.constant 0 : i32
    %c0_i32_0 = arith.constant 0 : i32
    %c0_i32_1 = arith.constant 0 : i32
    return %arg0, %c0_i32, %c0_i32_0 : i32, i32, i32
  }
  func.func @transform_4(%arg0: i32) -> (i32, i32, i32) {
    %c0_i32 = arith.constant 0 : i32
    %c0_i32_0 = arith.constant 0 : i32
    %c0_i32_1 = arith.constant 0 : i32
    return %arg0, %c0_i32, %c0_i32_0 : i32, i32, i32
  }
  func.func @transform_5(%arg0: i32) -> (i32, i32) {
    %c0_i32 = arith.constant 0 : i32
    %c0_i32_0 = arith.constant 0 : i32
    %c0_i32_1 = arith.constant 0 : i32
    return %c0_i32, %c0_i32_0 : i32, i32
  }
  func.func @transform_6(%arg0: i32) -> (i32, i32) {
    %c0_i32 = arith.constant 0 : i32
    %c0_i32_0 = arith.constant 0 : i32
    %c0_i32_1 = arith.constant 0 : i32
    return %c0_i32, %c0_i32_0 : i32, i32
  }
  func.func @transform_7(%arg0: i32) -> (i32, i32, i32) {
    %c0_i32 = arith.constant 0 : i32
    %c0_i32_0 = arith.constant 0 : i32
    %c0_i32_1 = arith.constant 0 : i32
    %c0_i32_2 = arith.constant 0 : i32
    return %c0_i32, %c0_i32_0, %c0_i32_1 : i32, i32, i32
  }
  func.func @transform_8(%arg0: i32) -> (i32, i32, i32) {
    %c0_i32 = arith.constant 0 : i32
    %c0_i32_0 = arith.constant 0 : i32
    %c0_i32_1 = arith.constant 0 : i32
    %c0_i32_2 = arith.constant 0 : i32
    return %c0_i32, %c0_i32_0, %c0_i32_1 : i32, i32, i32
  }
  func.func @transform_9(%arg0: i32) -> (i32, i32, i32) {
    %c0_i32 = arith.constant 0 : i32
    %c0_i32_0 = arith.constant 0 : i32
    %c0_i32_1 = arith.constant 0 : i32
    %c0_i32_2 = arith.constant 0 : i32
    return %c0_i32, %c0_i32_0, %c0_i32_1 : i32, i32, i32
  }
  func.func @transform_10(%arg0: i32) -> (i32, i32, i32) {
    %c0_i32 = arith.constant 0 : i32
    %c0_i32_0 = arith.constant 0 : i32
    %c0_i32_1 = arith.constant 0 : i32
    %c0_i32_2 = arith.constant 0 : i32
    return %c0_i32, %c0_i32_0, %c0_i32_1 : i32, i32, i32
  }
  func.func @transform_11(%arg0: i32) -> (i32, i32, i32) {
    %c0_i32 = arith.constant 0 : i32
    %c0_i32_0 = arith.constant 0 : i32
    %c0_i32_1 = arith.constant 0 : i32
    return %arg0, %c0_i32, %c0_i32_0 : i32, i32, i32
  }
}

</mosaic_0001>

<bundles_post_ra>
// kernel: eq.8
= control target key start
LH: loop header
LB: loop body
LE: loop exit
PB: predicated region body
PF: predicated region fallthrough
CT: control target
= control target key end

     0   :  { %s7_s6 = smov 3  ;;  %s21_s9 = smov 3  ;;  %vm4_vm0 = vcmask 130048   ;;  %vm11_vm1 = vcmask 1048448   ;;  %vm18_vm2 = vcmask 917248   ;;  %vm25_vm3 = vcmask 786048   ;;  %s119_s0 = inlined_call_operand.vmem [shape: s32[16,16], index: 0, kind: input, shape index: {}]   ;;  %s120_s1 = inlined_call_operand.vmem [shape: s32[256], index: 1, kind: output, shape index: {}]  }
   0x1   :  { %v61_v0 = vld [vmem:[%s119_s0 + $0x7] ss:$8 sm:%s7_s6]   ;;  %s75_s10 = smov 112   ;;  %v63_v1 = vld [vmem:[%s119_s0 + $0x5] ss:$8 sm:%s21_s9]   ;;  %s14_s13 = smov 3 }
   0x2   :  { %9 = vrot.lane.b32.xlu0 %v61_v0, %s75_s10  ;;  %s76_s14 = smov 80   ;;  %v62_v2 = vld [vmem:[%s119_s0 + $0x6] ss:$8 sm:%s14_s13]   ;;  %s28_s17 = smov 3  ;;  %vm32_vm4 = vcmask 654848   ;;  %vm39_vm5 = vcmask 523648  }
   0x3   :  { %23 = vrot.lane.b32.xlu1 %v63_v1, %s76_s14  ;;  %v64_v3 = vld [vmem:[%s119_s0 + $0x4] ss:$8 sm:%s28_s17]   ;;  %s35_s20 = smov 3  ;;  %s42_s21 = smov 3  ;;  %vm46_vm6 = vcmask 392448   ;;  %vm53_vm7 = vcmask 261248  }
   0x4   :  { %s77_s22 = smov 96   ;;  %s78_s23 = smov 64   ;;  %v65_v4 = vld [vmem:[%s119_s0 + $0x3] ss:$8 sm:%s35_s20]   ;;  %v66_v5 = vld [vmem:[%s119_s0 + $0x2] ss:$8 sm:%s42_s21]  }
   0x5   :  { %s2_s26 = smov 3  ;;  %s49_s29 = smov 3 }
   0x6   :  { %16 = vrot.lane.b32.xlu0 %v62_v2, %s77_s22  ;;  %v3_v6 = vld [vmem:[%s119_s0] ss:$8 sm:%s2_s26]   ;;  %s79_s3 = smov 48   ;;  %s80_s4 = smov 32  }
   0x7   :  { %30 = vrot.lane.b32.xlu1 %v64_v3, %s78_s23  ;;  %5 = vst.msk [vmem:[#allocation0] sm:$0x3] %vm4_vm0, %v3_v6   ;;  %v67_v7 = vld [vmem:[%s119_s0 + $0x1] ss:$8 sm:%s49_s29]   ;;  %s81_s0 = smov 16  }
   0xa   :  { %37 = vrot.lane.b32.xlu0 %v65_v4, %s79_s3 }
   0xb   :  { %44 = vrot.lane.b32.xlu1 %v66_v5, %s80_s4 }
   0xe   :  { %51 = vrot.lane.b32.xlu0 %v67_v7, %s81_s0 }
  0x74   :  { %v10_v8 = vpop.permute.xlu0 %9  }
  0x75   :  { %12 = vst.msk [vmem:[#allocation0] sm:$0x3] %vm11_vm1, %v10_v8   ;;  %v24_v9 = vpop.permute.xlu1 %23  }
  0x78   :  { %v17_v10 = vpop.permute.xlu0 %16  }
  0x79   :  { %19 = vst.msk [vmem:[#allocation0] sm:$0x3] %vm18_vm2, %v17_v10   ;;  %v31_v11 = vpop.permute.xlu1 %30  }
  0x7a   :  { %26 = vst.msk [vmem:[#allocation0] sm:$0x3] %vm25_vm3, %v24_v9  }
  0x7b   :  { %33 = vst.msk [vmem:[#allocation0] sm:$0x3] %vm32_vm4, %v31_v11  }
  0x7c   :  { %v38_v12 = vpop.permute.xlu0 %37  }
  0x7d   :  { %40 = vst.msk [vmem:[#allocation0] sm:$0x3] %vm39_vm5, %v38_v12   ;;  %v45_v13 = vpop.permute.xlu1 %44  }
  0x7e   :  { %47 = vst.msk [vmem:[#allocation0] sm:$0x3] %vm46_vm6, %v45_v13  }
  0x80   :  { %v52_v14 = vpop.permute.xlu0 %51  }
  0x81   :  { %54 = vst.msk [vmem:[#allocation0] sm:$0x3] %vm53_vm7, %v52_v14  }
  0x88   :  { %v58_v15 = vld [vmem:[#allocation0] sm:$0x3] }
  0x89   :  { %60 = vst [vmem:[%s120_s1] sm:$0x3] %v58_v15 }

// kernel: t3s_forward.2
= control target key start
LH: loop header
LB: loop body
LE: loop exit
PB: predicated region body
PF: predicated region fallthrough
CT: control target
= control target key end

     0   :  { %v509_v0 = vmov 0   ;;  %v510_v17 = vmov 1   ;;  %s709_s0 = inlined_call_operand.vmem [shape: f32[16,8,2], index: 0, kind: input, shape index: {}]   ;;  %s710_s2 = inlined_call_operand.vmem [shape: f32[32,128], index: 2, kind: input, shape index: {}]   ;;  %s711_s4 = inlined_call_operand.vmem [shape: f32[8,32], index: 4, kind: output, shape index: {}]   ;;  %s712_s1 = inlined_call_operand.vmem [shape: f32[2,128], index: 1, kind: input, shape index: {}]   ;;  %s713_s3 = inlined_call_operand.vmem [shape: f32[1,128], index: 3, kind: input, shape index: {}]  }
   0x1   :  { %474 = vset.pattern.permute.xlu1 %v509_v0  ;;  %473 = vset.pattern.permute.xlu0 %v509_v0  ;;  %v19_v1 = vld [vmem:[%s709_s0 + $0x10] sm:$0xff]  ;;  %v17_v2 = vld [vmem:[%s709_s0] sm:$0xff]  ;;  %v20_v3 = vld [vmem:[%s709_s0 + $0x18] sm:$0xff] }
   0x2   :  { %48 = vperm.xlu1 %474, %v19_v1   ;;  %38 = vperm.xlu0 %473, %v17_v2   ;;  %v18_v4 = vld [vmem:[%s709_s0 + $0x8] sm:$0xff]  ;;  %v21_v6 = vld [vmem:[%s709_s0 + $0x20] sm:$0xff]  ;;  %v24_v7 = vld [vmem:[%s709_s0 + $0x38] sm:$0xff] }
   0x3   :  { %v22_v5 = vld [vmem:[%s709_s0 + $0x28] sm:$0xff]  ;;  %v23_v8 = vld [vmem:[%s709_s0 + $0x30] sm:$0xff]  ;;  %v25_v10 = vld [vmem:[%s709_s0 + $0x40] sm:$0xff] }
   0x4   :  { %v26_v9 = vld [vmem:[%s709_s0 + $0x48] sm:$0xff]  ;;  %v28_v11 = vld [vmem:[%s709_s0 + $0x58] sm:$0xff]  ;;  %v27_v12 = vld [vmem:[%s709_s0 + $0x50] sm:$0xff] }
   0x5   :  { %v30_v13 = vld [vmem:[%s709_s0 + $0x68] sm:$0xff]  ;;  %v29_v14 = vld [vmem:[%s709_s0 + $0x60] sm:$0xff]  ;;  %v32_v15 = vld [vmem:[%s709_s0 + $0x78] sm:$0xff] }
   0x6   :  { %53 = vperm.xlu1 %474, %v20_v3   ;;  %43 = vperm.xlu0 %473, %v18_v4   ;;  %v31_v16 = vld [vmem:[%s709_s0 + $0x70] sm:$0xff]  ;;  %v593_v18 = vld [vmem:[%s710_s2] sm:$0xff]  ;;  %v598_v19 = vld [vmem:[%s710_s2 + $0x8] sm:$0xff] }
   0x7   :  { %v603_v20 = vld [vmem:[%s710_s2 + $0x10] sm:$0xff]  ;;  %v608_v21 = vld [vmem:[%s710_s2 + $0x18] sm:$0xff]  ;;  %v625_v38 = vld [vmem:[%s712_s1] ss:$0 sm:$0xff] }
   0x8   :  { %v630_v39 = vld [vmem:[%s712_s1 + $0x1] ss:$0 sm:$0xff]  ;;  %v639_v46 = vld [vmem:[%s713_s3] ss:$0 sm:$0xff]  ;;  %s691_s1 = smov 0  }
   0xa   :  { %63 = vperm.xlu1 %474, %v22_v5   ;;  %58 = vperm.xlu0 %473, %v21_v6  }
   0xe   :  { %73 = vperm.xlu1 %474, %v24_v7   ;;  %68 = vperm.xlu0 %473, %v23_v8  }
  0x12   :  { %83 = vperm.xlu1 %474, %v26_v9   ;;  %78 = vperm.xlu0 %473, %v25_v10  }
  0x16   :  { %93 = vperm.xlu1 %474, %v28_v11   ;;  %88 = vperm.xlu0 %473, %v27_v12  }
  0x1a   :  { %103 = vperm.xlu1 %474, %v30_v13   ;;  %98 = vperm.xlu0 %473, %v29_v14  }
  0x1e   :  { %113 = vperm.xlu1 %474, %v32_v15   ;;  %108 = vperm.xlu0 %473, %v31_v16  }
  0x22   :  { %476 = vset.pattern.permute.xlu1 %v510_v17  ;;  %475 = vset.pattern.permute.xlu0 %v510_v17 }
  0x23   :  { %141 = vperm.xlu1 %476, %v18_v4   ;;  %137 = vperm.xlu0 %475, %v17_v2  }
  0x27   :  { %145 = vperm.xlu1 %476, %v19_v1   ;;  %149 = vperm.xlu0 %475, %v20_v3  }
  0x2b   :  { %153 = vperm.xlu1 %476, %v21_v6   ;;  %157 = vperm.xlu0 %475, %v22_v5  }
  0x2f   :  { %161 = vperm.xlu1 %476, %v23_v8   ;;  %165 = vperm.xlu0 %475, %v24_v7  }
  0x33   :  { %169 = vperm.xlu1 %476, %v25_v10   ;;  %173 = vperm.xlu0 %475, %v26_v9  }
  0x37   :  { %177 = vperm.xlu1 %476, %v27_v12   ;;  %181 = vperm.xlu0 %475, %v28_v11  }
  0x3b   :  { %185 = vperm.xlu1 %476, %v29_v14   ;;  %189 = vperm.xlu0 %475, %v30_v13  }
  0x3f   :  { %193 = vperm.xlu1 %476, %v31_v16   ;;  %197 = vperm.xlu0 %475, %v32_v15  }
  0x81   :  { %v49_v22 = vpop.permute.xlu1 %48  ;;  %v39_v23 = vpop.permute.xlu0 %38 }
  0x82   :  { %v120_v42 = vmul.f32 %v625_v38, %v39_v23  ;;  %v122_v49 = vmul.f32 %v625_v38, %v49_v22 }
  0x85   :  { %v54_v24 = vpop.permute.xlu1 %53  ;;  %v44_v25 = vpop.permute.xlu0 %43 }
  0x86   :  { %v121_v43 = vmul.f32 %v625_v38, %v44_v25  ;;  %v123_v50 = vmul.f32 %v625_v38, %v54_v24 }
  0x89   :  { %v64_v26 = vpop.permute.xlu1 %63  ;;  %v59_v27 = vpop.permute.xlu0 %58 }
  0x8a   :  { %v125_v59 = vmul.f32 %v625_v38, %v64_v26  ;;  %v124_v60 = vmul.f32 %v625_v38, %v59_v27 }
  0x8d   :  { %v74_v28 = vpop.permute.xlu1 %73  ;;  %v69_v29 = vpop.permute.xlu0 %68 }
  0x8e   :  { %v127_v5 = vmul.f32 %v625_v38, %v74_v28  ;;  %v126_v6 = vmul.f32 %v625_v38, %v69_v29 }
  0x91   :  { %v84_v30 = vpop.permute.xlu1 %83  ;;  %v79_v31 = vpop.permute.xlu0 %78 }
  0x92   :  { %v129_v15 = vmul.f32 %v625_v38, %v84_v30  ;;  %v128_v16 = vmul.f32 %v625_v38, %v79_v31 }
  0x95   :  { %v610_v32 = vpop.permute.xlu1 %93  ;;  %v612_v33 = vpop.permute.xlu0 %88 }
  0x96   :  { %v131_v29 = vmul.f32 %v625_v38, %v610_v32  ;;  %v130_v30 = vmul.f32 %v625_v38, %v612_v33 }
  0x99   :  { %v614_v34 = vpop.permute.xlu1 %103  ;;  %v616_v35 = vpop.permute.xlu0 %98 }
  0x9a   :  { %v133_v32 = vmul.f32 %v625_v38, %v614_v34  ;;  %v132_v33 = vmul.f32 %v625_v38, %v616_v35 }
  0x9d   :  { %v618_v36 = vpop.permute.xlu1 %113  ;;  %v620_v37 = vpop.permute.xlu0 %108 }
  0x9e   :  { %v135_v34 = vmul.f32 %v625_v38, %v618_v36  ;;  %v134_v35 = vmul.f32 %v625_v38, %v620_v37  ;;  %v497_v37 = vmov 0.0   ;;  %v501_v38 = vmov 0.0  }
  0xa2   :  { %v142_v40 = vpop.permute.xlu1 %141  ;;  %v138_v41 = vpop.permute.xlu0 %137 }
  0xa3   :  { %v205_v44 = vmul.f32 %v630_v39, %v142_v40  ;;  %v204_v45 = vmul.f32 %v630_v39, %v138_v41 }
  0xa5   :  { %v221_v47 = vadd.f32 %v205_v44, %v121_v43  ;;  %v220_v48 = vadd.f32 %v204_v45, %v120_v42 }
  0xa6   :  { %v146_v51 = vpop.permute.xlu1 %145  ;;  %v150_v52 = vpop.permute.xlu0 %149 }
  0xa7   :  { %v243_v53 = vadd.f32 %v639_v46, %v221_v47  ;;  %v242_v54 = vadd.f32 %v639_v46, %v220_v48  ;;  %v206_v55 = vmul.f32 %v630_v39, %v146_v51  ;;  %v207_v56 = vmul.f32 %v630_v39, %v150_v52 }
  0xa9   :  { %259 = vst [vmem:[#allocation2 + $0x8] sm:$0xff] %v243_v53  ;;  %258 = vst [vmem:[#allocation2] sm:$0xff] %v242_v54  ;;  %v222_v57 = vadd.f32 %v206_v55, %v122_v49  ;;  %v223_v58 = vadd.f32 %v207_v56, %v123_v50 }
  0xaa   :  { %v154_v61 = vpop.permute.xlu1 %153  ;;  %v158_v62 = vpop.permute.xlu0 %157 }
  0xab   :  { %v244_v63 = vadd.f32 %v639_v46, %v222_v57  ;;  %v245_v0 = vadd.f32 %v639_v46, %v223_v58  ;;  %v208_v1 = vmul.f32 %v630_v39, %v154_v61  ;;  %v209_v2 = vmul.f32 %v630_v39, %v158_v62 }
  0xad   :  { %260 = vst [vmem:[#allocation2 + $0x10] sm:$0xff] %v244_v63  ;;  %261 = vst [vmem:[#allocation2 + $0x18] sm:$0xff] %v245_v0  ;;  %v224_v3 = vadd.f32 %v208_v1, %v124_v60  ;;  %v225_v4 = vadd.f32 %v209_v2, %v125_v59 }
  0xae   :  { %v162_v7 = vpop.permute.xlu1 %161  ;;  %v166_v8 = vpop.permute.xlu0 %165 }
  0xaf   :  { %v246_v9 = vadd.f32 %v639_v46, %v224_v3  ;;  %v247_v10 = vadd.f32 %v639_v46, %v225_v4  ;;  %v210_v11 = vmul.f32 %v630_v39, %v162_v7  ;;  %v211_v12 = vmul.f32 %v630_v39, %v166_v8 }
  0xb1   :  { %262 = vst [vmem:[#allocation2 + $0x20] sm:$0xff] %v246_v9  ;;  %263 = vst [vmem:[#allocation2 + $0x28] sm:$0xff] %v247_v10  ;;  %v226_v13 = vadd.f32 %v210_v11, %v126_v6  ;;  %v227_v14 = vadd.f32 %v211_v12, %v127_v5 }
  0xb2   :  { %v170_v17 = vpop.permute.xlu1 %169  ;;  %v174_v22 = vpop.permute.xlu0 %173 }
  0xb3   :  { %v248_v23 = vadd.f32 %v639_v46, %v226_v13  ;;  %v249_v24 = vadd.f32 %v639_v46, %v227_v14  ;;  %v212_v25 = vmul.f32 %v630_v39, %v170_v17  ;;  %v213_v26 = vmul.f32 %v630_v39, %v174_v22 }
  0xb5   :  { %264 = vst [vmem:[#allocation2 + $0x30] sm:$0xff] %v248_v23  ;;  %265 = vst [vmem:[#allocation2 + $0x38] sm:$0xff] %v249_v24  ;;  %v228_v27 = vadd.f32 %v212_v25, %v128_v16  ;;  %v229_v28 = vadd.f32 %v213_v26, %v129_v15 }
  0xb6   :  { %v178_v31 = vpop.permute.xlu1 %177  ;;  %v182_v40 = vpop.permute.xlu0 %181 }
  0xb7   :  { %v250_v41 = vadd.f32 %v639_v46, %v228_v27  ;;  %v251_v42 = vadd.f32 %v639_v46, %v229_v28  ;;  %v214_v43 = vmul.f32 %v630_v39, %v178_v31  ;;  %v215_v44 = vmul.f32 %v630_v39, %v182_v40 }
  0xb9   :  { %266 = vst [vmem:[#allocation2 + $0x40] sm:$0xff] %v250_v41  ;;  %267 = vst [vmem:[#allocation2 + $0x48] sm:$0xff] %v251_v42  ;;  %v230_v45 = vadd.f32 %v214_v43, %v130_v30  ;;  %v231_v47 = vadd.f32 %v215_v44, %v131_v29 }
  0xba   :  { %v186_v48 = vpop.permute.xlu1 %185  ;;  %v190_v49 = vpop.permute.xlu0 %189 }
  0xbb   :  { %v252_v50 = vadd.f32 %v639_v46, %v230_v45  ;;  %v253_v51 = vadd.f32 %v639_v46, %v231_v47  ;;  %v216_v52 = vmul.f32 %v630_v39, %v186_v48  ;;  %v217_v53 = vmul.f32 %v630_v39, %v190_v49 }
  0xbd   :  { %268 = vst [vmem:[#allocation2 + $0x50] sm:$0xff] %v252_v50  ;;  %269 = vst [vmem:[#allocation2 + $0x58] sm:$0xff] %v253_v51  ;;  %v232_v54 = vadd.f32 %v216_v52, %v132_v33  ;;  %v233_v55 = vadd.f32 %v217_v53, %v133_v32 }
  0xbe   :  { %v194_v56 = vpop.permute.xlu1 %193  ;;  %v198_v57 = vpop.permute.xlu0 %197 }
  0xbf   :  { %v254_v58 = vadd.f32 %v639_v46, %v232_v54  ;;  %v255_v59 = vadd.f32 %v639_v46, %v233_v55  ;;  %v218_v60 = vmul.f32 %v630_v39, %v194_v56  ;;  %v219_v61 = vmul.f32 %v630_v39, %v198_v57 }
  0xc1   :  { %270 = vst [vmem:[#allocation2 + $0x60] sm:$0xff] %v254_v58  ;;  %271 = vst [vmem:[#allocation2 + $0x68] sm:$0xff] %v255_v59  ;;  %v234_v62 = vadd.f32 %v218_v60, %v134_v35  ;;  %v235_v63 = vadd.f32 %v219_v61, %v135_v34 }
  0xc3   :  { %v256_v0 = vadd.f32 %v639_v46, %v234_v62  ;;  %v257_v36 = vadd.f32 %v639_v46, %v235_v63 }
  0xc5   :  { %272 = vst [vmem:[#allocation2 + $0x70] sm:$0xff] %v256_v0  ;;  %273 = vst [vmem:[#allocation2 + $0x78] sm:$0xff] %v257_v36 }
  0xc6 LB: > { %v436_v39 = vpack.c.bf16 %v598_v19, %v593_v18  ;;  %v511_v1 = vmov 0.0|0.0   ;;  %s512_s3 = smov 32   ;;  %v439_v46 = vpack.c.bf16 %v608_v21, %v603_v20  ;;  %vm513_vm0 = vmmov 0   ;;  %s416_s7 = sshll.u32 %s507_s1, 3  ;;  %s507_s1 = sphi %s691_s1, %s283_s1   ;;  %v503_v38 = vphi %v501_v38, %v502_v38   ;;  %v499_v37 = vphi %v497_v37, %v383_v37  }
  0xc7   : > { %435 = vmatprep.subr.bf16.mxu0 %v511_v1  ;;  %290 = vrot.lane.b32.xlu0 %v503_v38, %s512_s3  ;;  %v514_v2 = vmov 0.0   ;;  %vm292_vm1 = vcmask 261120   ;;  %s287_s8 = scalar_lea.vmem [#allocation2], %s416_s7  ;;  %s515_s9 = smov 64  }
  0xc8   : > { %437 = vmatpush3.bf16.msra.mxu0 %v436_v39  ;;  %432 = vmatprep.mubr.msk.f32.mxu0 %vm513_vm0, %v514_v2  ;;  %s283_s1 = sadd.s32 1, %s507_s1  }
  0xc9   : > { %438 = vmatprep.subr.bf16.mxu0 %v511_v1  ;;  %p280_p0 = scmp.ge.s32.totalorder %s283_s1, 16  }
  0xca   :  { %s516_s10 = smov (%p280_p0), 32  }
  0xcc   : > { %440 = vmatpush3.bf16.msra.mxu0 %v439_v46  ;;  %v288_v4 = vld [vmem:[%s287_s8] sm:$0xff] }
 0x139   : > { %v291_v3 = vpop.permute.xlu0 %290 }
 0x13a   : > { %433 = vmatmul.mubr.msk.f32.vlgmr.msra.gmra.mrb[0].mxu0 %vm292_vm1, %v291_v3 }
 0x20d   : > { %v361_v5 = vpop.f32.mrb[0].mxu0 }
 0x20e   : > { %v365_v6 = vadd.f32 %v361_v5, %v288_v4  ;;  %v434_v7 = vpop.f32.mrb[1].mxu0 }
 0x210   : > { %477 = vtanh.f32 %v365_v6  ;;  %v418_v9 = vmul.f32 -1.442695, %v365_v6 }
 0x212   : > { %479 = vpow2.f32 %v418_v9 }
 0x21a   : > { %v478_v8 = vpop.eup %477 }
 0x21b   : > { %375 = vrot.lane.b32.xlu0 %v478_v8, %s515_s9 }
 0x21c   : > { %v480_v10 = vpop.eup %479 }
 0x21d   : > { %v369_v11 = vadd.f32 1.0, %v480_v10 }
 0x21f   : > { %481 = vrcp.f32 %v369_v11 }
 0x229   : > { %v482_v12 = vpop.eup %481 }
 0x22a   : > { %v373_v15 = vmul.f32 %v499_v37, %v482_v12 }
 0x28d   : > { %v376_v13 = vpop.permute.xlu0 %375 }
 0x28e   : > { %v378_v14 = vmul.f32 %v482_v12, %v376_v13 }
 0x290   : > { %380 = vrot.lane.b32.xlu1 %v378_v14, %s512_s3 }
 0x302   : > { %v381_v16 = vpop.permute.xlu1 %380 }
 0x303   : > { %v383_v37 = vadd.f32 %v381_v16, %v373_v15  }
 0x305   : > { %483 = vtanh.f32 %v383_v37 }
 0x30f   : > { %v484_v17 = vpop.eup %483 }
 0x310   : > { %386 = vrot.lane.b32.xlu1 %v484_v17, %s515_s9 }
 0x37f   :  { %282 = sbr.rel (!%p280_p0) target bundleno = 198 (0xc6), region = 44 }
 0x382   : > { %v387_v22 = vpop.permute.xlu1 %386 }
 0x383   : > { %v389_v23 = vmul.f32 %v482_v12, %v387_v22  }
 0x385   : > { %v502_v38 = vmov %v389_v23   ;;  %391 = vrot.lane.b32.xlu0 (%p280_p0), %v389_v23, %s516_s10 }
 0x3f7   :  { %v392_v24 = vpop.permute.xlu0 %391 }
 0x3f8   :  { %395 = vst.msk [vmem:[%s711_s4] sm:$0xff] %vm292_vm1, %v392_v24 }

// kernel: t3s_forward.3
= control target key start
LH: loop header
LB: loop body
LE: loop exit
PB: predicated region body
PF: predicated region fallthrough
CT: control target
= control target key end

     0   :  { %s5948_s0 = inlined_call_operand.vmem [shape: f32[8,16,32], index: 0, kind: input, shape index: {}]   ;;  %s5949_s1 = inlined_call_operand.vmem [shape: f32[8,16,16], index: 1, kind: input, shape index: {}]   ;;  %s5950_s2 = inlined_call_operand.vmem [shape: f32[8,16,1], index: 2, kind: input, shape index: {}]   ;;  %s5951_s3 = inlined_call_operand.vmem [shape: f32[8,1,1], index: 3, kind: input, shape index: {}]   ;;  %s5952_s4 = inlined_call_operand.vmem [shape: f32[8,1,32], index: 4, kind: input, shape index: {}]   ;;  %s5953_s5 = inlined_call_operand.<no memory space> [shape: f32[1,1], index: 5, kind: input, shape index: {}]   ;;  %s5954_s6 = inlined_call_operand.vmem [shape: f32[256,32], index: 6, kind: input, shape index: {}]   ;;  %s5955_s7 = inlined_call_operand.vmem [shape: f32[2,32,96], index: 7, kind: input, shape index: {}]   ;;  %s5956_s8 = inlined_call_operand.vmem [shape: f32[2,1,96], index: 8, kind: input, shape index: {}]   ;;  %s5957_s9 = inlined_call_operand.vmem [shape: f32[2,32,32], index: 9, kind: input, shape index: {}]   ;;  %s5958_s10 = inlined_call_operand.vmem [shape: f32[2,1,32], index: 10, kind: input, shape index: {}]   ;;  %s5959_s11 = inlined_call_operand.hbm [shape: f32[8,1,32], index: 11, kind: output, shape index: {}]  }
   0x1   :  { %5962 = sst [smem:[#allocation6_spill]] %s5948_s0  ;;  %v16_v0 = vstv %s5953_s5 }
   0x2   :  { %5963 = sst [smem:[#allocation7_spill]] %s5949_s1  ;;  %17 = vst [vmem:[#allocation2] sm:$0x1] %v16_v0 }
   0x3   :  { %18 = vsyncpa [#allocation4], 0 }
   0x4   :  { %20 = vsyncpa [#allocation4 + $0x1], 0  ;;  %s4411_s19 = smov 0   ;;  %s4413_s20 = smov 0  }
   0x5   :  { %s4415_s21 = smov 0   ;;  %s4417_s22 = smov 0  }
   0x6 LB: > { %s4432_s5 = sadd.s32 4294967295, %s4342_s22   ;;  %s3253_s23 = sadd.s32 4294967294, %s4342_s22   ;;  %s4342_s22 = sphi %s4417_s22, %s5975_s22   ;;  %s4338_s21 = sphi %s4415_s21, %s5974_s21   ;;  %s4334_s20 = sphi %s4413_s20, %s5973_s20   ;;  %s4330_s19 = sphi %s4411_s19, %s5972_s19  }
   0x7   : > { %s4436_s24 = sadd.s32 1, %s4342_s22   ;;  %s289_s25 = sadd.s32 1, %s4338_s21 }
   0x8   : > { %s286_s26 = ssub.s32 %s4342_s22, %s4436_s24  ;;  %p299_p0 = scmp.ne.s32.totalorder %s4338_s21, %s4334_s20 }
   0x9   : > { %p287_p1 = scmp.eq.s32.totalorder %s286_s26, 0  ;;  %p300_p2 = scmp.eq.s32.totalorder %s4432_s5, 7 }
   0xa   : > { %p305_p3 = scmp.ne.s32.totalorder %s4334_s20, %s4330_s19  ;;  %p306_p4 = scmp.eq.s32.totalorder %s3253_s23, 7 }
   0xb   : > { %s4447_s27 = scalar_select %p287_p1, %s4338_s21, %s289_s25  }
   0xc   : > { %p4449_p5 = por %p300_p2, %p299_p0  ;;  %p4453_p6 = por %p306_p4, %p305_p3 }
   0xd   : > { %p3256_p7 = scmp.ge.s32.totalorder %s4342_s22, 1  ;;  %p378_p8 = scmp.lt.s32.totalorder %s4342_s22, 9 }
   0xf   : > { %p379_p9 = pnand %p3256_p7, %p378_p8 }
  0x10   : > { %v490_v1 = vld [vmem:[%s5955_s7] sm:$0xff] (!%p379_p9)  ;;  %v491_v2 = vld [vmem:[%s5955_s7 + $0x8] sm:$0xff] (!%p379_p9)  ;;  %v492_v3 = vld [vmem:[%s5955_s7 + $0x10] sm:$0xff] (!%p379_p9)  ;;  %p433_p10 = scmp.lt.s32.totalorder (!%p379_p9), %s4432_s5, 7  ;;  %vm501_vm0 = vcmask (!%p379_p9), 261120   ;;  %s5966_s0 = sld [smem:[#allocation6_spill]] (!%p379_p9) }
  0x11   : > { %382 = sbr.rel (%p379_p9) target bundleno = 2909 (0xb5d), region = 64  ;;  %v3836_v4 = vpack.c.bf16 (!%p379_p9), %v491_v2, %v490_v1  ;;  %v493_v5 = vld [vmem:[%s5955_s7 + $0x18] sm:$0xff] (!%p379_p9)  ;;  %v3263_v9 = vld [vmem:[%s5956_s8] ss:$0 sm:$0xff] (!%p379_p9)  ;;  %s5961_s17 = smov (!%p379_p9), 96   ;;  %vm4500_vm1 = vmpackc.low (!%p379_p9), %vm501_vm0, %vm501_vm0  ;;  %vm948_vm2 = vcmask (!%p379_p9), 130048  }
  0x12   : > { %v3840_v6 = vpack.c.bf16 (!%p379_p9), %v493_v5, %v492_v3  ;;  %v456_v14 = vld [vmem:[%s5954_s6] sm:$0xff] (!%p379_p9)  ;;  %v457_v24 = vld [vmem:[%s5954_s6 + $0x8] sm:$0xff] (!%p379_p9)  ;;  %v458_v25 = vld [vmem:[%s5954_s6 + $0x10] sm:$0xff] (!%p379_p9)  ;;  %s5969_s1 = sld [smem:[#allocation7_spill]] (!%p379_p9)  ;;  %s5960_s26 = smov (!%p379_p9), 64   ;;  %vm3141_vm3 = vcmask (!%p379_p9), 253952  }
  0x13   : > { %3837 = vmatprep.subr.bf16.mxu0 (!%p379_p9), %v3836_v4  ;;  %v459_v28 = vld [vmem:[%s5954_s6 + $0x18] sm:$0xff] (!%p379_p9)  ;;  %v460_v29 = vld [vmem:[%s5954_s6 + $0x20] sm:$0xff] (!%p379_p9)  ;;  %v461_v32 = vld [vmem:[%s5954_s6 + $0x28] sm:$0xff] (!%p379_p9)  ;;  %s5970_s15 = smov (!%p379_p9), 96   ;;  %s431_s14 = sand.u32 (!%p379_p9), 1, %s4334_s20  }
  0x14   : > { %3839 = vmatpush3.bf16.msra.mxu0 (!%p379_p9), %v3836_v4  ;;  %v462_v33 = vld [vmem:[%s5954_s6 + $0x30] sm:$0xff] (!%p379_p9)  ;;  %v463_v36 = vld [vmem:[%s5954_s6 + $0x38] sm:$0xff] (!%p379_p9)  ;;  %v464_v37 = vld [vmem:[%s5954_s6 + $0x40] sm:$0xff] (!%p379_p9)  ;;  %s3144_s30 = scalar_lea.sflag (!%p379_p9), [#allocation4], %s431_s14 }
  0x15   : > { %3841 = vmatprep.subr.bf16.mxu0 (!%p379_p9), %v3840_v6  ;;  %v465_v40 = vld [vmem:[%s5954_s6 + $0x48] sm:$0xff] (!%p379_p9)  ;;  %v466_v41 = vld [vmem:[%s5954_s6 + $0x50] sm:$0xff] (!%p379_p9)  ;;  %v467_v44 = vld [vmem:[%s5954_s6 + $0x58] sm:$0xff] (!%p379_p9) }
  0x16   : > { %v468_v45 = vld [vmem:[%s5954_s6 + $0x60] sm:$0xff] (!%p379_p9)  ;;  %v469_v48 = vld [vmem:[%s5954_s6 + $0x68] sm:$0xff] (!%p379_p9)  ;;  %v470_v49 = vld [vmem:[%s5954_s6 + $0x70] sm:$0xff] (!%p379_p9) }
  0x17   : > { %v471_v52 = vld [vmem:[%s5954_s6 + $0x78] sm:$0xff] (!%p379_p9)  ;;  %v472_v53 = vld [vmem:[%s5954_s6 + $0x80] sm:$0xff] (!%p379_p9)  ;;  %v473_v56 = vld [vmem:[%s5954_s6 + $0x88] sm:$0xff] (!%p379_p9) }
  0x18   : > { %s4473_s23 = scalar_select %p433_p10, %s4432_s5, 7  ;;  %3843 = vmatpush3.bf16.msra.mxu0 %v3840_v6  ;;  %v474_v57 = vld [vmem:[%s5954_s6 + $0x90] sm:$0xff]  ;;  %v475_v60 = vld [vmem:[%s5954_s6 + $0x98] sm:$0xff]  ;;  %v476_v61 = vld [vmem:[%s5954_s6 + $0xa0] sm:$0xff] }
  0x19   : > { %v477_v0 = vld [vmem:[%s5954_s6 + $0xa8] sm:$0xff]  ;;  %v478_v1 = vld [vmem:[%s5954_s6 + $0xb0] sm:$0xff]  ;;  %v479_v4 = vld [vmem:[%s5954_s6 + $0xb8] sm:$0xff] }
  0x1a   : > { %s4476_s25 = sshll.u32 %s4473_s23, 4  ;;  %v480_v5 = vld [vmem:[%s5954_s6 + $0xc0] sm:$0xff]  ;;  %s453_s16 = scalar_lea.vmem %s5952_s4, %s4473_s23 }
  0x1b   : > { %s437_s12 = scalar_lea.vmem %s5966_s0, %s4476_s25  ;;  %s4669_s18 = scalar_lea.vmem %s5969_s1, %s4476_s25 }
  0x1c   : > { %v454_v7 = vld [vmem:[%s437_s12] sm:$0xff]  ;;  %v455_v8 = vld [vmem:[%s437_s12 + $0x8] sm:$0xff] }
  0x1d   : > { %3592 = vmatprep.mubr.msk.f32.mxu0 %vm501_vm0, %v454_v7 }
  0x1e   : > { %3593 = vmatmul.mubr.msk.f32.vlgmr.msra.gmra.mrb[0].mxu0 %vm501_vm0, %v455_v8  ;;  %v481_v8 = vld [vmem:[%s5954_s6 + $0xc8] sm:$0xff] }
  0xf1   : > { %v3594_v10 = vpop.f32.mrb[0].mxu0 }
  0xf2   : > { %v580_v11 = vadd.f32 %v3594_v10, %v3263_v9  ;;  %v574_v12 = vpop.f32.mrb[1].mxu0 }
  0xf3   : > { %v575_v13 = vadd.f32 %v3263_v9, %v574_v12  ;;  %v482_v9 = vld [vmem:[%s5954_s6 + $0xd0] sm:$0xff]  ;;  %v483_v12 = vld [vmem:[%s5954_s6 + $0xd8] sm:$0xff] }
  0xf4   : > { %v4508_v23 = vmul.f32 0.70710677, %v580_v11 }
  0xf5   : > { %v4490_v15 = vmul.f32 0.70710677, %v575_v13  ;;  %v4492_v16 = vpack.i.bf16 %v580_v11, %v575_v13  ;;  %v484_v13 = vld [vmem:[%s5954_s6 + $0xe0] sm:$0xff] }
  0xf6   : > { %v586_v26 = vmul.f32 %v4508_v23, %v457_v24  ;;  %v588_v30 = vmul.f32 %v4508_v23, %v459_v28  ;;  %v590_v34 = vmul.f32 %v4508_v23, %v461_v32  ;;  %v592_v38 = vmul.f32 %v4508_v23, %v463_v36  ;;  %v487_v24 = vld [vmem:[%s5954_s6 + $0xf8] sm:$0xff] }
  0xf7   : > { %3931 = vrot.lane.b32.xlu0 %v4492_v16, %s5961_s17  ;;  %v585_v17 = vmul.f32 %v4490_v15, %v456_v14  ;;  %v587_v27 = vmul.f32 %v4490_v15, %v458_v25  ;;  %v589_v31 = vmul.f32 %v4490_v15, %v460_v29  ;;  %v591_v35 = vmul.f32 %v4490_v15, %v462_v33  ;;  %s3418_s17 = sshll.u32 %s4432_s5, 4  ;;  %s4347_s5 = smov [#allocation3]  }
  0xf8   : > { %v593_v39 = vmul.f32 %v4490_v15, %v464_v37  ;;  %v594_v42 = vmul.f32 %v4508_v23, %v465_v40  ;;  %v595_v43 = vmul.f32 %v4490_v15, %v466_v41  ;;  %v596_v46 = vmul.f32 %v4508_v23, %v467_v44  ;;  %s4284_s13 = sshll.u32 %s4347_s5, 4  ;;  %s4285_s13 = int_to_ptr.vmem [resolvable:$false] %s4284_s13 }
  0xf9   : > { %3599 = vmatprep.mubr.msk.f32.mxu1 %vm501_vm0, %v585_v17  ;;  %v597_v47 = vmul.f32 %v4490_v15, %v468_v45  ;;  %v598_v50 = vmul.f32 %v4508_v23, %v469_v48  ;;  %v599_v51 = vmul.f32 %v4490_v15, %v470_v49  ;;  %v600_v54 = vmul.f32 %v4508_v23, %v471_v52 }
  0xfa   : > { %v601_v55 = vmul.f32 %v4490_v15, %v472_v53  ;;  %v602_v58 = vmul.f32 %v4508_v23, %v473_v56  ;;  %v603_v59 = vmul.f32 %v4490_v15, %v474_v57  ;;  %v604_v62 = vmul.f32 %v4508_v23, %v475_v60 }
  0xfb   : > { %v605_v63 = vmul.f32 %v4490_v15, %v476_v61  ;;  %v606_v2 = vmul.f32 %v4508_v23, %v477_v0  ;;  %v607_v3 = vmul.f32 %v4490_v15, %v478_v1  ;;  %v608_v6 = vmul.f32 %v4508_v23, %v479_v4 }
  0xfc   : > { %v609_v7 = vmul.f32 %v4490_v15, %v480_v5  ;;  %v610_v10 = vmul.f32 %v4508_v23, %v481_v8  ;;  %v611_v11 = vmul.f32 %v4490_v15, %v482_v9  ;;  %v612_v14 = vmul.f32 %v4508_v23, %v483_v12 }
  0xfd   : > { %v613_v17 = vmul.f32 %v4490_v15, %v484_v13  ;;  %v616_v25 = vmul.f32 %v4508_v23, %v487_v24 }
 0x169   : > { %v3932_v18 = vpop.permute.xlu0 %3931 }
 0x16a   : > { %v3934_v19 = vunpack.i.h.bf16 %v3932_v18  ;;  %v3933_v20 = vunpack.i.l.bf16 %v3932_v18  ;;  %v485_v18 = vld [vmem:[%s5954_s6 + $0xe8] sm:$0xff] }
 0x16c   : > { %v3844_v22 = vpack.c.bf16 %v3934_v19, %v3933_v20  ;;  %v486_v19 = vld [vmem:[%s5954_s6 + $0xf0] sm:$0xff]  ;;  %v614_v20 = vmul.f32 %v4508_v23, %v485_v18 }
 0x16e   : > { %3846 = vmatprep.subr.msk.bf16.mxu1 %vm4500_vm1, %v3844_v22 }
 0x16f   : > { %3849 = vmatpush3.bf16.xpose.msk.msra.mxu1 %vm4500_vm1, %v3844_v22  ;;  %v615_v22 = vmul.f32 %v4490_v15, %v486_v19  ;;  %v4672_v15 = vld [vmem:[%s4669_s18 + $0x8] sm:$0xff] }
 0x176   : > { %3600 = vmatmul.mubr.msk.f32.vlgmr.msra.gmra.mrb[0].mxu1 %vm501_vm0, %v586_v26  ;;  %v4675_v26 = vld [vmem:[%s4669_s18] sm:$0xff] }
 0x177   : > { %3602 = vmatprep.mubr.msk.f32.mxu1 %vm501_vm0, %v587_v27 }
 0x17a   : > { %3603 = vmatmul.mubr.msk.f32.gmra.mrb[2].mxu1 %vm501_vm0, %v588_v30 }
 0x17b   : > { %3605 = vmatprep.mubr.msk.f32.mxu1 %vm501_vm0, %v589_v31 }
 0x17e   : > { %3606 = vmatmul.mubr.msk.f32.gmra.mrb[4].mxu1 %vm501_vm0, %v590_v34 }
 0x17f   : > { %3608 = vmatprep.mubr.msk.f32.mxu1 %vm501_vm0, %v591_v35 }
 0x182   : > { %3609 = vmatmul.mubr.msk.f32.gmra.mrb[6].mxu1 %vm501_vm0, %v592_v38 }
 0x183   : > { %3611 = vmatprep.mubr.msk.f32.mxu1 %vm501_vm0, %v593_v39 }
 0x186   : > { %3612 = vmatmul.mubr.msk.f32.gmra.mrb[8].mxu1 %vm501_vm0, %v594_v42 }
 0x187   : > { %3614 = vmatprep.mubr.msk.f32.mxu1 %vm501_vm0, %v595_v43 }
 0x18a   : > { %3615 = vmatmul.mubr.msk.f32.gmra.mrb[10].mxu1 %vm501_vm0, %v596_v46 }
 0x18b   : > { %3617 = vmatprep.mubr.msk.f32.mxu1 %vm501_vm0, %v597_v47 }
 0x18e   : > { %3618 = vmatmul.mubr.msk.f32.gmra.mrb[12].mxu1 %vm501_vm0, %v598_v50 }
 0x18f   : > { %3620 = vmatprep.mubr.msk.f32.mxu1 %vm501_vm0, %v599_v51 }
 0x192   : > { %3621 = vmatmul.mubr.msk.f32.gmra.mrb[14].mxu1 %vm501_vm0, %v600_v54 }
 0x193   : > { %3623 = vmatprep.mubr.msk.f32.mxu1 %vm501_vm0, %v601_v55 }
 0x196   : > { %3624 = vmatmul.mubr.msk.f32.gmra.mrb[16].mxu1 %vm501_vm0, %v602_v58 }
 0x197   : > { %3626 = vmatprep.mubr.msk.f32.mxu1 %vm501_vm0, %v603_v59 }
 0x19a   : > { %3627 = vmatmul.mubr.msk.f32.gmra.mrb[18].mxu1 %vm501_vm0, %v604_v62 }
 0x19b   : > { %3629 = vmatprep.mubr.msk.f32.mxu1 %vm501_vm0, %v605_v63 }
 0x19e   : > { %3630 = vmatmul.mubr.msk.f32.gmra.mrb[20].mxu1 %vm501_vm0, %v606_v2 }
 0x19f   : > { %3632 = vmatprep.mubr.msk.f32.mxu1 %vm501_vm0, %v607_v3 }
 0x1a2   : > { %3633 = vmatmul.mubr.msk.f32.gmra.mrb[22].mxu1 %vm501_vm0, %v608_v6 }
 0x1a3   : > { %3635 = vmatprep.mubr.msk.f32.mxu1 %vm501_vm0, %v609_v7 }
 0x1a6   : > { %3636 = vmatmul.mubr.msk.f32.gmra.mrb[24].mxu1 %vm501_vm0, %v610_v10 }
 0x1a7   : > { %3638 = vmatprep.mubr.msk.f32.mxu1 %vm501_vm0, %v611_v11 }
 0x1aa   : > { %3639 = vmatmul.mubr.msk.f32.gmra.mrb[26].mxu1 %vm501_vm0, %v612_v14 }
 0x1ab   : > { %3641 = vmatprep.mubr.msk.f32.mxu1 %vm501_vm0, %v613_v17 }
 0x1ae   : > { %3642 = vmatmul.mubr.msk.f32.gmra.mrb[28].mxu1 %vm501_vm0, %v614_v20 }
 0x1af   : > { %3644 = vmatprep.mubr.msk.f32.mxu1 %vm501_vm0, %v615_v22 }
 0x1b2   : > { %3645 = vmatmul.mubr.msk.f32.gmra.mrb[30].mxu1 %vm501_vm0, %v616_v25 }
 0x249   : > { %v3601_v27 = vpop.f32.mrb[0].mxu1 }
 0x24a   : > { %v4678_v28 = vadd.f32 %v3601_v27, %v4672_v15  ;;  %v789_v29 = vpop.f32.mrb[1].mxu1 }
 0x24b   : > { %v4681_v23 = vadd.f32 %v789_v29, %v4675_v26 }
 0x24c   : > { %v952_v30 = vsel %vm948_vm2, %v4678_v28, -inf }
 0x24d   : > { %953 = vmax.xlane.f32.xlu1 %v952_v30  ;;  %v3604_v31 = vpop.f32.mrb[2].mxu1  ;;  %v949_v32 = vsel %vm948_vm2, %v4681_v23, -inf }
 0x24e   : > { %v4688_v33 = vadd.f32 %v3604_v31, %v4672_v15  ;;  %v799_v34 = vpop.f32.mrb[3].mxu1  ;;  %950 = vmax.xlane.f32.xlu0 %v949_v32 }
 0x24f   : > { %v4691_v35 = vadd.f32 %v799_v34, %v4675_v26 }
 0x250   : > { %v958_v36 = vsel %vm948_vm2, %v4688_v33, -inf }
 0x251   : > { %959 = vmax.xlane.f32.xlu1 %v958_v36  ;;  %v3607_v37 = vpop.f32.mrb[4].mxu1  ;;  %v955_v40 = vsel %vm948_vm2, %v4691_v35, -inf }
 0x252   : > { %v809_v38 = vpop.f32.mrb[5].mxu1  ;;  %v4696_v39 = vadd.f32 %v3607_v37, %v4672_v15 }
 0x253   : > { %v4701_v43 = vadd.f32 %v809_v38, %v4675_v26 }
 0x254   : > { %v964_v44 = vsel %vm948_vm2, %v4696_v39, -inf }
 0x255   : > { %v3610_v41 = vpop.f32.mrb[6].mxu1  ;;  %956 = vmax.xlane.f32.xlu1 %v955_v40  ;;  %v961_v48 = vsel %vm948_vm2, %v4701_v43, -inf }
 0x256   : > { %v819_v42 = vpop.f32.mrb[7].mxu1  ;;  %v4706_v47 = vadd.f32 %v3610_v41, %v4672_v15 }
 0x257   : > { %v4714_v52 = vadd.f32 %v819_v42, %v4675_v26 }
 0x258   : > { %v970_v53 = vsel %vm948_vm2, %v4706_v47, -inf }
 0x259   : > { %v3613_v45 = vpop.f32.mrb[8].mxu1  ;;  %965 = vmax.xlane.f32.xlu1 %v964_v44  ;;  %v967_v59 = vsel %vm948_vm2, %v4714_v52, -inf }
 0x25a   : > { %v829_v46 = vpop.f32.mrb[9].mxu1  ;;  %v4734_v0 = vadd.f32 %v3613_v45, %v4672_v15 }
 0x25b   : > { %v4724_v58 = vadd.f32 %v829_v46, %v4675_v26 }
 0x25c   : > { %v976_v7 = vsel %vm948_vm2, %v4734_v0, -inf }
 0x25d   : > { %v3616_v49 = vpop.f32.mrb[10].mxu1  ;;  %962 = vmax.xlane.f32.xlu1 %v961_v48  ;;  %v973_v1 = vsel %vm948_vm2, %v4724_v58, -inf }
 0x25e   : > { %v839_v50 = vpop.f32.mrb[11].mxu1  ;;  %v4744_v6 = vadd.f32 %v3616_v49, %v4672_v15 }
 0x25f   : > { %v4711_v51 = vadd.f32 %v839_v50, %v4675_v26 }
 0x260   : > { %v982_v13 = vsel %vm948_vm2, %v4744_v6, -inf }
 0x261   : > { %v3619_v54 = vpop.f32.mrb[12].mxu1  ;;  %971 = vmax.xlane.f32.xlu1 %v970_v53  ;;  %v979_v55 = vsel %vm948_vm2, %v4711_v51, -inf }
 0x262   : > { %v849_v56 = vpop.f32.mrb[13].mxu1  ;;  %980 = vmax.xlane.f32.xlu0 %v979_v55  ;;  %v4754_v12 = vadd.f32 %v3619_v54, %v4672_v15 }
 0x263   : > { %v4721_v57 = vadd.f32 %v849_v56, %v4675_v26 }
 0x264   : > { %v988_v22 = vsel %vm948_vm2, %v4754_v12, -inf }
 0x265   : > { %v3622_v60 = vpop.f32.mrb[14].mxu1  ;;  %968 = vmax.xlane.f32.xlu1 %v967_v59  ;;  %v985_v61 = vsel %vm948_vm2, %v4721_v57, -inf }
 0x266   : > { %v859_v62 = vpop.f32.mrb[15].mxu1  ;;  %986 = vmax.xlane.f32.xlu0 %v985_v61  ;;  %v4764_v20 = vadd.f32 %v3622_v60, %v4672_v15 }
 0x267   : > { %v4731_v63 = vadd.f32 %v859_v62, %v4675_v26 }
 0x268   : > { %v994_v31 = vsel %vm948_vm2, %v4764_v20, -inf }
 0x269   : > { %v3625_v2 = vpop.f32.mrb[16].mxu1  ;;  %974 = vmax.xlane.f32.xlu1 %v973_v1  ;;  %v991_v3 = vsel %vm948_vm2, %v4731_v63, -inf }
 0x26a   : > { %v869_v4 = vpop.f32.mrb[17].mxu1  ;;  %992 = vmax.xlane.f32.xlu0 %v991_v3  ;;  %v4774_v30 = vadd.f32 %v3625_v2, %v4672_v15 }
 0x26b   : > { %v4741_v5 = vadd.f32 %v869_v4, %v4675_v26 }
 0x26c   : > { %v1000_v40 = vsel %vm948_vm2, %v4774_v30, -inf }
 0x26d   : > { %v3628_v8 = vpop.f32.mrb[18].mxu1  ;;  %977 = vmax.xlane.f32.xlu1 %v976_v7  ;;  %v997_v9 = vsel %vm948_vm2, %v4741_v5, -inf }
 0x26e   : > { %v879_v10 = vpop.f32.mrb[19].mxu1  ;;  %998 = vmax.xlane.f32.xlu0 %v997_v9  ;;  %v4784_v38 = vadd.f32 %v3628_v8, %v4672_v15 }
 0x26f   : > { %v4751_v11 = vadd.f32 %v879_v10, %v4675_v26 }
 0x270   : > { %v1006_v48 = vsel %vm948_vm2, %v4784_v38, -inf }
 0x271   : > { %v3631_v14 = vpop.f32.mrb[20].mxu1  ;;  %983 = vmax.xlane.f32.xlu1 %v982_v13  ;;  %v1003_v17 = vsel %vm948_vm2, %v4751_v11, -inf }
 0x272   : > { %v889_v18 = vpop.f32.mrb[21].mxu1  ;;  %1004 = vmax.xlane.f32.xlu0 %v1003_v17  ;;  %v4794_v46 = vadd.f32 %v3631_v14, %v4672_v15 }
 0x273   : > { %v4761_v19 = vadd.f32 %v889_v18, %v4675_v26 }
 0x274   : > { %v1012_v56 = vsel %vm948_vm2, %v4794_v46, -inf }
 0x275   : > { %v3634_v24 = vpop.f32.mrb[22].mxu1  ;;  %989 = vmax.xlane.f32.xlu1 %v988_v22  ;;  %v1009_v25 = vsel %vm948_vm2, %v4761_v19, -inf }
 0x276   : > { %v899_v27 = vpop.f32.mrb[23].mxu1  ;;  %1010 = vmax.xlane.f32.xlu0 %v1009_v25  ;;  %v4804_v55 = vadd.f32 %v3634_v24, %v4672_v15 }
 0x277   : > { %v4771_v29 = vadd.f32 %v899_v27, %v4675_v26 }
 0x278   : > { %v1018_v2 = vsel %vm948_vm2, %v4804_v55, -inf }
 0x279   : > { %v3637_v32 = vpop.f32.mrb[24].mxu1  ;;  %995 = vmax.xlane.f32.xlu1 %v994_v31  ;;  %v1015_v34 = vsel %vm948_vm2, %v4771_v29, -inf }
 0x27a   : > { %v909_v36 = vpop.f32.mrb[25].mxu1  ;;  %1016 = vmax.xlane.f32.xlu0 %v1015_v34  ;;  %v4814_v1 = vadd.f32 %v3637_v32, %v4672_v15 }
 0x27b   : > { %v4781_v37 = vadd.f32 %v909_v36, %v4675_v26 }
 0x27c   : > { %v1024_v7 = vsel %vm948_vm2, %v4814_v1, -inf }
 0x27d   : > { %v3640_v41 = vpop.f32.mrb[26].mxu1  ;;  %1001 = vmax.xlane.f32.xlu1 %v1000_v40  ;;  %v1021_v42 = vsel %vm948_vm2, %v4781_v37, -inf }
 0x27e   : > { %v919_v44 = vpop.f32.mrb[27].mxu1  ;;  %1022 = vmax.xlane.f32.xlu0 %v1021_v42  ;;  %v4821_v4 = vadd.f32 %v3640_v41, %v4672_v15 }
 0x27f   : > { %v4791_v45 = vadd.f32 %v919_v44, %v4675_v26 }
 0x280   : > { %v1030_v8 = vsel %vm948_vm2, %v4821_v4, -inf }
 0x281   : > { %v3643_v49 = vpop.f32.mrb[28].mxu1  ;;  %1007 = vmax.xlane.f32.xlu1 %v1006_v48  ;;  %v1027_v50 = vsel %vm948_vm2, %v4791_v45, -inf }
 0x282   : > { %v929_v53 = vpop.f32.mrb[29].mxu1  ;;  %1028 = vmax.xlane.f32.xlu0 %v1027_v50 }
 0x283   : > { %v4801_v54 = vadd.f32 %v929_v53, %v4675_v26 }
 0x285   : > { %v3646_v59 = vpop.f32.mrb[30].mxu1  ;;  %1013 = vmax.xlane.f32.xlu1 %v1012_v56  ;;  %v1033_v60 = vsel %vm948_vm2, %v4801_v54, -inf }
 0x286   : > { %v939_v61 = vpop.f32.mrb[31].mxu1  ;;  %1034 = vmax.xlane.f32.xlu0 %v1033_v60  ;;  %v4831_v9 = vadd.f32 %v3646_v59, %v4672_v15 }
 0x287   : > { %v4811_v62 = vadd.f32 %v939_v61, %v4675_v26  ;;  %v4826_v26 = vadd.f32 %v3643_v49, %v4672_v15 }
 0x288   : > { %v1042_v13 = vsel %vm948_vm2, %v4831_v9, -inf }
 0x289   : > { %1019 = vmax.xlane.f32.xlu1 %v1018_v2  ;;  %v1039_v3 = vsel %vm948_vm2, %v4811_v62, -inf  ;;  %v1036_v10 = vsel %vm948_vm2, %v4826_v26, -inf }
 0x28a   : > { %1040 = vmax.xlane.f32.xlu0 %v1039_v3 }
 0x28d   : > { %1025 = vmax.xlane.f32.xlu1 %v1024_v7 }
 0x291   : > { %1031 = vmax.xlane.f32.xlu1 %v1030_v8 }
 0x295   : > { %1037 = vmax.xlane.f32.xlu1 %v1036_v10 }
 0x299   : > { %1043 = vmax.xlane.f32.xlu1 %v1042_v13 }
 0x2da   : > { %v954_v14 = vpop.xlane.xlu1 %953 }
 0x2db   : > { %v1046_v17 = vsub.f32 %v4678_v28, %v954_v14  ;;  %v951_v18 = vpop.xlane.xlu0 %950 }
 0x2dc   : > { %v1045_v22 = vsub.f32 %v4681_v23, %v951_v18 }
 0x2dd   : > { %v1079_v24 = vmul.f32 1.442695, %v1046_v17 }
 0x2de   : > { %v1077_v25 = vmul.f32 1.442695, %v1045_v22  ;;  %v960_v27 = vpop.xlane.xlu1 %959 }
 0x2df   : > { %3952 = vpow2.f32 %v1079_v24  ;;  %v1048_v15 = vsub.f32 %v4688_v33, %v960_v27 }
 0x2e0   : > { %3954 = vpow2.f32 %v1077_v25 }
 0x2e1   : > { %v1083_v31 = vmul.f32 1.442695, %v1048_v15 }
 0x2e2   : > { %v957_v32 = vpop.xlane.xlu1 %956 }
 0x2e3   : > { %3956 = vpow2.f32 %v1083_v31  ;;  %v1047_v34 = vsub.f32 %v4691_v35, %v957_v32 }
 0x2e5   : > { %v1081_v36 = vmul.f32 1.442695, %v1047_v34 }
 0x2e6   : > { %v966_v40 = vpop.xlane.xlu1 %965 }
 0x2e7   : > { %3958 = vpow2.f32 %v1081_v36  ;;  %v1050_v28 = vsub.f32 %v4696_v39, %v966_v40 }
 0x2e9   : > { %v4842_v41 = vpop.eup %3952  ;;  %v1087_v23 = vmul.f32 1.442695, %v1050_v28 }
 0x2ea   : > { %v4844_v42 = vpop.eup %3954  ;;  %v963_v44 = vpop.xlane.xlu1 %962  ;;  %v1144_v33 = vsel %vm948_vm2, %v4842_v41, 0.0 }
 0x2eb   : > { %3960 = vpow2.f32 %v1087_v23  ;;  %v1049_v48 = vsub.f32 %v4701_v43, %v963_v44  ;;  %1145 = vadd.xlane.f32.xlu1 %v1144_v33  ;;  %v1141_v35 = vsel %vm948_vm2, %v4844_v42, 0.0 }
 0x2ec   : > { %1142 = vadd.xlane.f32.xlu0 %v1141_v35 }
 0x2ed   : > { %v4851_v49 = vpop.eup %3956  ;;  %v1085_v39 = vmul.f32 1.442695, %v1049_v48 }
 0x2ee   : > { %v972_v50 = vpop.xlane.xlu1 %971  ;;  %v1150_v53 = vsel %vm948_vm2, %v4851_v49, 0.0 }
 0x2ef   : > { %3962 = vpow2.f32 %v1085_v39  ;;  %v1052_v56 = vsub.f32 %v4706_v47, %v972_v50  ;;  %1151 = vadd.xlane.f32.xlu1 %v1150_v53  ;;  %v981_v43 = vpop.xlane.xlu0 %980 }
 0x2f0   : > { %v1055_v8 = vsub.f32 %v4711_v51, %v981_v43 }
 0x2f1   : > { %v4856_v59 = vpop.eup %3958  ;;  %v1091_v60 = vmul.f32 1.442695, %v1052_v56 }
 0x2f2   : > { %v969_v61 = vpop.xlane.xlu1 %968  ;;  %v1147_v2 = vsel %vm948_vm2, %v4856_v59, 0.0  ;;  %v1097_v18 = vmul.f32 1.442695, %v1055_v8 }
 0x2f3   : > { %3964 = vpow2.f32 %v1091_v60  ;;  %v1051_v3 = vsub.f32 %v4714_v52, %v969_v61  ;;  %1148 = vadd.xlane.f32.xlu0 %v1147_v2  ;;  %v987_v27 = vpop.xlane.xlu0 %986 }
 0x2f4   : > { %v1057_v36 = vsub.f32 %v4721_v57, %v987_v27 }
 0x2f5   : > { %v4861_v7 = vpop.eup %3960  ;;  %v1089_v10 = vmul.f32 1.442695, %v1051_v3 }
 0x2f6   : > { %v975_v13 = vpop.xlane.xlu1 %974  ;;  %v1156_v47 = vsel %vm948_vm2, %v4861_v7, 0.0  ;;  %v1101_v48 = vmul.f32 1.442695, %v1057_v36 }
 0x2f7   : > { %3966 = vpow2.f32 %v1089_v10  ;;  %v1053_v14 = vsub.f32 %v4724_v58, %v975_v13  ;;  %1157 = vadd.xlane.f32.xlu1 %v1156_v47  ;;  %v993_v23 = vpop.xlane.xlu0 %992 }
 0x2f9   : > { %v4867_v17 = vpop.eup %3962  ;;  %v1093_v22 = vmul.f32 1.442695, %v1053_v14 }
 0x2fa   : > { %v978_v24 = vpop.xlane.xlu1 %977  ;;  %v1153_v52 = vsel %vm948_vm2, %v4867_v17, 0.0 }
 0x2fb   : > { %3968 = vpow2.f32 %v1093_v22  ;;  %v1054_v51 = vsub.f32 %v4734_v0, %v978_v24  ;;  %1154 = vadd.xlane.f32.xlu0 %v1153_v52  ;;  %v999_v56 = vpop.xlane.xlu0 %998 }
 0x2fc   : > { %3970 = vpow2.f32 %v1097_v18  ;;  %v1061_v14 = vsub.f32 %v4741_v5, %v999_v56 }
 0x2fd   : > { %v4872_v25 = vpop.eup %3964  ;;  %v1095_v15 = vmul.f32 1.442695, %v1054_v51 }
 0x2fe   : > { %v984_v31 = vpop.xlane.xlu1 %983  ;;  %v1162_v58 = vsel %vm948_vm2, %v4872_v25, 0.0  ;;  %v1109_v52 = vmul.f32 1.442695, %v1061_v14 }
 0x2ff   : > { %3972 = vpow2.f32 %v1095_v15  ;;  %v1056_v32 = vsub.f32 %v4744_v6, %v984_v31  ;;  %1163 = vadd.xlane.f32.xlu1 %v1162_v58  ;;  %v1005_v10 = vpop.xlane.xlu0 %1004 }
 0x301   : > { %v4877_v34 = vpop.eup %3966  ;;  %v1099_v40 = vmul.f32 1.442695, %v1056_v32 }
 0x302   : > { %v990_v0 = vpop.xlane.xlu1 %989  ;;  %v1159_v28 = vsel %vm948_vm2, %v4877_v34, 0.0 }
 0x303   : > { %3974 = vpow2.f32 %v1099_v40  ;;  %v1058_v44 = vsub.f32 %v4754_v12, %v990_v0  ;;  %1160 = vadd.xlane.f32.xlu0 %v1159_v28  ;;  %v1059_v12 = vsub.f32 %v4731_v63, %v993_v23 }
 0x305   : > { %v4883_v33 = vpop.eup %3968  ;;  %v1103_v35 = vmul.f32 1.442695, %v1058_v44 }
 0x306   : > { %v996_v6 = vpop.xlane.xlu1 %995  ;;  %v1165_v39 = vsel %vm948_vm2, %v4883_v33, 0.0  ;;  %v4887_v50 = vpop.eup %3970 }
 0x307   : > { %3976 = vpow2.f32 %v1103_v35  ;;  %v1060_v57 = vsub.f32 %v4764_v20, %v996_v6  ;;  %1166 = vadd.xlane.f32.xlu0 %v1165_v39  ;;  %v1171_v2 = vsel %vm948_vm2, %v4887_v50, 0.0  ;;  %v1105_v20 = vmul.f32 1.442695, %v1059_v12 }
 0x308   : > { %3978 = vpow2.f32 %v1101_v48 }
 0x309   : > { %v4890_v53 = vpop.eup %3972  ;;  %v1107_v60 = vmul.f32 1.442695, %v1060_v57 }
 0x30a   : > { %v1002_v43 = vpop.xlane.xlu1 %1001  ;;  %v1168_v61 = vsel %vm948_vm2, %v4890_v53, 0.0 }
 0x30b   : > { %1169 = vadd.xlane.f32.xlu1 %v1168_v61  ;;  %1172 = vadd.xlane.f32.xlu0 %v1171_v2  ;;  %3980 = vpow2.f32 %v1107_v60  ;;  %v1062_v8 = vsub.f32 %v4774_v30, %v1002_v43  ;;  %v1011_v30 = vpop.xlane.xlu0 %1010  ;;  %v1063_v61 = vsub.f32 %v4751_v11, %v1005_v10 }
 0x30c   : > { %3982 = vpow2.f32 %v1105_v20 }
 0x30d   : > { %v4897_v3 = vpop.eup %3974  ;;  %v1111_v18 = vmul.f32 1.442695, %v1062_v8  ;;  %v1113_v14 = vmul.f32 1.442695, %v1063_v61 }
 0x30e   : > { %v1174_v63 = vsel %vm948_vm2, %v4897_v3, 0.0  ;;  %v1008_v13 = vpop.xlane.xlu1 %1007 }
 0x30f   : > { %1175 = vadd.xlane.f32.xlu1 %v1174_v63  ;;  %3984 = vpow2.f32 %v1111_v18  ;;  %v1064_v51 = vsub.f32 %v4784_v38, %v1008_v13  ;;  %v1017_v40 = vpop.xlane.xlu0 %1016  ;;  %v1065_v38 = vsub.f32 %v4761_v19, %v1011_v30 }
 0x310   : > { %3986 = vpow2.f32 %v1109_v52  ;;  %v1067_v57 = vsub.f32 %v4771_v29, %v1017_v40 }
 0x311   : > { %v4902_v47 = vpop.eup %3976  ;;  %v1115_v5 = vmul.f32 1.442695, %v1064_v51  ;;  %v1117_v48 = vmul.f32 1.442695, %v1065_v38 }
 0x312   : > { %v1180_v22 = vsel %vm948_vm2, %v4902_v47, 0.0  ;;  %v4907_v24 = vpop.eup %3978  ;;  %v1014_v27 = vpop.xlane.xlu1 %1013  ;;  %v1121_v43 = vmul.f32 1.442695, %v1067_v57 }
 0x313   : > { %1181 = vadd.xlane.f32.xlu1 %v1180_v22  ;;  %v1177_v15 = vsel %vm948_vm2, %v4907_v24, 0.0  ;;  %v1066_v58 = vsub.f32 %v4794_v46, %v1014_v27  ;;  %3988 = vpow2.f32 %v1115_v5  ;;  %v1023_v46 = vpop.xlane.xlu0 %1022 }
 0x315   : > { %v4912_v31 = vpop.eup %3980  ;;  %v1119_v0 = vmul.f32 1.442695, %v1066_v58 }
 0x316   : > { %v1186_v32 = vsel %vm948_vm2, %v4912_v31, 0.0  ;;  %v4917_v36 = vpop.eup %3982  ;;  %v1020_v28 = vpop.xlane.xlu1 %1019 }
 0x317   : > { %1178 = vadd.xlane.f32.xlu1 %v1177_v15  ;;  %v1183_v23 = vsel %vm948_vm2, %v4917_v36, 0.0  ;;  %3990 = vpow2.f32 %v1119_v0  ;;  %v1068_v35 = vsub.f32 %v4804_v55, %v1020_v28  ;;  %v1029_v55 = vpop.xlane.xlu0 %1028 }
 0x318   : > { %3992 = vpow2.f32 %v1117_v48  ;;  %v1071_v18 = vsub.f32 %v4791_v45, %v1029_v55 }
 0x319   : > { %v4922_v44 = vpop.eup %3984  ;;  %v1123_v12 = vmul.f32 1.442695, %v1068_v35 }
 0x31a   : > { %v1192_v19 = vsel %vm948_vm2, %v4922_v44, 0.0  ;;  %v4929_v6 = vpop.eup %3986  ;;  %v1026_v39 = vpop.xlane.xlu1 %1025  ;;  %v1129_v30 = vmul.f32 1.442695, %v1071_v18 }
 0x31b   : > { %1187 = vadd.xlane.f32.xlu1 %v1186_v32  ;;  %v1189_v56 = vsel %vm948_vm2, %v4929_v6, 0.0  ;;  %3994 = vpow2.f32 %v1123_v12  ;;  %v1035_v63 = vpop.xlane.xlu0 %1034  ;;  %v1070_v13 = vsub.f32 %v4814_v1, %v1026_v39 }
 0x31c   : > { %3996 = vpow2.f32 %v1121_v43  ;;  %v1073_v51 = vsub.f32 %v4801_v54, %v1035_v63 }
 0x31d   : > { %v4934_v60 = vpop.eup %3988  ;;  %v1127_v10 = vmul.f32 1.442695, %v1070_v13 }
 0x31e   : > { %v1032_v2 = vpop.xlane.xlu1 %1031  ;;  %v1198_v20 = vsel %vm948_vm2, %v4934_v60, 0.0  ;;  %v1133_v58 = vmul.f32 1.442695, %v1073_v51 }
 0x31f   : > { %1184 = vadd.xlane.f32.xlu1 %v1183_v23  ;;  %v1072_v52 = vsub.f32 %v4821_v4, %v1032_v2  ;;  %v1041_v45 = vpop.xlane.xlu0 %1040 }
 0x320   : > { %v1075_v32 = vsub.f32 %v4811_v62, %v1041_v45 }
 0x321   : > { %3936 = vrot.lane.b32.xlu0 %v4492_v16, %s5960_s26  ;;  %v1069_v16 = vsub.f32 %v4781_v37, %v1023_v46  ;;  %v4940_v8 = vpop.eup %3990  ;;  %v1131_v15 = vmul.f32 1.442695, %v1072_v52  ;;  %s450_s26 = scalar_lea.vmem %s5951_s3, %s4473_s23  ;;  %s5906_s23 = scalar_lea.hbm %s5959_s11, %s3418_s17 }
 0x322   : > { %v1204_v37 = vsel %vm948_vm2, %v4940_v8, 0.0  ;;  %v4946_v22 = vpop.eup %3992  ;;  %v1038_v11 = vpop.xlane.xlu1 %1037  ;;  %v1137_v28 = vmul.f32 1.442695, %v1075_v32 }
 0x323   : > { %1193 = vadd.xlane.f32.xlu1 %v1192_v19  ;;  %v1125_v29 = vmul.f32 1.442695, %v1069_v16  ;;  %v1201_v1 = vsel %vm948_vm2, %v4946_v22, 0.0  ;;  %v1074_v5 = vsub.f32 %v4826_v26, %v1038_v11 }
 0x325   : > { %3998 = vpow2.f32 %v1125_v29  ;;  %v4952_v27 = vpop.eup %3994  ;;  %v1135_v38 = vmul.f32 1.442695, %v1074_v5 }
 0x326   : > { %4000 = vpow2.f32 %v1113_v14  ;;  %v1044_v4 = vpop.xlane.xlu1 %1043  ;;  %v1210_v40 = vsel %vm948_vm2, %v4952_v27, 0.0  ;;  %v4958_v54 = vpop.eup %3996 }
 0x327   : > { %1190 = vadd.xlane.f32.xlu1 %v1189_v56  ;;  %4002 = vpow2.f32 %v1127_v10  ;;  %v1076_v0 = vsub.f32 %v4831_v9, %v1044_v4  ;;  %v1207_v26 = vsel %vm948_vm2, %v4958_v54, 0.0 }
 0x328   : > { %4004 = vpow2.f32 %v1129_v30 }
 0x329   : > { %4006 = vpow2.f32 %v1131_v15  ;;  %v1139_v48 = vmul.f32 1.442695, %v1076_v0 }
 0x32a   : > { %4008 = vpow2.f32 %v1133_v58 }
 0x32b   : > { %1199 = vadd.xlane.f32.xlu1 %v1198_v20  ;;  %4010 = vpow2.f32 %v1135_v38 }
 0x32c   : > { %4012 = vpow2.f32 %v1137_v28 }
 0x32d   : > { %4014 = vpow2.f32 %v1139_v48 }
 0x32f   : > { %1205 = vadd.xlane.f32.xlu1 %v1204_v37  ;;  %v4963_v23 = vpop.eup %3998 }
 0x330   : > { %v4965_v62 = vpop.eup %4000  ;;  %v1213_v46 = vsel %vm948_vm2, %v4963_v23, 0.0 }
 0x331   : > { %v4969_v35 = vpop.eup %4002  ;;  %v1195_v9 = vsel %vm948_vm2, %v4965_v62, 0.0 }
 0x332   : > { %v4973_v19 = vpop.eup %4004  ;;  %v1216_v39 = vsel %vm948_vm2, %v4969_v35, 0.0 }
 0x333   : > { %1202 = vadd.xlane.f32.xlu1 %v1201_v1  ;;  %v4977_v57 = vpop.eup %4006  ;;  %v1219_v12 = vsel %vm948_vm2, %v4973_v19, 0.0 }
 0x334   : > { %v4981_v56 = vpop.eup %4008  ;;  %v1222_v55 = vsel %vm948_vm2, %v4977_v57, 0.0 }
 0x335   : > { %v4985_v43 = vpop.eup %4010  ;;  %v1225_v16 = vsel %vm948_vm2, %v4981_v56, 0.0 }
 0x336   : > { %v4989_v61 = vpop.eup %4012  ;;  %v1228_v2 = vsel %vm948_vm2, %v4985_v43, 0.0 }
 0x337   : > { %1211 = vadd.xlane.f32.xlu1 %v1210_v40  ;;  %v4993_v20 = vpop.eup %4014  ;;  %v1231_v29 = vsel %vm948_vm2, %v4989_v61, 0.0 }
 0x338   : > { %v1234_v63 = vsel %vm948_vm2, %v4993_v20, 0.0 }
 0x33b   : > { %1208 = vadd.xlane.f32.xlu1 %v1207_v26 }
 0x33f   : > { %1214 = vadd.xlane.f32.xlu1 %v1213_v46 }
 0x340   : > { %1196 = vadd.xlane.f32.xlu0 %v1195_v9 }
 0x343   : > { %1217 = vadd.xlane.f32.xlu1 %v1216_v39 }
 0x344   : > { %1220 = vadd.xlane.f32.xlu0 %v1219_v12 }
 0x347   : > { %1223 = vadd.xlane.f32.xlu1 %v1222_v55 }
 0x348   : > { %1226 = vadd.xlane.f32.xlu0 %v1225_v16 }
 0x34b   : > { %1229 = vadd.xlane.f32.xlu1 %v1228_v2 }
 0x34c   : > { %1232 = vadd.xlane.f32.xlu0 %v1231_v29 }
 0x34f   : > { %1235 = vadd.xlane.f32.xlu1 %v1234_v63 }
 0x378   : > { %v1146_v37 = vpop.xlane.xlu1 %1145 }
 0x379   : > { %v1143_v13 = vpop.xlane.xlu0 %1142 }
 0x37a   : > { %4016 = vrcp.f32 %v1143_v13 }
 0x37b   : > { %4018 = vrcp.f32 %v1146_v37 }
 0x37c   : > { %v1152_v10 = vpop.xlane.xlu1 %1151 }
 0x380   : > { %v1149_v11 = vpop.xlane.xlu0 %1148 }
 0x381   : > { %4020 = vrcp.f32 %v1149_v11 }
 0x382   : > { %4022 = vrcp.f32 %v1152_v10 }
 0x384   : > { %v4017_v14 = vpop.eup %4016  ;;  %v1158_v30 = vpop.xlane.xlu1 %1157 }
 0x385   : > { %v1238_v18 = vmul.f32 %v4017_v14, %v4844_v42  ;;  %v4019_v38 = vpop.eup %4018 }
 0x386   : > { %v1240_v26 = vmul.f32 %v4019_v38, %v4842_v41 }
 0x387   : > { %3651 = vmatprep.mubr.msk.f32.mxu0 %vm948_vm2, %v1238_v18 }
 0x388   : > { %v1155_v52 = vpop.xlane.xlu0 %1154 }
 0x389   : > { %4024 = vrcp.f32 %v1155_v52 }
 0x38a   : > { %4026 = vrcp.f32 %v1158_v30 }
 0x38b   : > { %v4021_v28 = vpop.eup %4020 }
 0x38c   : > { %v1164_v1 = vpop.xlane.xlu1 %1163  ;;  %v4023_v48 = vpop.eup %4022  ;;  %v1242_v9 = vmul.f32 %v4021_v28, %v4856_v59 }
 0x38d   : > { %v1244_v12 = vmul.f32 %v4023_v48, %v4851_v49 }
 0x390   : > { %v1161_v51 = vpop.xlane.xlu0 %1160 }
 0x391   : > { %4028 = vrcp.f32 %v1161_v51 }
 0x392   : > { %4030 = vrcp.f32 %v1164_v1 }
 0x393   : > { %v4025_v39 = vpop.eup %4024 }
 0x394   : > { %v1167_v45 = vpop.xlane.xlu0 %1166  ;;  %v4027_v55 = vpop.eup %4026  ;;  %v1246_v2 = vmul.f32 %v4025_v39, %v4867_v17 }
 0x395   : > { %4032 = vrcp.f32 %v1167_v45  ;;  %v1248_v41 = vmul.f32 %v4027_v55, %v4861_v7 }
 0x398   : > { %v1170_v15 = vpop.xlane.xlu1 %1169  ;;  %v1173_v5 = vpop.xlane.xlu0 %1172 }
 0x399   : > { %4034 = vrcp.f32 %v1170_v15 }
 0x39a   : > { %4036 = vrcp.f32 %v1173_v5 }
 0x39b   : > { %v4029_v29 = vpop.eup %4028 }
 0x39c   : > { %v1176_v58 = vpop.xlane.xlu1 %1175  ;;  %v3937_v32 = vpop.permute.xlu0 %3936  ;;  %v1250_v13 = vmul.f32 %v4029_v29, %v4877_v34 }
 0x39d   : > { %v3939_v4 = vunpack.i.h.bf16 %v3937_v32  ;;  %v3938_v42 = vunpack.i.l.bf16 %v3937_v32  ;;  %4038 = vrcp.f32 %v1176_v58  ;;  %v4031_v59 = vpop.eup %4030 }
 0x39e   : > { %v1252_v49 = vmul.f32 %v4031_v59, %v4872_v25 }
 0x39f   : > { %v3850_v40 = vpack.c.bf16 %v3939_v4, %v3938_v42  ;;  %v4033_v14 = vpop.eup %4032 }
 0x3a0   : > { %v1182_v0 = vpop.xlane.xlu1 %1181  ;;  %v1254_v37 = vmul.f32 %v4033_v14, %v4883_v33 }
 0x3a1   : > { %3851 = vmatprep.subr.bf16.mxu0 %v3850_v40 }
 0x3a2   : > { %3853 = vmatpush3.bf16.msra.mxu0 %v3850_v40 }
 0x3a3   : > { %v4035_v17 = vpop.eup %4034 }
 0x3a4   : > { %v1179_v46 = vpop.xlane.xlu1 %1178  ;;  %v4037_v11 = vpop.eup %4036  ;;  %v1256_v7 = vmul.f32 %v4035_v17, %v4890_v53 }
 0x3a5   : > { %3652 = vmatmul.mubr.msk.f32.vlgmr.msra.gmra.mrb[2].mxu0 %vm948_vm2, %v1240_v26  ;;  %4040 = vrcp.f32 %v1179_v46  ;;  %v1258_v52 = vmul.f32 %v4037_v11, %v4887_v50 }
 0x3a6   : > { %3654 = vmatprep.mubr.msk.f32.mxu0 %vm948_vm2, %v1242_v9  ;;  %4042 = vrcp.f32 %v1182_v0 }
 0x3a7   : > { %v4039_v34 = vpop.eup %4038 }
 0x3a8   : > { %v1188_v16 = vpop.xlane.xlu1 %1187  ;;  %v1260_v25 = vmul.f32 %v4039_v34, %v4897_v3 }
 0x3a9   : > { %3655 = vmatmul.mubr.msk.f32.gmra.mrb[4].mxu0 %vm948_vm2, %v1244_v12 }
 0x3aa   : > { %3657 = vmatprep.mubr.msk.f32.mxu0 %vm948_vm2, %v1246_v2 }
 0x3ac   : > { %v1185_v63 = vpop.xlane.xlu1 %1184 }
 0x3ad   : > { %3658 = vmatmul.mubr.msk.f32.gmra.mrb[6].mxu0 %vm948_vm2, %v1248_v41  ;;  %4044 = vrcp.f32 %v1185_v63 }
 0x3ae   : > { %3660 = vmatprep.mubr.msk.f32.mxu0 %vm948_vm2, %v1250_v13  ;;  %4046 = vrcp.f32 %v1188_v16 }
 0x3af   : > { %v4041_v30 = vpop.eup %4040 }
 0x3b0   : > { %v1194_v18 = vpop.xlane.xlu1 %1193  ;;  %v4043_v33 = vpop.eup %4042  ;;  %v1262_v1 = vmul.f32 %v4041_v30, %v4907_v24  ;;  %v3337_v30 = vld [vmem:[%s5955_s7 + $0x30] sm:$0xff] }
 0x3b1   : > { %3661 = vmatmul.mubr.msk.f32.gmra.mrb[8].mxu0 %vm948_vm2, %v1252_v49  ;;  %v1264_v50 = vmul.f32 %v4043_v33, %v4902_v47  ;;  %v3338_v33 = vld [vmem:[%s5955_s7 + $0x38] sm:$0xff] }
 0x3b2   : > { %3663 = vmatprep.mubr.msk.f32.mxu0 %vm948_vm2, %v1254_v37 }
 0x3b4   : > { %v1191_v10 = vpop.xlane.xlu1 %1190 }
 0x3b5   : > { %4048 = vrcp.f32 %v1191_v10  ;;  %3664 = vmatmul.mubr.msk.f32.gmra.mrb[10].mxu0 %vm948_vm2, %v1256_v7  ;;  %v3335_v10 = vld [vmem:[%s5955_s7 + $0x20] sm:$0xff] }
 0x3b6   : > { %4050 = vrcp.f32 %v1194_v18  ;;  %3666 = vmatprep.mubr.msk.f32.mxu0 %vm948_vm2, %v1258_v52  ;;  %v3336_v52 = vld [vmem:[%s5955_s7 + $0x28] sm:$0xff] }
 0x3b7   : > { %v4045_v45 = vpop.eup %4044 }
 0x3b8   : > { %v1200_v51 = vpop.xlane.xlu1 %1199  ;;  %v4047_v53 = vpop.eup %4046  ;;  %v1266_v5 = vmul.f32 %v4045_v45, %v4917_v36 }
 0x3b9   : > { %3667 = vmatmul.mubr.msk.f32.gmra.mrb[12].mxu0 %vm948_vm2, %v1260_v25  ;;  %v1268_v58 = vmul.f32 %v4047_v53, %v4912_v31  ;;  %4052 = vrcp.f32 %v1200_v51  ;;  %v3862_v25 = vpack.c.bf16 %v3336_v52, %v3335_v10  ;;  %v3866_v51 = vpack.c.bf16 %v3338_v33, %v3337_v30  ;;  %v5090_v53 = vld [vmem:[%s5954_s6 + $0x8] sm:$0xff]  ;;  %v5180_v52 = vld [vmem:[%s5954_s6 + $0x70] sm:$0xff] }
 0x3ba   : > { %3669 = vmatprep.mubr.msk.f32.mxu0 %vm948_vm2, %v1262_v1 }
 0x3bb   : > { %3863 = vmatprep.subr.bf16.mxu0 %v3862_v25 }
 0x3bc   : > { %v1206_v15 = vpop.xlane.xlu1 %1205  ;;  %3865 = vmatpush3.bf16.msra.mxu0 %v3862_v25 }
 0x3bd   : > { %3670 = vmatmul.mubr.msk.f32.gmra.mrb[14].mxu0 %vm948_vm2, %v1264_v50  ;;  %3867 = vmatprep.subr.bf16.mxu0 %v3866_v51 }
 0x3be   : > { %3672 = vmatprep.mubr.msk.f32.mxu0 %vm948_vm2, %v1266_v5  ;;  %v5096_v5 = vld [vmem:[%s5954_s6 + $0x18] sm:$0xff] }
 0x3bf   : > { %v4049_v3 = vpop.eup %4048 }
 0x3c0   : > { %v4051_v32 = vpop.eup %4050  ;;  %v1203_v24 = vpop.xlane.xlu1 %1202  ;;  %v1270_v4 = vmul.f32 %v4049_v3, %v4929_v6  ;;  %3869 = vmatpush3.bf16.msra.mxu0 %v3866_v51 }
 0x3c1   : > { %3673 = vmatmul.mubr.msk.f32.gmra.mrb[16].mxu0 %vm948_vm2, %v1268_v58  ;;  %v1272_v47 = vmul.f32 %v4051_v32, %v4922_v44  ;;  %4054 = vrcp.f32 %v1203_v24  ;;  %v5102_v32 = vld [vmem:[%s5954_s6] sm:$0xff] }
 0x3c2   : > { %3675 = vmatprep.mubr.msk.f32.mxu0 %vm948_vm2, %v1270_v4  ;;  %v5108_v4 = vld [vmem:[%s5954_s6 + $0x10] sm:$0xff] }
 0x3c3   : > { %v4053_v6 = vpop.eup %4052 }
 0x3c4   : > { %v1212_v42 = vpop.xlane.xlu1 %1211  ;;  %v1276_v9 = vmul.f32 %v4053_v6, %v4934_v60  ;;  %v5120_v6 = vld [vmem:[%s5954_s6 + $0x20] sm:$0xff] }
 0x3c5   : > { %3676 = vmatmul.mubr.msk.f32.gmra.mrb[18].mxu0 %vm948_vm2, %v1272_v47 }
 0x3c8   : > { %v1209_v36 = vpop.xlane.xlu1 %1208 }
 0x3cb   : > { %v4055_v26 = vpop.eup %4054 }
 0x3cc   : > { %v1215_v40 = vpop.xlane.xlu1 %1214  ;;  %v1278_v12 = vmul.f32 %v4055_v26, %v4946_v22 }
 0x3cd   : > { %v1197_v38 = vpop.xlane.xlu0 %1196 }
 0x3ce   : > { %4056 = vrcp.f32 %v1197_v38  ;;  %v5114_v38 = vld [vmem:[%s5954_s6 + $0x28] sm:$0xff] }
 0x3cf   : > { %4058 = vrcp.f32 %v1206_v15 }
 0x3d0   : > { %v1218_v31 = vpop.xlane.xlu1 %1217  ;;  %4060 = vrcp.f32 %v1209_v36 }
 0x3d1   : > { %v1221_v0 = vpop.xlane.xlu0 %1220  ;;  %4062 = vrcp.f32 %v1212_v42 }
 0x3d2   : > { %4064 = vrcp.f32 %v1215_v40 }
 0x3d3   : > { %4066 = vrcp.f32 %v1218_v31 }
 0x3d4   : > { %v1224_v28 = vpop.xlane.xlu1 %1223  ;;  %4068 = vrcp.f32 %v1221_v0 }
 0x3d5   : > { %v1227_v44 = vpop.xlane.xlu0 %1226  ;;  %4070 = vrcp.f32 %v1224_v28 }
 0x3d6   : > { %4072 = vrcp.f32 %v1227_v44 }
 0x3d8   : > { %v4057_v48 = vpop.eup %4056  ;;  %v1230_v16 = vpop.xlane.xlu1 %1229 }
 0x3d9   : > { %v1274_v46 = vmul.f32 %v4057_v48, %v4965_v62  ;;  %v4059_v39 = vpop.eup %4058  ;;  %v1233_v62 = vpop.xlane.xlu0 %1232  ;;  %4074 = vrcp.f32 %v1230_v16 }
 0x3da   : > { %v4061_v55 = vpop.eup %4060  ;;  %v1280_v2 = vmul.f32 %v4059_v39, %v4940_v8  ;;  %4076 = vrcp.f32 %v1233_v62  ;;  %v5138_v62 = vld [vmem:[%s5954_s6 + $0x48] sm:$0xff] }
 0x3db   : > { %3678 = vmatprep.mubr.msk.f32.mxu0 %vm948_vm2, %v1274_v46  ;;  %v4063_v29 = vpop.eup %4062  ;;  %v1282_v41 = vmul.f32 %v4061_v55, %v4958_v54  ;;  %v5126_v46 = vld [vmem:[%s5954_s6 + $0x38] sm:$0xff] }
 0x3dc   : > { %3679 = vmatmul.mubr.msk.f32.gmra.mrb[20].mxu0 %vm948_vm2, %v1276_v9  ;;  %v4065_v60 = vpop.eup %4064  ;;  %v1236_v22 = vpop.xlane.xlu1 %1235  ;;  %v1284_v59 = vmul.f32 %v4063_v29, %v4952_v27 }
 0x3dd   : > { %3681 = vmatprep.mubr.msk.f32.mxu0 %vm948_vm2, %v1278_v12  ;;  %v4067_v63 = vpop.eup %4066  ;;  %v1286_v13 = vmul.f32 %v4065_v60, %v4963_v23  ;;  %4078 = vrcp.f32 %v1236_v22  ;;  %v5132_v12 = vld [vmem:[%s5954_s6 + $0x30] sm:$0xff]  ;;  %v5144_v22 = vld [vmem:[%s5954_s6 + $0x40] sm:$0xff] }
 0x3de   : > { %v4069_v14 = vpop.eup %4068  ;;  %v1288_v8 = vmul.f32 %v4067_v63, %v4969_v35 }
 0x3df   : > { %v4071_v54 = vpop.eup %4070  ;;  %v1290_v49 = vmul.f32 %v4069_v14, %v4973_v19 }
 0x3e0   : > { %3682 = vmatmul.mubr.msk.f32.gmra.mrb[22].mxu0 %vm948_vm2, %v1280_v2  ;;  %v4073_v17 = vpop.eup %4072  ;;  %v1292_v27 = vmul.f32 %v4071_v54, %v4977_v57  ;;  %v1690_v57 = vld [vmem:[%s5957_s9] sm:$0xff] }
 0x3e1   : > { %3684 = vmatprep.mubr.msk.f32.mxu0 %vm948_vm2, %v1282_v41  ;;  %v1294_v23 = vmul.f32 %v4073_v17, %v4981_v56  ;;  %v1691_v56 = vld [vmem:[%s5957_s9 + $0x8] sm:$0xff]  ;;  %v5156_v17 = vld [vmem:[%s5954_s6 + $0x50] sm:$0xff] }
 0x3e3   : > { %v4075_v18 = vpop.eup %4074 }
 0x3e4   : > { %3685 = vmatmul.mubr.msk.f32.gmra.mrb[24].mxu0 %vm948_vm2, %v1284_v59  ;;  %v4077_v37 = vpop.eup %4076  ;;  %v1296_v35 = vmul.f32 %v4075_v18, %v4985_v43  ;;  %v3854_v43 = vpack.c.bf16 %v1691_v56, %v1690_v57 }
 0x3e5   : > { %3687 = vmatprep.mubr.msk.f32.mxu0 %vm948_vm2, %v1286_v13  ;;  %v1298_v19 = vmul.f32 %v4077_v37, %v4989_v61  ;;  %v1692_v61 = vld [vmem:[%s5957_s9 + $0x10] sm:$0xff] }
 0x3e6   : > { %3855 = vmatprep.subr.bf16.mxu1 %v3854_v43 }
 0x3e7   : > { %v4079_v11 = vpop.eup %4078  ;;  %3857 = vmatpush3.bf16.msra.mxu1 %v3854_v43 }
 0x3e8   : > { %3688 = vmatmul.mubr.msk.f32.gmra.mrb[26].mxu0 %vm948_vm2, %v1288_v8  ;;  %v1300_v7 = vmul.f32 %v4079_v11, %v4993_v20  ;;  %v1693_v20 = vld [vmem:[%s5957_s9 + $0x18] sm:$0xff] }
 0x3e9   : > { %3690 = vmatprep.mubr.msk.f32.mxu0 %vm948_vm2, %v1290_v49  ;;  %v3858_v34 = vpack.c.bf16 %v1693_v20, %v1692_v61  ;;  %v5150_v8 = vld [vmem:[%s5954_s6 + $0x58] sm:$0xff] }
 0x3ea   : > { %v5174_v20 = vld [vmem:[%s5954_s6 + $0x78] sm:$0xff] }
 0x3eb   : > { %3859 = vmatprep.subr.bf16.mxu1 %v3858_v34 }
 0x3ec   : > { %3691 = vmatmul.mubr.msk.f32.gmra.mrb[28].mxu0 %vm948_vm2, %v1292_v27  ;;  %3861 = vmatpush3.bf16.msra.mxu1 %v3858_v34 }
 0x3ed   : > { %3693 = vmatprep.mubr.msk.f32.mxu0 %vm948_vm2, %v1294_v23 }
 0x3f0   : > { %3694 = vmatmul.mubr.msk.f32.gmra.mrb[30].mxu0 %vm948_vm2, %v1296_v35  ;;  %v5162_v35 = vld [vmem:[%s5954_s6 + $0x68] sm:$0xff] }
 0x3f1   : > { %3696 = vmatprep.mubr.msk.f32.mxu0 %vm948_vm2, %v1298_v19 }
 0x3f4   : > { %3697 = vmatmul.mubr.msk.f32.gmra.mrb[32].mxu0 %vm948_vm2, %v1300_v7  ;;  %v5168_v7 = vld [vmem:[%s5954_s6 + $0x60] sm:$0xff] }
 0x478   : > { %v3653_v1 = vpop.f32.mrb[2].mxu0 }
 0x479   : > { %v1469_v45 = vpop.f32.mrb[3].mxu0  ;;  %v1629_v15 = vmul.f32 %v5090_v53, %v3653_v1  ;;  %v5186_v1 = vld [vmem:[%s5954_s6 + $0x88] sm:$0xff] }
 0x47a   : > { %v1628_v24 = vmul.f32 %v5102_v32, %v1469_v45 }
 0x47c   : > { %v3656_v50 = vpop.f32.mrb[4].mxu0 }
 0x47d   : > { %v1631_v3 = vmul.f32 %v5096_v5, %v3656_v50  ;;  %v1479_v58 = vpop.f32.mrb[5].mxu0 }
 0x47e   : > { %v1630_v47 = vmul.f32 %v5108_v4, %v1479_v58 }
 0x47f   : > { %v1661_v42 = vadd.f32 %v1631_v3, %v1629_v15  ;;  %v5192_v15 = vld [vmem:[%s5954_s6 + $0x80] sm:$0xff] }
 0x480   : > { %v1660_v36 = vadd.f32 %v1630_v47, %v1628_v24  ;;  %v3659_v40 = vpop.f32.mrb[6].mxu0 }
 0x481   : > { %v1633_v31 = vmul.f32 %v5114_v38, %v3659_v40  ;;  %v1489_v0 = vpop.f32.mrb[7].mxu0 }
 0x482   : > { %v1632_v28 = vmul.f32 %v5120_v6, %v1489_v0 }
 0x483   : > { %v1663_v26 = vadd.f32 %v1661_v42, %v1633_v31  ;;  %v5198_v42 = vld [vmem:[%s5954_s6 + $0x98] sm:$0xff]  ;;  %v5204_v31 = vld [vmem:[%s5954_s6 + $0x90] sm:$0xff] }
 0x484   : > { %v1662_v48 = vadd.f32 %v1660_v36, %v1632_v28  ;;  %v3662_v44 = vpop.f32.mrb[8].mxu0 }
 0x485   : > { %v1635_v9 = vmul.f32 %v5126_v46, %v3662_v44  ;;  %v1499_v39 = vpop.f32.mrb[9].mxu0  ;;  %v5210_v44 = vld [vmem:[%s5954_s6 + $0xa8] sm:$0xff] }
 0x486   : > { %v1634_v55 = vmul.f32 %v5132_v12, %v1499_v39 }
 0x487   : > { %v1665_v16 = vadd.f32 %v1663_v26, %v1635_v9 }
 0x488   : > { %v1664_v2 = vadd.f32 %v1662_v48, %v1634_v55  ;;  %v3665_v29 = vpop.f32.mrb[10].mxu0  ;;  %v5216_v55 = vld [vmem:[%s5954_s6 + $0xa0] sm:$0xff] }
 0x489   : > { %v1637_v41 = vmul.f32 %v5138_v62, %v3665_v29  ;;  %v1509_v60 = vpop.f32.mrb[11].mxu0 }
 0x48a   : > { %v1636_v59 = vmul.f32 %v5144_v22, %v1509_v60  ;;  %v5222_v60 = vld [vmem:[%s5954_s6 + $0xb8] sm:$0xff] }
 0x48b   : > { %v1667_v63 = vadd.f32 %v1665_v16, %v1637_v41 }
 0x48c   : > { %v1666_v13 = vadd.f32 %v1664_v2, %v1636_v59  ;;  %v3668_v14 = vpop.f32.mrb[12].mxu0 }
 0x48d   : > { %v1639_v54 = vmul.f32 %v5150_v8, %v3668_v14  ;;  %v1519_v49 = vpop.f32.mrb[13].mxu0 }
 0x48e   : > { %v1638_v27 = vmul.f32 %v5156_v17, %v1519_v49 }
 0x48f   : > { %v1669_v18 = vadd.f32 %v1667_v63, %v1639_v54 }
 0x490   : > { %v1668_v23 = vadd.f32 %v1666_v13, %v1638_v27  ;;  %v3671_v37 = vpop.f32.mrb[14].mxu0  ;;  %v5228_v13 = vld [vmem:[%s5954_s6 + $0xb0] sm:$0xff] }
 0x491   : > { %v1641_v11 = vmul.f32 %v5162_v35, %v3671_v37  ;;  %v1529_v19 = vpop.f32.mrb[15].mxu0 }
 0x492   : > { %v1640_v57 = vmul.f32 %v5168_v7, %v1529_v19 }
 0x493   : > { %v1671_v56 = vadd.f32 %v1669_v18, %v1641_v11  ;;  %v5234_v18 = vld [vmem:[%s5954_s6 + $0xc8] sm:$0xff]  ;;  %v5240_v11 = vld [vmem:[%s5954_s6 + $0xc0] sm:$0xff] }
 0x494   : > { %v1670_v43 = vadd.f32 %v1668_v23, %v1640_v57  ;;  %v3674_v61 = vpop.f32.mrb[16].mxu0 }
 0x495   : > { %v1643_v34 = vmul.f32 %v5174_v20, %v3674_v61  ;;  %v1539_v10 = vpop.f32.mrb[17].mxu0  ;;  %v5246_v61 = vld [vmem:[%s5954_s6 + $0xd8] sm:$0xff] }
 0x496   : > { %v1642_v30 = vmul.f32 %v5180_v52, %v1539_v10 }
 0x497   : > { %v1673_v25 = vadd.f32 %v1671_v56, %v1643_v34 }
 0x498   : > { %v1672_v33 = vadd.f32 %v1670_v43, %v1642_v30  ;;  %v3677_v51 = vpop.f32.mrb[18].mxu0  ;;  %v5252_v30 = vld [vmem:[%s5954_s6 + $0xd0] sm:$0xff] }
 0x499   : > { %v1645_v45 = vmul.f32 %v5186_v1, %v3677_v51  ;;  %v1549_v50 = vpop.f32.mrb[19].mxu0 }
 0x49a   : > { %v1644_v3 = vmul.f32 %v5192_v15, %v1549_v50  ;;  %v5258_v50 = vld [vmem:[%s5954_s6 + $0xe8] sm:$0xff] }
 0x49b   : > { %v1675_v58 = vadd.f32 %v1673_v25, %v1645_v45 }
 0x49c   : > { %v1674_v24 = vadd.f32 %v1672_v33, %v1644_v3 }
 0x4af   : > { %v3680_v47 = vpop.f32.mrb[20].mxu0 }
 0x4b0   : > { %v1647_v36 = vmul.f32 %v5198_v42, %v3680_v47  ;;  %v1559_v40 = vpop.f32.mrb[21].mxu0 }
 0x4b1   : > { %v1646_v0 = vmul.f32 %v5204_v31, %v1559_v40 }
 0x4b2   : > { %v1677_v28 = vadd.f32 %v1675_v58, %v1647_v36 }
 0x4b3   : > { %v1676_v26 = vadd.f32 %v1674_v24, %v1646_v0  ;;  %v3683_v48 = vpop.f32.mrb[22].mxu0  ;;  %v5264_v24 = vld [vmem:[%s5954_s6 + $0xe0] sm:$0xff] }
 0x4b4   : > { %v1649_v9 = vmul.f32 %v5210_v44, %v3683_v48  ;;  %v1569_v39 = vpop.f32.mrb[23].mxu0 }
 0x4b5   : > { %v1648_v16 = vmul.f32 %v5216_v55, %v1569_v39 }
 0x4b6   : > { %v1679_v2 = vadd.f32 %v1677_v28, %v1649_v9  ;;  %v5270_v28 = vld [vmem:[%s5954_s6 + $0xf8] sm:$0xff]  ;;  %v5276_v9 = vld [vmem:[%s5954_s6 + $0xf0] sm:$0xff] }
 0x4b7   : > { %v1678_v29 = vadd.f32 %v1676_v26, %v1648_v16  ;;  %v3686_v41 = vpop.f32.mrb[24].mxu0 }
 0x4b8   : > { %v1651_v59 = vmul.f32 %v5222_v60, %v3686_v41  ;;  %v1579_v63 = vpop.f32.mrb[25].mxu0 }
 0x4b9   : > { %v1650_v14 = vmul.f32 %v5228_v13, %v1579_v63 }
 0x4ba   : > { %v1681_v54 = vadd.f32 %v1679_v2, %v1651_v59 }
 0x4bb   : > { %v1680_v49 = vadd.f32 %v1678_v29, %v1650_v14  ;;  %v3689_v27 = vpop.f32.mrb[26].mxu0  ;;  %v3332_v29 = vld [vmem:[%s5958_s10] ss:$0 sm:$0xff] }
 0x4bc   : > { %v1653_v23 = vmul.f32 %v5234_v18, %v3689_v27  ;;  %v1589_v37 = vpop.f32.mrb[27].mxu0 }
 0x4bd   : > { %v1652_v19 = vmul.f32 %v5240_v11, %v1589_v37 }
 0x4be   : > { %v1683_v57 = vadd.f32 %v1681_v54, %v1653_v23  ;;  %v3340_v54 = vld [vmem:[%s5956_s8 + $0x1] ss:$0 sm:$0xff] }
 0x4bf   : > { %v1682_v56 = vadd.f32 %v1680_v49, %v1652_v19  ;;  %v3692_v43 = vpop.f32.mrb[28].mxu0 }
 0x4c0   : > { %v1655_v34 = vmul.f32 %v5246_v61, %v3692_v43  ;;  %v1599_v10 = vpop.f32.mrb[29].mxu0 }
 0x4c1   : > { %v1654_v25 = vmul.f32 %v5252_v30, %v1599_v10 }
 0x4c2   : > { %v1685_v33 = vadd.f32 %v1683_v57, %v1655_v34 }
 0x4c3   : > { %v1684_v51 = vadd.f32 %v1682_v56, %v1654_v25  ;;  %v3695_v45 = vpop.f32.mrb[30].mxu0 }
 0x4c4   : > { %v1657_v3 = vmul.f32 %v5258_v50, %v3695_v45  ;;  %v1609_v58 = vpop.f32.mrb[31].mxu0 }
 0x4c5   : > { %v1656_v47 = vmul.f32 %v5264_v24, %v1609_v58  ;;  %v5380_v58 = vld [vmem:[%s4669_s18 + $0x8] sm:$0xff] }
 0x4c6   : > { %v1687_v36 = vadd.f32 %v1685_v33, %v1657_v3 }
 0x4c7   : > { %v1686_v40 = vadd.f32 %v1684_v51, %v1656_v47  ;;  %v3698_v0 = vpop.f32.mrb[32].mxu0 }
 0x4c8   : > { %v1659_v26 = vmul.f32 %v5270_v28, %v3698_v0  ;;  %v1619_v48 = vpop.f32.mrb[33].mxu0 }
 0x4c9   : > { %v1658_v39 = vmul.f32 %v5276_v9, %v1619_v48 }
 0x4ca   : > { %v1689_v16 = vadd.f32 %v1687_v36, %v1659_v26  ;;  %v5386_v36 = vld [vmem:[%s4669_s18] sm:$0xff]  ;;  %s5971_s18 = smov 64  }
 0x4cb   : > { %v1688_v2 = vadd.f32 %v1686_v40, %v1658_v39 }
 0x4cd   : > { %3707 = vmatprep.mubr.msk.f32.mxu1 %vm501_vm0, %v1688_v2 }
 0x4ce   : > { %3708 = vmatmul.mubr.msk.f32.vlgmr.msra.gmra.mrb[32].mxu1 %vm501_vm0, %v1689_v16 }
 0x5a1   : > { %v3709_v41 = vpop.f32.mrb[32].mxu1 }
 0x5a2   : > { %v1773_v59 = vpop.f32.mrb[33].mxu1  ;;  %v1779_v14 = vadd.f32 %v3709_v41, %v3332_v29 }
 0x5a3   : > { %v1774_v63 = vadd.f32 %v3332_v29, %v1773_v59 }
 0x5a5   : > { %3718 = vmatprep.mubr.msk.f32.mxu0 %vm501_vm0, %v1774_v63 }
 0x5a6   : > { %3719 = vmatmul.mubr.msk.f32.vlgmr.msra.gmra.mrb[34].mxu0 %vm501_vm0, %v1779_v14 }
 0x679   : > { %v3720_v49 = vpop.f32.mrb[34].mxu0 }
 0x67a   : > { %v1873_v27 = vadd.f32 %v3720_v49, %v3340_v54  ;;  %v1867_v23 = vpop.f32.mrb[35].mxu0 }
 0x67b   : > { %v1868_v37 = vadd.f32 %v3340_v54, %v1867_v23 }
 0x67c   : > { %v1877_v33 = vmul.f32 0.70710677, %v1873_v27 }
 0x67d   : > { %v5289_v19 = vpack.i.bf16 %v1873_v27, %v1868_v37  ;;  %v5291_v57 = vmul.f32 0.70710677, %v1868_v37 }
 0x67e   : > { %v1879_v51 = vmul.f32 %v5090_v53, %v1877_v33  ;;  %v1883_v21 = vmul.f32 %v5114_v38, %v1877_v33 }
 0x67f   : > { %3941 = vrot.lane.b32.xlu0 %v5289_v19, %s5970_s15  ;;  %v1878_v56 = vmul.f32 %v5102_v32, %v5291_v57  ;;  %v1880_v45 = vmul.f32 %v5108_v4, %v5291_v57  ;;  %v1881_v32 = vmul.f32 %v5096_v5, %v1877_v33  ;;  %v1882_v3 = vmul.f32 %v5120_v6, %v5291_v57  ;;  %s4286_s15 = scalar_lea.vmem %s4285_s13, 32 }
 0x680   : > { %v1884_v53 = vmul.f32 %v5132_v12, %v5291_v57  ;;  %v1885_v4 = vmul.f32 %v5126_v46, %v1877_v33  ;;  %v1886_v5 = vmul.f32 %v5144_v22, %v5291_v57  ;;  %v1887_v6 = vmul.f32 %v5138_v62, %v1877_v33 }
 0x681   : > { %3725 = vmatprep.mubr.msk.f32.mxu1 %vm501_vm0, %v1878_v56  ;;  %v1888_v38 = vmul.f32 %v5156_v17, %v5291_v57  ;;  %v1889_v12 = vmul.f32 %v5150_v8, %v1877_v33  ;;  %v1890_v46 = vmul.f32 %v5168_v7, %v5291_v57  ;;  %v1891_v22 = vmul.f32 %v5162_v35, %v1877_v33 }
 0x682   : > { %v1892_v62 = vmul.f32 %v5180_v52, %v5291_v57  ;;  %v1893_v17 = vmul.f32 %v5174_v20, %v1877_v33  ;;  %v1894_v8 = vmul.f32 %v5192_v15, %v5291_v57  ;;  %v1895_v7 = vmul.f32 %v5186_v1, %v1877_v33 }
 0x683   : > { %v1896_v35 = vmul.f32 %v5204_v31, %v5291_v57  ;;  %v1897_v52 = vmul.f32 %v5198_v42, %v1877_v33  ;;  %v1898_v20 = vmul.f32 %v5216_v55, %v5291_v57  ;;  %v1899_v15 = vmul.f32 %v5210_v44, %v1877_v33 }
 0x684   : > { %v1900_v1 = vmul.f32 %v5228_v13, %v5291_v57  ;;  %v1901_v31 = vmul.f32 %v5222_v60, %v1877_v33  ;;  %v1902_v42 = vmul.f32 %v5240_v11, %v5291_v57  ;;  %v1903_v55 = vmul.f32 %v5234_v18, %v1877_v33 }
 0x685   : > { %v1904_v44 = vmul.f32 %v5252_v30, %v5291_v57  ;;  %v1905_v60 = vmul.f32 %v5246_v61, %v1877_v33  ;;  %v1906_v13 = vmul.f32 %v5264_v24, %v5291_v57  ;;  %v1907_v11 = vmul.f32 %v5258_v50, %v1877_v33 }
 0x686   : > { %v1908_v18 = vmul.f32 %v5276_v9, %v5291_v57  ;;  %v1909_v30 = vmul.f32 %v5270_v28, %v1877_v33 }
 0x6f1   : > { %v3942_v43 = vpop.permute.xlu0 %3941 }
 0x6f2   : > { %v3944_v34 = vunpack.i.h.bf16 %v3942_v43  ;;  %v3943_v10 = vunpack.i.l.bf16 %v3942_v43 }
 0x6f4   : > { %v3870_v25 = vpack.c.bf16 %v3944_v34, %v3943_v10 }
 0x6f6   : > { %3872 = vmatprep.subr.msk.bf16.mxu1 %vm4500_vm1, %v3870_v25 }
 0x6f7   : > { %3875 = vmatpush3.bf16.xpose.msk.msra.mxu1 %vm4500_vm1, %v3870_v25 }
 0x6fe   : > { %3726 = vmatmul.mubr.msk.f32.vlgmr.msra.gmra.mrb[34].mxu1 %vm501_vm0, %v1879_v51 }
 0x6ff   : > { %3728 = vmatprep.mubr.msk.f32.mxu1 %vm501_vm0, %v1880_v45 }
 0x702   : > { %3729 = vmatmul.mubr.msk.f32.gmra.mrb[36].mxu1 %vm501_vm0, %v1881_v32 }
 0x703   : > { %3731 = vmatprep.mubr.msk.f32.mxu1 %vm501_vm0, %v1882_v3 }
 0x706   : > { %3732 = vmatmul.mubr.msk.f32.gmra.mrb[38].mxu1 %vm501_vm0, %v1883_v21 }
 0x707   : > { %3734 = vmatprep.mubr.msk.f32.mxu1 %vm501_vm0, %v1884_v53 }
 0x70a   : > { %3735 = vmatmul.mubr.msk.f32.gmra.mrb[40].mxu1 %vm501_vm0, %v1885_v4 }
 0x70b   : > { %3737 = vmatprep.mubr.msk.f32.mxu1 %vm501_vm0, %v1886_v5 }
 0x70e   : > { %3738 = vmatmul.mubr.msk.f32.gmra.mrb[42].mxu1 %vm501_vm0, %v1887_v6 }
 0x70f   : > { %3740 = vmatprep.mubr.msk.f32.mxu1 %vm501_vm0, %v1888_v38 }
 0x712   : > { %3741 = vmatmul.mubr.msk.f32.gmra.mrb[44].mxu1 %vm501_vm0, %v1889_v12 }
 0x713   : > { %3743 = vmatprep.mubr.msk.f32.mxu1 %vm501_vm0, %v1890_v46 }
 0x716   : > { %3744 = vmatmul.mubr.msk.f32.gmra.mrb[46].mxu1 %vm501_vm0, %v1891_v22 }
 0x717   : > { %3746 = vmatprep.mubr.msk.f32.mxu1 %vm501_vm0, %v1892_v62 }
 0x71a   : > { %3747 = vmatmul.mubr.msk.f32.gmra.mrb[48].mxu1 %vm501_vm0, %v1893_v17 }
 0x71b   : > { %3749 = vmatprep.mubr.msk.f32.mxu1 %vm501_vm0, %v1894_v8 }
 0x71e   : > { %3750 = vmatmul.mubr.msk.f32.gmra.mrb[50].mxu1 %vm501_vm0, %v1895_v7 }
 0x71f   : > { %3752 = vmatprep.mubr.msk.f32.mxu1 %vm501_vm0, %v1896_v35 }
 0x722   : > { %3753 = vmatmul.mubr.msk.f32.gmra.mrb[52].mxu1 %vm501_vm0, %v1897_v52 }
 0x723   : > { %3755 = vmatprep.mubr.msk.f32.mxu1 %vm501_vm0, %v1898_v20 }
 0x726   : > { %3756 = vmatmul.mubr.msk.f32.gmra.mrb[54].mxu1 %vm501_vm0, %v1899_v15 }
 0x727   : > { %3758 = vmatprep.mubr.msk.f32.mxu1 %vm501_vm0, %v1900_v1 }
 0x72a   : > { %3759 = vmatmul.mubr.msk.f32.gmra.mrb[56].mxu1 %vm501_vm0, %v1901_v31 }
 0x72b   : > { %3761 = vmatprep.mubr.msk.f32.mxu1 %vm501_vm0, %v1902_v42 }
 0x72e   : > { %3762 = vmatmul.mubr.msk.f32.gmra.mrb[58].mxu1 %vm501_vm0, %v1903_v55 }
 0x72f   : > { %3764 = vmatprep.mubr.msk.f32.mxu1 %vm501_vm0, %v1904_v44 }
 0x732   : > { %3765 = vmatmul.mubr.msk.f32.gmra.mrb[60].mxu1 %vm501_vm0, %v1905_v60 }
 0x733   : > { %3767 = vmatprep.mubr.msk.f32.mxu1 %vm501_vm0, %v1906_v13 }
 0x736   : > { %3768 = vmatmul.mubr.msk.f32.gmra.mrb[62].mxu1 %vm501_vm0, %v1907_v11 }
 0x737   : > { %3770 = vmatprep.mubr.msk.f32.mxu1 %vm501_vm0, %v1908_v18 }
 0x73a   : > { %3771 = vmatmul.mubr.msk.f32.gmra.mrb[64].mxu1 %vm501_vm0, %v1909_v30 }
 0x7d1   : > { %v3727_v61 = vpop.f32.mrb[34].mxu1 }
 0x7d2   : > { %v5383_v24 = vadd.f32 %v5380_v58, %v3727_v61  ;;  %v2082_v47 = vpop.f32.mrb[35].mxu1 }
 0x7d3   : > { %v5389_v50 = vadd.f32 %v5386_v36, %v2082_v47 }
 0x7d4   : > { %v2244_v40 = vsel %vm948_vm2, %v5383_v24, -inf }
 0x7d5   : > { %2245 = vmax.xlane.f32.xlu1 %v2244_v40  ;;  %v3730_v0 = vpop.f32.mrb[36].mxu1  ;;  %v2241_v48 = vsel %vm948_vm2, %v5389_v50, -inf }
 0x7d6   : > { %v2092_v28 = vpop.f32.mrb[37].mxu1  ;;  %v5394_v26 = vadd.f32 %v5380_v58, %v3730_v0 }
 0x7d7   : > { %v5399_v16 = vadd.f32 %v5386_v36, %v2092_v28 }
 0x7d8   : > { %v2250_v2 = vsel %vm948_vm2, %v5394_v26, -inf }
 0x7d9   : > { %v3733_v9 = vpop.f32.mrb[38].mxu1  ;;  %2242 = vmax.xlane.f32.xlu1 %v2241_v48  ;;  %v2247_v14 = vsel %vm948_vm2, %v5399_v16, -inf }
 0x7da   : > { %v2102_v39 = vpop.f32.mrb[39].mxu1  ;;  %v5407_v63 = vadd.f32 %v5380_v58, %v3733_v9 }
 0x7db   : > { %v5414_v23 = vadd.f32 %v5386_v36, %v2102_v39 }
 0x7dc   : > { %v2256_v37 = vsel %vm948_vm2, %v5407_v63, -inf }
 0x7dd   : > { %v3736_v29 = vpop.f32.mrb[40].mxu1  ;;  %2251 = vmax.xlane.f32.xlu1 %v2250_v2  ;;  %v2253_v34 = vsel %vm948_vm2, %v5414_v23, -inf }
 0x7de   : > { %v2112_v41 = vpop.f32.mrb[41].mxu1  ;;  %v5419_v43 = vadd.f32 %v5380_v58, %v3736_v29 }
 0x7df   : > { %v5404_v59 = vadd.f32 %v5386_v36, %v2112_v41 }
 0x7e0   : > { %v2262_v51 = vsel %vm948_vm2, %v5419_v43, -inf }
 0x7e1   : > { %v3739_v54 = vpop.f32.mrb[42].mxu1  ;;  %2248 = vmax.xlane.f32.xlu1 %v2247_v14  ;;  %v2259_v49 = vsel %vm948_vm2, %v5404_v59, -inf }
 0x7e2   : > { %v2122_v27 = vpop.f32.mrb[43].mxu1  ;;  %2260 = vmax.xlane.f32.xlu0 %v2259_v49  ;;  %v5424_v33 = vadd.f32 %v5380_v58, %v3739_v54 }
 0x7e3   : > { %v5432_v21 = vadd.f32 %v5386_v36, %v2122_v27 }
 0x7e4   : > { %v2268_v4 = vsel %vm948_vm2, %v5424_v33, -inf }
 0x7e5   : > { %v3742_v57 = vpop.f32.mrb[44].mxu1  ;;  %2257 = vmax.xlane.f32.xlu1 %v2256_v37  ;;  %v2265_v22 = vsel %vm948_vm2, %v5432_v21, -inf }
 0x7e6   : > { %v2132_v56 = vpop.f32.mrb[45].mxu1  ;;  %v5442_v12 = vadd.f32 %v5380_v58, %v3742_v57 }
 0x7e7   : > { %v5452_v7 = vadd.f32 %v5386_v36, %v2132_v56 }
 0x7e8   : > { %v2274_v52 = vsel %vm948_vm2, %v5442_v12, -inf }
 0x7e9   : > { %v3745_v10 = vpop.f32.mrb[46].mxu1  ;;  %2254 = vmax.xlane.f32.xlu1 %v2253_v34  ;;  %v2271_v55 = vsel %vm948_vm2, %v5452_v7, -inf }
 0x7ea   : > { %v2142_v25 = vpop.f32.mrb[47].mxu1  ;;  %v5462_v31 = vadd.f32 %v5380_v58, %v3745_v10 }
 0x7eb   : > { %v5472_v11 = vadd.f32 %v5386_v36, %v2142_v25 }
 0x7ec   : > { %v2280_v30 = vsel %vm948_vm2, %v5462_v31, -inf }
 0x7ed   : > { %v3748_v45 = vpop.f32.mrb[48].mxu1  ;;  %2263 = vmax.xlane.f32.xlu1 %v2262_v51  ;;  %v2277_v48 = vsel %vm948_vm2, %v5472_v11, -inf }
 0x7ee   : > { %v5429_v32 = vadd.f32 %v5380_v58, %v3748_v45  ;;  %v2152_v3 = vpop.f32.mrb[49].mxu1 }
 0x7ef   : > { %v5482_v0 = vadd.f32 %v5386_v36, %v2152_v3 }
 0x7f0   : > { %v2286_v53 = vsel %vm948_vm2, %v5429_v32, -inf }
 0x7f1   : > { %v3751_v5 = vpop.f32.mrb[50].mxu1  ;;  %2287 = vmax.xlane.f32.xlu0 %v2286_v53  ;;  %2269 = vmax.xlane.f32.xlu1 %v2268_v4  ;;  %v2283_v14 = vsel %vm948_vm2, %v5482_v0, -inf }
 0x7f2   : > { %v5439_v6 = vadd.f32 %v5380_v58, %v3751_v5  ;;  %v2162_v38 = vpop.f32.mrb[51].mxu1 }
 0x7f3   : > { %v5492_v29 = vadd.f32 %v5386_v36, %v2162_v38 }
 0x7f4   : > { %v2292_v46 = vsel %vm948_vm2, %v5439_v6, -inf }
 0x7f5   : > { %v3754_v62 = vpop.f32.mrb[52].mxu1  ;;  %2293 = vmax.xlane.f32.xlu0 %v2292_v46  ;;  %2266 = vmax.xlane.f32.xlu1 %v2265_v22  ;;  %v2289_v56 = vsel %vm948_vm2, %v5492_v29, -inf }
 0x7f6   : > { %v5449_v17 = vadd.f32 %v5380_v58, %v3754_v62  ;;  %v2172_v8 = vpop.f32.mrb[53].mxu1 }
 0x7f7   : > { %v5502_v37 = vadd.f32 %v5386_v36, %v2172_v8 }
 0x7f8   : > { %v2298_v35 = vsel %vm948_vm2, %v5449_v17, -inf }
 0x7f9   : > { %v3757_v20 = vpop.f32.mrb[54].mxu1  ;;  %2299 = vmax.xlane.f32.xlu0 %v2298_v35  ;;  %2275 = vmax.xlane.f32.xlu1 %v2274_v52  ;;  %v2295_v3 = vsel %vm948_vm2, %v5502_v37, -inf }
 0x7fa   : > { %v5459_v15 = vadd.f32 %v5380_v58, %v3757_v20  ;;  %v2182_v1 = vpop.f32.mrb[55].mxu1 }
 0x7fb   : > { %v5512_v51 = vadd.f32 %v5386_v36, %v2182_v1 }
 0x7fc   : > { %v2304_v42 = vsel %vm948_vm2, %v5459_v15, -inf }
 0x7fd   : > { %v3760_v44 = vpop.f32.mrb[56].mxu1  ;;  %2305 = vmax.xlane.f32.xlu0 %v2304_v42  ;;  %2272 = vmax.xlane.f32.xlu1 %v2271_v55  ;;  %v2301_v4 = vsel %vm948_vm2, %v5512_v51, -inf }
 0x7fe   : > { %v5469_v60 = vadd.f32 %v5380_v58, %v3760_v44  ;;  %v2192_v13 = vpop.f32.mrb[57].mxu1 }
 0x7ff   : > { %v5519_v53 = vadd.f32 %v5386_v36, %v2192_v13 }
 0x800   : > { %v2310_v18 = vsel %vm948_vm2, %v5469_v60, -inf }
 0x801   : > { %v3763_v61 = vpop.f32.mrb[58].mxu1  ;;  %2311 = vmax.xlane.f32.xlu0 %v2310_v18  ;;  %2281 = vmax.xlane.f32.xlu1 %v2280_v30  ;;  %v2307_v5 = vsel %vm948_vm2, %v5519_v53, -inf }
 0x802   : > { %v5479_v47 = vadd.f32 %v5380_v58, %v3763_v61  ;;  %v2202_v40 = vpop.f32.mrb[59].mxu1 }
 0x804   : > { %v2316_v28 = vsel %vm948_vm2, %v5479_v47, -inf }
 0x805   : > { %v3766_v9 = vpop.f32.mrb[60].mxu1  ;;  %2317 = vmax.xlane.f32.xlu0 %v2316_v28  ;;  %2278 = vmax.xlane.f32.xlu1 %v2277_v48 }
 0x806   : > { %v5489_v39 = vadd.f32 %v5380_v58, %v3766_v9  ;;  %v2212_v2 = vpop.f32.mrb[61].mxu1 }
 0x807   : > { %v5529_v38 = vadd.f32 %v5386_v36, %v2212_v2 }
 0x808   : > { %v2322_v41 = vsel %vm948_vm2, %v5489_v39, -inf }
 0x809   : > { %v3769_v54 = vpop.f32.mrb[62].mxu1  ;;  %2323 = vmax.xlane.f32.xlu0 %v2322_v41  ;;  %2284 = vmax.xlane.f32.xlu1 %v2283_v14  ;;  %v2319_v62 = vsel %vm948_vm2, %v5529_v38, -inf }
 0x80a   : > { %v5499_v49 = vadd.f32 %v5380_v58, %v3769_v54  ;;  %v2222_v27 = vpop.f32.mrb[63].mxu1 }
 0x80b   : > { %v5534_v22 = vadd.f32 %v5386_v36, %v2222_v27 }
 0x80c   : > { %v2328_v57 = vsel %vm948_vm2, %v5499_v49, -inf }
 0x80d   : > { %v3772_v34 = vpop.f32.mrb[64].mxu1  ;;  %2329 = vmax.xlane.f32.xlu0 %v2328_v57  ;;  %2290 = vmax.xlane.f32.xlu1 %v2289_v56  ;;  %v2325_v35 = vsel %vm948_vm2, %v5534_v22, -inf }
 0x80e   : > { %v5509_v10 = vadd.f32 %v5380_v58, %v3772_v34  ;;  %v2232_v25 = vpop.f32.mrb[65].mxu1  ;;  %v5524_v58 = vadd.f32 %v5386_v36, %v2202_v40 }
 0x80f   : > { %v5539_v8 = vadd.f32 %v5386_v36, %v2232_v25 }
 0x810   : > { %v2334_v45 = vsel %vm948_vm2, %v5509_v10, -inf  ;;  %v2313_v46 = vsel %vm948_vm2, %v5524_v58, -inf }
 0x811   : > { %2335 = vmax.xlane.f32.xlu0 %v2334_v45  ;;  %2296 = vmax.xlane.f32.xlu1 %v2295_v3  ;;  %v2331_v52 = vsel %vm948_vm2, %v5539_v8, -inf }
 0x815   : > { %2302 = vmax.xlane.f32.xlu1 %v2301_v4 }
 0x819   : > { %2308 = vmax.xlane.f32.xlu1 %v2307_v5 }
 0x81d   : > { %2314 = vmax.xlane.f32.xlu1 %v2313_v46 }
 0x821   : > { %2320 = vmax.xlane.f32.xlu1 %v2319_v62 }
 0x825   : > { %2326 = vmax.xlane.f32.xlu1 %v2325_v35 }
 0x829   : > { %2332 = vmax.xlane.f32.xlu1 %v2331_v52 }
 0x862   : > { %v2246_v20 = vpop.xlane.xlu1 %2245 }
 0x863   : > { %v2338_v1 = vsub.f32 %v5383_v24, %v2246_v20 }
 0x865   : > { %v2371_v42 = vmul.f32 1.442695, %v2338_v1 }
 0x866   : > { %v2243_v55 = vpop.xlane.xlu1 %2242 }
 0x867   : > { %4080 = vpow2.f32 %v2371_v42  ;;  %v2337_v44 = vsub.f32 %v5389_v50, %v2243_v55 }
 0x869   : > { %v2369_v13 = vmul.f32 1.442695, %v2337_v44 }
 0x86a   : > { %v2252_v18 = vpop.xlane.xlu1 %2251 }
 0x86b   : > { %4082 = vpow2.f32 %v2369_v13  ;;  %v2340_v36 = vsub.f32 %v5394_v26, %v2252_v18 }
 0x86d   : > { %v2375_v30 = vmul.f32 1.442695, %v2340_v36 }
 0x86e   : > { %v2249_v61 = vpop.xlane.xlu1 %2248 }
 0x86f   : > { %4084 = vpow2.f32 %v2375_v30  ;;  %v2339_v40 = vsub.f32 %v5399_v16, %v2249_v61  ;;  %v2261_v9 = vpop.xlane.xlu0 %2260 }
 0x870   : > { %v2343_v26 = vsub.f32 %v5404_v59, %v2261_v9 }
 0x871   : > { %v5549_v28 = vpop.eup %4080  ;;  %v2373_v48 = vmul.f32 1.442695, %v2339_v40 }
 0x872   : > { %v2258_v24 = vpop.xlane.xlu1 %2257  ;;  %v2436_v2 = vsel %vm948_vm2, %v5549_v28, 0.0  ;;  %v2381_v56 = vmul.f32 1.442695, %v2343_v26 }
 0x873   : > { %4086 = vpow2.f32 %v2373_v48  ;;  %v2342_v50 = vsub.f32 %v5407_v63, %v2258_v24  ;;  %2437 = vadd.xlane.f32.xlu0 %v2436_v2 }
 0x875   : > { %v5554_v41 = vpop.eup %4082  ;;  %v2379_v14 = vmul.f32 1.442695, %v2342_v50 }
 0x876   : > { %v2255_v54 = vpop.xlane.xlu1 %2254  ;;  %v2433_v16 = vsel %vm948_vm2, %v5554_v41, 0.0 }
 0x877   : > { %4088 = vpow2.f32 %v2379_v14  ;;  %v2341_v27 = vsub.f32 %v5414_v23, %v2255_v54  ;;  %2434 = vadd.xlane.f32.xlu1 %v2433_v16 }
 0x879   : > { %v5560_v57 = vpop.eup %4084  ;;  %v2377_v34 = vmul.f32 1.442695, %v2341_v27 }
 0x87a   : > { %v2264_v25 = vpop.xlane.xlu1 %2263  ;;  %v2442_v63 = vsel %vm948_vm2, %v5560_v57, 0.0 }
 0x87b   : > { %4090 = vpow2.f32 %v2377_v34  ;;  %v2344_v59 = vsub.f32 %v5419_v43, %v2264_v25  ;;  %2443 = vadd.xlane.f32.xlu0 %v2442_v63 }
 0x87c   : > { %4092 = vpow2.f32 %v2381_v56 }
 0x87d   : > { %v5565_v45 = vpop.eup %4086  ;;  %v2383_v3 = vmul.f32 1.442695, %v2344_v59 }
 0x87e   : > { %v2270_v4 = vpop.xlane.xlu1 %2269  ;;  %v2439_v23 = vsel %vm948_vm2, %v5565_v45, 0.0  ;;  %v2288_v9 = vpop.xlane.xlu0 %2287 }
 0x87f   : > { %4094 = vpow2.f32 %v2383_v3  ;;  %v2346_v5 = vsub.f32 %v5424_v33, %v2270_v4  ;;  %2440 = vadd.xlane.f32.xlu1 %v2439_v23 }
 0x881   : > { %v5570_v46 = vpop.eup %4088  ;;  %v2387_v62 = vmul.f32 1.442695, %v2346_v5 }
 0x882   : > { %v2267_v35 = vpop.xlane.xlu1 %2266  ;;  %v2448_v43 = vsel %vm948_vm2, %v5570_v46, 0.0  ;;  %v5600_v27 = vpop.xlane.xlu0 %2293 }
 0x883   : > { %v2345_v52 = vsub.f32 %v5432_v21, %v2267_v35  ;;  %2449 = vadd.xlane.f32.xlu0 %v2448_v43  ;;  %4096 = vpow2.f32 %v2387_v62 }
 0x885   : > { %v5575_v20 = vpop.eup %4090  ;;  %v2385_v1 = vmul.f32 1.442695, %v2345_v52 }
 0x886   : > { %v2276_v42 = vpop.xlane.xlu1 %2275  ;;  %v2445_v55 = vsel %vm948_vm2, %v5575_v20, 0.0  ;;  %v5579_v33 = vpop.eup %4092 }
 0x887   : > { %v2348_v44 = vsub.f32 %v5442_v12, %v2276_v42  ;;  %2446 = vadd.xlane.f32.xlu1 %v2445_v55  ;;  %4098 = vpow2.f32 %v2385_v1  ;;  %v2451_v21 = vsel %vm948_vm2, %v5579_v33, 0.0  ;;  %v2300_v4 = vpop.xlane.xlu0 %2299 }
 0x889   : > { %v5582_v13 = vpop.eup %4094  ;;  %v2391_v18 = vmul.f32 1.442695, %v2348_v44 }
 0x88a   : > { %v2273_v36 = vpop.xlane.xlu1 %2272  ;;  %v2454_v30 = vsel %vm948_vm2, %v5582_v13, 0.0 }
 0x88b   : > { %v2347_v61 = vsub.f32 %v5452_v7, %v2273_v36  ;;  %2452 = vadd.xlane.f32.xlu1 %v2451_v21  ;;  %2455 = vadd.xlane.f32.xlu0 %v2454_v30  ;;  %4100 = vpow2.f32 %v2391_v18  ;;  %v2352_v7 = vsub.f32 %v5429_v32, %v2288_v9  ;;  %v2306_v55 = vpop.xlane.xlu0 %2305 }
 0x88c   : > { %v2358_v36 = vsub.f32 %v5459_v15, %v2306_v55 }
 0x88d   : > { %v2389_v40 = vmul.f32 1.442695, %v2347_v61  ;;  %v5589_v48 = vpop.eup %4096  ;;  %v2399_v34 = vmul.f32 1.442695, %v2352_v7 }
 0x88e   : > { %v2282_v12 = vpop.xlane.xlu1 %2281  ;;  %v2460_v2 = vsel %vm948_vm2, %v5589_v48, 0.0 }
 0x88f   : > { %v2350_v24 = vsub.f32 %v5462_v31, %v2282_v12  ;;  %4102 = vpow2.f32 %v2389_v40  ;;  %2461 = vadd.xlane.f32.xlu0 %v2460_v2  ;;  %v2411_v40 = vmul.f32 1.442695, %v2358_v36  ;;  %v2312_v12 = vpop.xlane.xlu0 %2311 }
 0x890   : > { %v2360_v15 = vsub.f32 %v5469_v60, %v2312_v12 }
 0x891   : > { %v2395_v50 = vmul.f32 1.442695, %v2350_v24  ;;  %v5594_v26 = vpop.eup %4098 }
 0x892   : > { %v2279_v14 = vpop.xlane.xlu1 %2278  ;;  %v2457_v16 = vsel %vm948_vm2, %v5594_v26, 0.0 }
 0x893   : > { %v2349_v54 = vsub.f32 %v5472_v11, %v2279_v14  ;;  %4104 = vpow2.f32 %v2395_v50  ;;  %2458 = vadd.xlane.f32.xlu1 %v2457_v16  ;;  %v2318_v16 = vpop.xlane.xlu0 %2317 }
 0x894   : > { %v2362_v60 = vsub.f32 %v5479_v47, %v2318_v16 }
 0x895   : > { %v2393_v31 = vmul.f32 1.442695, %v2349_v54  ;;  %v5602_v56 = vpop.eup %4100  ;;  %v2415_v54 = vmul.f32 1.442695, %v2360_v15 }
 0x896   : > { %v2285_v25 = vpop.xlane.xlu1 %2284  ;;  %v2466_v32 = vsel %vm948_vm2, %v5602_v56, 0.0 }
 0x897   : > { %v2351_v63 = vsub.f32 %v5482_v0, %v2285_v25  ;;  %4106 = vpow2.f32 %v2393_v31  ;;  %2467 = vadd.xlane.f32.xlu0 %v2466_v32  ;;  %v2356_v0 = vsub.f32 %v5449_v17, %v2300_v4  ;;  %v2419_v4 = vmul.f32 1.442695, %v2362_v60 }
 0x898   : > { %4108 = vpow2.f32 %v2399_v34 }
 0x899   : > { %v5607_v11 = vpop.eup %4102  ;;  %v2397_v59 = vmul.f32 1.442695, %v2351_v63  ;;  %v2407_v42 = vmul.f32 1.442695, %v2356_v0 }
 0x89a   : > { %v2291_v3 = vpop.xlane.xlu1 %2290  ;;  %v2463_v5 = vsel %vm948_vm2, %v5607_v11, 0.0 }
 0x89b   : > { %v2353_v23 = vsub.f32 %v5492_v29, %v2291_v3  ;;  %2464 = vadd.xlane.f32.xlu1 %v2463_v5  ;;  %4110 = vpow2.f32 %v2397_v59  ;;  %v2324_v3 = vpop.xlane.xlu0 %2323 }
 0x89d   : > { %v5612_v62 = vpop.eup %4104  ;;  %v2401_v35 = vmul.f32 1.442695, %v2353_v23  ;;  %v2354_v23 = vsub.f32 %v5439_v6, %v5600_v27 }
 0x89e   : > { %v2297_v43 = vpop.xlane.xlu1 %2296  ;;  %v2472_v52 = vsel %vm948_vm2, %v5612_v62, 0.0 }
 0x89f   : > { %2473 = vadd.xlane.f32.xlu0 %v2472_v52  ;;  %4112 = vpow2.f32 %v2401_v35  ;;  %v2355_v29 = vsub.f32 %v5502_v37, %v2297_v43  ;;  %v2330_v35 = vpop.xlane.xlu0 %2329 }
 0x8a0   : > { %4114 = vpow2.f32 %v2407_v42  ;;  %v2403_v42 = vmul.f32 1.442695, %v2354_v23 }
 0x8a1   : > { %v5617_v1 = vpop.eup %4106  ;;  %v2405_v21 = vmul.f32 1.442695, %v2355_v29  ;;  %v2364_v29 = vsub.f32 %v5489_v39, %v2324_v3 }
 0x8a2   : > { %v2469_v44 = vsel %vm948_vm2, %v5617_v1, 0.0  ;;  %v5622_v18 = vpop.eup %4108  ;;  %v2303_v17 = vpop.xlane.xlu1 %2302 }
 0x8a3   : > { %2470 = vadd.xlane.f32.xlu0 %v2469_v44  ;;  %v2478_v30 = vsel %vm948_vm2, %v5622_v18, 0.0  ;;  %4116 = vpow2.f32 %v2405_v21  ;;  %v2357_v37 = vsub.f32 %v5512_v51, %v2303_v17  ;;  %v2423_v44 = vmul.f32 1.442695, %v2364_v29  ;;  %v2336_v39 = vpop.xlane.xlu0 %2335 }
 0x8a4   : > { %4118 = vpow2.f32 %v2411_v40  ;;  %v2366_v17 = vsub.f32 %v5499_v49, %v2330_v35 }
 0x8a5   : > { %v5627_v61 = vpop.eup %4110  ;;  %v2409_v50 = vmul.f32 1.442695, %v2357_v37 }
 0x8a6   : > { %v2309_v9 = vpop.xlane.xlu1 %2308  ;;  %v2475_v24 = vsel %vm948_vm2, %v5627_v61, 0.0  ;;  %v2427_v37 = vmul.f32 1.442695, %v2366_v17 }
 0x8a7   : > { %2479 = vadd.xlane.f32.xlu0 %v2478_v30  ;;  %4120 = vpow2.f32 %v2409_v50  ;;  %v2359_v31 = vsub.f32 %v5519_v53, %v2309_v9 }
 0x8a8   : > { %4122 = vpow2.f32 %v2415_v54 }
 0x8a9   : > { %v5632_v2 = vpop.eup %4112  ;;  %v2413_v25 = vmul.f32 1.442695, %v2359_v31 }
 0x8aa   : > { %v2481_v7 = vsel %vm948_vm2, %v5632_v2, 0.0  ;;  %v5639_v14 = vpop.eup %4114  ;;  %v2315_v51 = vpop.xlane.xlu1 %2314 }
 0x8ab   : > { %2476 = vadd.xlane.f32.xlu0 %v2475_v24  ;;  %v2490_v34 = vsel %vm948_vm2, %v5639_v14, 0.0  ;;  %4124 = vpow2.f32 %v2413_v25  ;;  %v2361_v53 = vsub.f32 %v5524_v58, %v2315_v51 }
 0x8ac   : > { %3946 = vrot.lane.b32.xlu1 %v5289_v19, %s5971_s18  ;;  %4126 = vpow2.f32 %v2419_v4  ;;  %s447_s18 = scalar_lea.vmem %s5950_s2, %s4476_s25 }
 0x8ad   : > { %v5644_v19 = vpop.eup %4116  ;;  %v2417_v43 = vmul.f32 1.442695, %v2361_v53 }
 0x8ae   : > { %v2321_v63 = vpop.xlane.xlu1 %2320  ;;  %v2487_v32 = vsel %vm948_vm2, %v5644_v19, 0.0  ;;  %v5649_v59 = vpop.eup %4118 }
 0x8af   : > { %2482 = vadd.xlane.f32.xlu0 %v2481_v7  ;;  %v2496_v5 = vsel %vm948_vm2, %v5649_v59, 0.0  ;;  %v2363_v52 = vsub.f32 %v5529_v38, %v2321_v63  ;;  %4128 = vpow2.f32 %v2417_v43 }
 0x8b0   : > { %4130 = vpow2.f32 %v2403_v42 }
 0x8b1   : > { %v5656_v47 = vpop.eup %4120  ;;  %v2421_v6 = vmul.f32 1.442695, %v2363_v52 }
 0x8b2   : > { %v2327_v0 = vpop.xlane.xlu1 %2326  ;;  %v2493_v58 = vsel %vm948_vm2, %v5656_v47, 0.0  ;;  %v5662_v55 = vpop.eup %4122 }
 0x8b3   : > { %2491 = vadd.xlane.f32.xlu0 %v2490_v34  ;;  %v2365_v27 = vsub.f32 %v5534_v22, %v2327_v0  ;;  %v2502_v38 = vsel %vm948_vm2, %v5662_v55, 0.0  ;;  %4132 = vpow2.f32 %v2421_v6  ;;  %v2368_v22 = vsub.f32 %v5509_v10, %v2336_v39 }
 0x8b4   : > { %4134 = vpow2.f32 %v2423_v44 }
 0x8b5   : > { %v5668_v21 = vpop.eup %4124  ;;  %v2425_v30 = vmul.f32 1.442695, %v2365_v27  ;;  %v2431_v24 = vmul.f32 1.442695, %v2368_v22 }
 0x8b6   : > { %v2333_v36 = vpop.xlane.xlu1 %2332  ;;  %v2499_v12 = vsel %vm948_vm2, %v5668_v21, 0.0  ;;  %v5674_v49 = vpop.eup %4126 }
 0x8b7   : > { %2488 = vadd.xlane.f32.xlu0 %v2487_v32  ;;  %v2367_v40 = vsub.f32 %v5539_v8, %v2333_v36  ;;  %4136 = vpow2.f32 %v2425_v30  ;;  %v2508_v15 = vsel %vm948_vm2, %v5674_v49, 0.0 }
 0x8b8   : > { %4138 = vpow2.f32 %v2427_v37 }
 0x8b9   : > { %v2429_v9 = vmul.f32 1.442695, %v2367_v40  ;;  %v5678_v50 = vpop.eup %4128 }
 0x8ba   : > { %v5680_v8 = vpop.eup %4130  ;;  %v2505_v10 = vsel %vm948_vm2, %v5678_v50, 0.0 }
 0x8bb   : > { %2497 = vadd.xlane.f32.xlu0 %v2496_v5  ;;  %4140 = vpow2.f32 %v2429_v9  ;;  %v2484_v51 = vsel %vm948_vm2, %v5680_v8, 0.0 }
 0x8bc   : > { %4142 = vpow2.f32 %v2431_v24 }
 0x8bd   : > { %v5684_v7 = vpop.eup %4132 }
 0x8be   : > { %v5688_v54 = vpop.eup %4134  ;;  %v2511_v16 = vsel %vm948_vm2, %v5684_v7, 0.0 }
 0x8bf   : > { %2494 = vadd.xlane.f32.xlu0 %v2493_v58  ;;  %v2514_v34 = vsel %vm948_vm2, %v5688_v54, 0.0 }
 0x8c1   : > { %v5692_v31 = vpop.eup %4136 }
 0x8c2   : > { %v5696_v60 = vpop.eup %4138  ;;  %v2517_v25 = vsel %vm948_vm2, %v5692_v31, 0.0 }
 0x8c3   : > { %2503 = vadd.xlane.f32.xlu0 %v2502_v38  ;;  %v2520_v32 = vsel %vm948_vm2, %v5696_v60, 0.0 }
 0x8c5   : > { %v5700_v63 = vpop.eup %4140 }
 0x8c6   : > { %v5704_v3 = vpop.eup %4142  ;;  %v2523_v4 = vsel %vm948_vm2, %v5700_v63, 0.0 }
 0x8c7   : > { %2500 = vadd.xlane.f32.xlu0 %v2499_v12  ;;  %v2526_v53 = vsel %vm948_vm2, %v5704_v3, 0.0 }
 0x8cb   : > { %2509 = vadd.xlane.f32.xlu0 %v2508_v15 }
 0x8cf   : > { %2506 = vadd.xlane.f32.xlu0 %v2505_v10 }
 0x8d0   : > { %2485 = vadd.xlane.f32.xlu1 %v2484_v51 }
 0x8d3   : > { %2512 = vadd.xlane.f32.xlu0 %v2511_v16 }
 0x8d4   : > { %2515 = vadd.xlane.f32.xlu1 %v2514_v34 }
 0x8d7   : > { %2518 = vadd.xlane.f32.xlu0 %v2517_v25 }
 0x8d8   : > { %2521 = vadd.xlane.f32.xlu1 %v2520_v32 }
 0x8db   : > { %2524 = vadd.xlane.f32.xlu0 %v2523_v4 }
 0x8dc   : > { %2527 = vadd.xlane.f32.xlu1 %v2526_v53 }
 0x900   : > { %v2438_v35 = vpop.xlane.xlu0 %2437 }
 0x904   : > { %v2435_v23 = vpop.xlane.xlu1 %2434 }
 0x905   : > { %4144 = vrcp.f32 %v2435_v23 }
 0x906   : > { %4146 = vrcp.f32 %v2438_v35 }
 0x908   : > { %v2444_v43 = vpop.xlane.xlu0 %2443 }
 0x90c   : > { %v2441_v52 = vpop.xlane.xlu1 %2440 }
 0x90d   : > { %4148 = vrcp.f32 %v2441_v52 }
 0x90e   : > { %4150 = vrcp.f32 %v2444_v43 }
 0x90f   : > { %v4145_v5 = vpop.eup %4144 }
 0x910   : > { %v2530_v0 = vmul.f32 %v4145_v5, %v5554_v41  ;;  %v2450_v42 = vpop.xlane.xlu0 %2449  ;;  %v4147_v37 = vpop.eup %4146 }
 0x911   : > { %v2532_v9 = vmul.f32 %v4147_v37, %v5549_v28 }
 0x912   : > { %3777 = vmatprep.mubr.msk.f32.mxu0 %vm948_vm2, %v2530_v0 }
 0x914   : > { %v2447_v29 = vpop.xlane.xlu1 %2446 }
 0x915   : > { %4152 = vrcp.f32 %v2447_v29 }
 0x916   : > { %4154 = vrcp.f32 %v2450_v42 }
 0x917   : > { %v4149_v12 = vpop.eup %4148 }
 0x918   : > { %v2456_v58 = vpop.xlane.xlu0 %2455  ;;  %v2453_v6 = vpop.xlane.xlu1 %2452  ;;  %v2534_v10 = vmul.f32 %v4149_v12, %v5565_v45 }
 0x919   : > { %4156 = vrcp.f32 %v2453_v6  ;;  %v4151_v24 = vpop.eup %4150 }
 0x91a   : > { %4158 = vrcp.f32 %v2456_v58  ;;  %v2536_v16 = vmul.f32 %v4151_v24, %v5560_v57 }
 0x91c   : > { %v2462_v27 = vpop.xlane.xlu0 %2461 }
 0x91f   : > { %v4153_v51 = vpop.eup %4152 }
 0x920   : > { %v2459_v44 = vpop.xlane.xlu1 %2458  ;;  %v4155_v34 = vpop.eup %4154  ;;  %v2538_v32 = vmul.f32 %v4153_v51, %v5575_v20 }
 0x921   : > { %4160 = vrcp.f32 %v2459_v44  ;;  %v2540_v28 = vmul.f32 %v4155_v34, %v5570_v46 }
 0x922   : > { %4162 = vrcp.f32 %v2462_v27 }
 0x923   : > { %v4157_v4 = vpop.eup %4156 }
 0x924   : > { %v2468_v17 = vpop.xlane.xlu0 %2467  ;;  %v4159_v45 = vpop.eup %4158  ;;  %v2542_v23 = vmul.f32 %v4157_v4, %v5579_v33 }
 0x925   : > { %v2544_v57 = vmul.f32 %v4159_v45, %v5582_v13 }
 0x928   : > { %v2465_v36 = vpop.xlane.xlu1 %2464 }
 0x929   : > { %4164 = vrcp.f32 %v2465_v36 }
 0x92a   : > { %4166 = vrcp.f32 %v2468_v17 }
 0x92b   : > { %v4161_v5 = vpop.eup %4160 }
 0x92c   : > { %v2474_v38 = vpop.xlane.xlu0 %2473  ;;  %v3947_v39 = vpop.permute.xlu1 %3946  ;;  %v2546_v35 = vmul.f32 %v4161_v5, %v5594_v26 }
 0x92d   : > { %v3949_v41 = vunpack.i.h.bf16 %v3947_v39  ;;  %v3948_v30 = vunpack.i.l.bf16 %v3947_v39  ;;  %v4163_v20 = vpop.eup %4162 }
 0x92e   : > { %v2548_v46 = vmul.f32 %v4163_v20, %v5589_v48 }
 0x92f   : > { %v3876_v40 = vpack.c.bf16 %v3949_v41, %v3948_v30 }
 0x930   : > { %v2471_v22 = vpop.xlane.xlu0 %2470 }
 0x931   : > { %3877 = vmatprep.subr.bf16.mxu0 %v3876_v40  ;;  %4168 = vrcp.f32 %v2471_v22 }
 0x932   : > { %3879 = vmatpush3.bf16.msra.mxu0 %v3876_v40  ;;  %4170 = vrcp.f32 %v2474_v38 }
 0x933   : > { %v4165_v43 = vpop.eup %4164 }
 0x934   : > { %v2480_v15 = vpop.xlane.xlu0 %2479  ;;  %v4167_v33 = vpop.eup %4166  ;;  %v2550_v42 = vmul.f32 %v4165_v43, %v5607_v11 }
 0x935   : > { %3778 = vmatmul.mubr.msk.f32.vlgmr.msra.gmra.mrb[36].mxu0 %vm948_vm2, %v2532_v9  ;;  %v2552_v13 = vmul.f32 %v4167_v33, %v5602_v56  ;;  %v4346_v33 = vmov 0  }
 0x936   : > { %3780 = vmatprep.mubr.msk.f32.mxu0 %vm948_vm2, %v2534_v10  ;;  %3951 = vset.pattern.permute.xlu1 %v4346_v33 }
 0x937   : > { %3950 = vset.pattern.permute.xlu0 %v4346_v33  ;;  %v4262_v33 = vld [vmem:[%s5954_s6 + $0x78] sm:$0xff] }
 0x938   : > { %v2477_v25 = vpop.xlane.xlu0 %2476 }
 0x939   : > { %3781 = vmatmul.mubr.msk.f32.gmra.mrb[38].mxu0 %vm948_vm2, %v2536_v16  ;;  %4172 = vrcp.f32 %v2477_v25 }
 0x93a   : > { %3783 = vmatprep.mubr.msk.f32.mxu0 %vm948_vm2, %v2538_v32  ;;  %4174 = vrcp.f32 %v2480_v15 }
 0x93b   : > { %v4169_v29 = vpop.eup %4168 }
 0x93c   : > { %v2483_v53 = vpop.xlane.xlu0 %2482  ;;  %v4171_v26 = vpop.eup %4170  ;;  %v2554_v6 = vmul.f32 %v4169_v29, %v5617_v1  ;;  %v3076_v29 = vld [vmem:[%s447_s18] sm:$0xff] }
 0x93d   : > { %3784 = vmatmul.mubr.msk.f32.gmra.mrb[40].mxu0 %vm948_vm2, %v2540_v28  ;;  %4176 = vrcp.f32 %v2483_v53  ;;  %v2556_v48 = vmul.f32 %v4171_v26, %v5612_v62  ;;  %3080 = vperm.xlu0 %3950, %v3076_v29   ;;  %v4263_v29 = vld [vmem:[%s5954_s6 + $0x70] sm:$0xff] }
 0x93e   : > { %3786 = vmatprep.mubr.msk.f32.mxu0 %vm948_vm2, %v2542_v23 }
 0x940   : > { %v2492_v0 = vpop.xlane.xlu0 %2491 }
 0x941   : > { %3787 = vmatmul.mubr.msk.f32.gmra.mrb[42].mxu0 %vm948_vm2, %v2544_v57 }
 0x942   : > { %3789 = vmatprep.mubr.msk.f32.mxu0 %vm948_vm2, %v2546_v35 }
 0x943   : > { %v4173_v27 = vpop.eup %4172 }
 0x944   : > { %v2489_v52 = vpop.xlane.xlu0 %2488  ;;  %v4175_v44 = vpop.eup %4174  ;;  %v2558_v17 = vmul.f32 %v4173_v27, %v5627_v61 }
 0x945   : > { %3790 = vmatmul.mubr.msk.f32.gmra.mrb[44].mxu0 %vm948_vm2, %v2548_v46  ;;  %v2560_v56 = vmul.f32 %v4175_v44, %v5622_v18  ;;  %4178 = vrcp.f32 %v2489_v52  ;;  %v3111_v46 = vld [vmem:[#allocation2] sm:$0x1]  ;;  %v3077_v52 = vld [vmem:[%s447_s18 + $0x8] sm:$0xff] }
 0x946   : > { %3792 = vmatprep.mubr.msk.f32.mxu0 %vm948_vm2, %v2550_v42  ;;  %v3417_v42 = vmul.f32 -1.442695, %v3111_v46  ;;  %3085 = vperm.xlu1 %3951, %v3077_v52  }
 0x947   : > { %v4177_v36 = vpop.eup %4176 }
 0x948   : > { %v2498_v58 = vpop.xlane.xlu0 %2497  ;;  %v2562_v1 = vmul.f32 %v4177_v36, %v5632_v2 }
 0x949   : > { %3793 = vmatmul.mubr.msk.f32.gmra.mrb[46].mxu0 %vm948_vm2, %v2552_v13  ;;  %v3099_v13 = vld [vmem:[%s450_s26] sm:$0x1]  ;;  %s432_s26 = scalar_lea.vmem [#allocation3], %s431_s14 }
 0x94a   : > { %3795 = vmatprep.mubr.msk.f32.mxu0 %vm948_vm2, %v2554_v6  ;;  %3102 = vperm.xlu1 %3951, %v3099_v13   ;;  %s3156_s25 = sshll.u32 %s432_s26, 4  ;;  %s5908_s25 = int_to_ptr.vmem [resolvable:$true] %s3156_s25 }
 0x94b   : > { %s4280_s12 = scalar_lea.vmem %s5908_s25, 16  ;;  %p4287_p0 = scmp.lt.s32.totalorder %s5908_s25, %s4285_s13 }
 0x94c   : > { %v2495_v11 = vpop.xlane.xlu0 %2494  ;;  %p4281_p11 = scmp.ne.s32.totalorder %s5908_s25, %s4280_s12  ;;  %p4288_p1 = scmp.lt.s32.totalorder %s4286_s15, %s4280_s12 }
 0x94d   : > { %3796 = vmatmul.mubr.msk.f32.gmra.mrb[48].mxu0 %vm948_vm2, %v2556_v48 }
 0x94e   : > { %3798 = vmatprep.mubr.msk.f32.mxu0 %vm948_vm2, %v2558_v17  ;;  %v4248_v17 = vld [vmem:[%s5954_s6 + $0x8] sm:$0xff]  ;;  %p4282_p12 = pnand %p4281_p11, %p4449_p5  ;;  %p4289_p2 = por %p4288_p1, %p4287_p0 }
 0x94f   : > { %v4179_v40 = vpop.eup %4178 }
 0x950   : > { %v2504_v38 = vpop.xlane.xlu0 %2503  ;;  %v2566_v12 = vmul.f32 %v4179_v40, %v5644_v19  ;;  %p4283_p13 = pneg %p4282_p12 }
 0x951   : > { %3799 = vmatmul.mubr.msk.f32.gmra.mrb[50].mxu0 %vm948_vm2, %v2560_v56  ;;  %v4249_v56 = vld [vmem:[%s5954_s6 + $0x18] sm:$0xff] }
 0x952   : > { %3801 = vmatprep.mubr.msk.f32.mxu0 %vm948_vm2, %v2562_v1  ;;  %p4290_p3 = pnand %p4289_p2, %p4283_p13 }
 0x954   : > { %v2501_v39 = vpop.xlane.xlu0 %2500 }
 0x958   : > { %v2510_v62 = vpop.xlane.xlu0 %2509 }
 0x95c   : > { %v2507_v61 = vpop.xlane.xlu0 %2506 }
 0x95d   : > { %v2486_v41 = vpop.xlane.xlu1 %2485 }
 0x95e   : > { %4180 = vrcp.f32 %v2486_v41  ;;  %v4251_v41 = vld [vmem:[%s5954_s6 + $0x10] sm:$0xff] }
 0x95f   : > { %4182 = vrcp.f32 %v2492_v0 }
 0x960   : > { %4184 = vrcp.f32 %v2495_v11  ;;  %v2513_v30 = vpop.xlane.xlu0 %2512 }
 0x961   : > { %4186 = vrcp.f32 %v2498_v58  ;;  %v2516_v2 = vpop.xlane.xlu1 %2515 }
 0x962   : > { %4188 = vrcp.f32 %v2501_v39  ;;  %v4250_v39 = vld [vmem:[%s5954_s6] sm:$0xff] }
 0x963   : > { %4190 = vrcp.f32 %v2504_v38 }
 0x964   : > { %4192 = vrcp.f32 %v2507_v61  ;;  %v2519_v24 = vpop.xlane.xlu0 %2518 }
 0x965   : > { %4194 = vrcp.f32 %v2510_v62  ;;  %v2522_v34 = vpop.xlane.xlu1 %2521 }
 0x966   : > { %4196 = vrcp.f32 %v2513_v30 }
 0x967   : > { %4198 = vrcp.f32 %v2516_v2  ;;  %v4252_v2 = vld [vmem:[%s5954_s6 + $0x28] sm:$0xff] }
 0x968   : > { %v4181_v18 = vpop.eup %4180  ;;  %4200 = vrcp.f32 %v2519_v24  ;;  %v2525_v25 = vpop.xlane.xlu0 %2524 }
 0x969   : > { %v2564_v37 = vmul.f32 %v4181_v18, %v5680_v8  ;;  %v4183_v22 = vpop.eup %4182  ;;  %4202 = vrcp.f32 %v2522_v34 }
 0x96a   : > { %v4185_v9 = vpop.eup %4184  ;;  %v2568_v15 = vmul.f32 %v4183_v22, %v5639_v14  ;;  %4204 = vrcp.f32 %v2525_v25  ;;  %v2528_v14 = vpop.xlane.xlu1 %2527 }
 0x96b   : > { %3802 = vmatmul.mubr.msk.f32.gmra.mrb[52].mxu0 %vm948_vm2, %v2564_v37  ;;  %v4187_v10 = vpop.eup %4186  ;;  %v2570_v51 = vmul.f32 %v4185_v9, %v5656_v47  ;;  %4206 = vrcp.f32 %v2528_v14  ;;  %v4256_v14 = vld [vmem:[%s5954_s6 + $0x48] sm:$0xff] }
 0x96c   : > { %3804 = vmatprep.mubr.msk.f32.mxu0 %vm948_vm2, %v2566_v12  ;;  %v4189_v16 = vpop.eup %4188  ;;  %v2572_v19 = vmul.f32 %v4187_v10, %v5649_v59  ;;  %4208 = vpow2.f32 %v3417_v42  ;;  %v4253_v12 = vld [vmem:[%s5954_s6 + $0x20] sm:$0xff] }
 0x96d   : > { %v4191_v8 = vpop.eup %4190  ;;  %v2574_v32 = vmul.f32 %v4189_v16, %v5668_v21 }
 0x96e   : > { %v4193_v4 = vpop.eup %4192  ;;  %v2576_v47 = vmul.f32 %v4191_v8, %v5662_v55 }
 0x96f   : > { %3805 = vmatmul.mubr.msk.f32.gmra.mrb[54].mxu0 %vm948_vm2, %v2568_v15  ;;  %v4195_v28 = vpop.eup %4194  ;;  %v2578_v45 = vmul.f32 %v4193_v4, %v5678_v50 }
 0x970   : > { %3807 = vmatprep.mubr.msk.f32.mxu0 %vm948_vm2, %v2570_v51  ;;  %v4197_v53 = vpop.eup %4196  ;;  %v2580_v59 = vmul.f32 %v4195_v28, %v5674_v49  ;;  %v4254_v51 = vld [vmem:[%s5954_s6 + $0x38] sm:$0xff] }
 0x971   : > { %v4199_v21 = vpop.eup %4198  ;;  %v2582_v23 = vmul.f32 %v4197_v53, %v5684_v7 }
 0x972   : > { %v4201_v5 = vpop.eup %4200  ;;  %v2584_v55 = vmul.f32 %v4199_v21, %v5688_v54 }
 0x973   : > { %3808 = vmatmul.mubr.msk.f32.gmra.mrb[56].mxu0 %vm948_vm2, %v2572_v19  ;;  %v4203_v57 = vpop.eup %4202  ;;  %v2586_v50 = vmul.f32 %v4201_v5, %v5692_v31  ;;  %v3409_v31 = vld [vmem:[%s5957_s9 + $0x20] sm:$0xff]  ;;  %v4255_v19 = vld [vmem:[%s5954_s6 + $0x30] sm:$0xff]  ;;  %v4258_v5 = vld [vmem:[%s5954_s6 + $0x58] sm:$0xff] }
 0x974   : > { %3810 = vmatprep.mubr.msk.f32.mxu0 %vm948_vm2, %v2574_v32  ;;  %v4205_v20 = vpop.eup %4204  ;;  %v2588_v49 = vmul.f32 %v4203_v57, %v5696_v60  ;;  %v3410_v60 = vld [vmem:[%s5957_s9 + $0x28] sm:$0xff] }
 0x975   : > { %v4207_v0 = vpop.eup %4206  ;;  %v2590_v7 = vmul.f32 %v4205_v20, %v5700_v63  ;;  %v3880_v35 = vpack.c.bf16 %v3410_v60, %v3409_v31  ;;  %v3411_v63 = vld [vmem:[%s5957_s9 + $0x30] sm:$0xff] }
 0x976   : > { %v2592_v54 = vmul.f32 %v4207_v0, %v5704_v3  ;;  %v3412_v3 = vld [vmem:[%s5957_s9 + $0x38] sm:$0xff]  ;;  %v4209_v26 = vpop.eup %4208 }
 0x977   : > { %3811 = vmatmul.mubr.msk.f32.gmra.mrb[58].mxu0 %vm948_vm2, %v2576_v47  ;;  %3881 = vmatprep.subr.bf16.mxu0 %v3880_v35  ;;  %v3884_v43 = vpack.c.bf16 %v3412_v3, %v3411_v63  ;;  %v3115_v58 = vadd.f32 1.0, %v4209_v26 }
 0x978   : > { %3813 = vmatprep.mubr.msk.f32.mxu0 %vm948_vm2, %v2578_v45  ;;  %3883 = vmatpush3.bf16.msra.mxu0 %v3880_v35  ;;  %v4257_v45 = vld [vmem:[%s5954_s6 + $0x40] sm:$0xff] }
 0x979   : > { %3885 = vmatprep.subr.bf16.mxu0 %v3884_v43  ;;  %4210 = vrcp.f32 %v3115_v58  ;;  %v4261_v35 = vld [vmem:[%s5954_s6 + $0x60] sm:$0xff] }
 0x97b   : > { %3814 = vmatmul.mubr.msk.f32.gmra.mrb[60].mxu0 %vm948_vm2, %v2580_v59 }
 0x97c   : > { %3816 = vmatprep.mubr.msk.f32.mxu0 %vm948_vm2, %v2582_v23  ;;  %3887 = vmatpush3.bf16.msra.mxu0 %v3884_v43 }
 0x97f   : > { %3817 = vmatmul.mubr.msk.f32.gmra.mrb[62].mxu0 %vm948_vm2, %v2584_v55 }
 0x980   : > { %3819 = vmatprep.mubr.msk.f32.mxu0 %vm948_vm2, %v2586_v50  ;;  %v4259_v50 = vld [vmem:[%s5954_s6 + $0x50] sm:$0xff] }
 0x983   : > { %3820 = vmatmul.mubr.msk.f32.gmra.mrb[64].mxu0 %vm948_vm2, %v2588_v49  ;;  %v4211_v6 = vpop.eup %4210 }
 0x984   : > { %3822 = vmatprep.mubr.msk.f32.mxu0 %vm948_vm2, %v2590_v7  ;;  %3121 = vperm.xlu1 %3951, %v4211_v6   ;;  %v3129_v27 = vsub.f32 1.0, %v4211_v6 }
 0x987   : > { %3823 = vmatmul.mubr.msk.f32.gmra.mrb[66].mxu0 %vm948_vm2, %v2592_v54  ;;  %v4260_v54 = vld [vmem:[%s5954_s6 + $0x68] sm:$0xff] }
 0x988   : > { %3132 = vperm.xlu1 %3951, %v3129_v27   ;;  %v4264_v27 = vld [vmem:[%s5954_s6 + $0x88] sm:$0xff] }
 0xa08   : > { %v3779_v48 = vpop.f32.mrb[36].mxu0 }
 0xa09   : > { %v2761_v44 = vpop.f32.mrb[37].mxu0  ;;  %v2921_v36 = vmul.f32 %v4248_v17, %v3779_v48 }
 0xa0a   : > { %v2920_v62 = vmul.f32 %v4250_v39, %v2761_v44 }
 0xa0c   : > { %v3782_v11 = vpop.f32.mrb[38].mxu0 }
 0xa0d   : > { %v2923_v38 = vmul.f32 %v4249_v56, %v3782_v11  ;;  %v2771_v1 = vpop.f32.mrb[39].mxu0  ;;  %v4265_v11 = vld [vmem:[%s5954_s6 + $0x80] sm:$0xff] }
 0xa0e   : > { %v2922_v61 = vmul.f32 %v4251_v41, %v2771_v1  ;;  %v4266_v1 = vld [vmem:[%s5954_s6 + $0x98] sm:$0xff]  ;;  %v4267_v41 = vld [vmem:[%s5954_s6 + $0x90] sm:$0xff] }
 0xa0f   : > { %v2953_v30 = vadd.f32 %v2923_v38, %v2921_v36 }
 0xa10   : > { %v2952_v40 = vadd.f32 %v2922_v61, %v2920_v62  ;;  %v3785_v18 = vpop.f32.mrb[40].mxu0 }
 0xa11   : > { %v2925_v37 = vmul.f32 %v4252_v2, %v3785_v18  ;;  %v2781_v22 = vpop.f32.mrb[41].mxu0  ;;  %v4268_v2 = vld [vmem:[%s5954_s6 + $0xa8] sm:$0xff] }
 0xa12   : > { %v2924_v9 = vmul.f32 %v4253_v12, %v2781_v22  ;;  %v4269_v12 = vld [vmem:[%s5954_s6 + $0xa0] sm:$0xff] }
 0xa13   : > { %v2955_v24 = vadd.f32 %v2953_v30, %v2925_v37 }
 0xa14   : > { %v2954_v15 = vadd.f32 %v2952_v40, %v2924_v9  ;;  %v3788_v10 = vpop.f32.mrb[42].mxu0 }
 0xa15   : > { %v2927_v16 = vmul.f32 %v4254_v51, %v3788_v10  ;;  %v2791_v34 = vpop.f32.mrb[43].mxu0  ;;  %v4270_v51 = vld [vmem:[%s5954_s6 + $0xb8] sm:$0xff] }
 0xa16   : > { %v2926_v8 = vmul.f32 %v4255_v19, %v2791_v34  ;;  %v4271_v19 = vld [vmem:[%s5954_s6 + $0xb0] sm:$0xff] }
 0xa17   : > { %v2957_v25 = vadd.f32 %v2955_v24, %v2927_v16 }
 0xa18   : > { %v2956_v32 = vadd.f32 %v2954_v15, %v2926_v8  ;;  %v3791_v4 = vpop.f32.mrb[44].mxu0 }
 0xa19   : > { %v2929_v47 = vmul.f32 %v4256_v14, %v3791_v4  ;;  %v2801_v28 = vpop.f32.mrb[45].mxu0  ;;  %v4272_v14 = vld [vmem:[%s5954_s6 + $0xc8] sm:$0xff] }
 0xa1a   : > { %v2928_v53 = vmul.f32 %v4257_v45, %v2801_v28  ;;  %v4273_v45 = vld [vmem:[%s5954_s6 + $0xc0] sm:$0xff] }
 0xa1b   : > { %v2959_v59 = vadd.f32 %v2957_v25, %v2929_v47 }
 0xa1c   : > { %v2958_v21 = vadd.f32 %v2956_v32, %v2928_v53  ;;  %v3794_v23 = vpop.f32.mrb[46].mxu0 }
 0xa1d   : > { %v2931_v55 = vmul.f32 %v4258_v5, %v3794_v23  ;;  %v2811_v57 = vpop.f32.mrb[47].mxu0  ;;  %v4274_v5 = vld [vmem:[%s5954_s6 + $0xd8] sm:$0xff] }
 0xa1e   : > { %v2930_v20 = vmul.f32 %v4259_v50, %v2811_v57  ;;  %v4275_v50 = vld [vmem:[%s5954_s6 + $0xd0] sm:$0xff] }
 0xa1f   : > { %v2961_v49 = vadd.f32 %v2959_v59, %v2931_v55 }
 0xa20   : > { %v2960_v0 = vadd.f32 %v2958_v21, %v2930_v20  ;;  %v3797_v7 = vpop.f32.mrb[48].mxu0 }
 0xa21   : > { %v2933_v31 = vmul.f32 %v4260_v54, %v3797_v7  ;;  %v2821_v60 = vpop.f32.mrb[49].mxu0  ;;  %v4276_v54 = vld [vmem:[%s5954_s6 + $0xe8] sm:$0xff] }
 0xa22   : > { %v2932_v63 = vmul.f32 %v4261_v35, %v2821_v60  ;;  %v4277_v35 = vld [vmem:[%s5954_s6 + $0xe0] sm:$0xff] }
 0xa23   : > { %v2963_v3 = vadd.f32 %v2961_v49, %v2933_v31 }
 0xa24   : > { %v2962_v43 = vadd.f32 %v2960_v0, %v2932_v63  ;;  %v3800_v46 = vpop.f32.mrb[50].mxu0 }
 0xa25   : > { %v2935_v52 = vmul.f32 %v4262_v33, %v3800_v46  ;;  %v2831_v42 = vpop.f32.mrb[51].mxu0  ;;  %v4278_v33 = vld [vmem:[%s5954_s6 + $0xf8] sm:$0xff] }
 0xa26   : > { %v2934_v13 = vmul.f32 %v4263_v29, %v2831_v42  ;;  %v4279_v29 = vld [vmem:[%s5954_s6 + $0xf0] sm:$0xff] }
 0xa27   : > { %v2965_v26 = vadd.f32 %v2963_v3, %v2935_v52 }
 0xa28   : > { %v2964_v58 = vadd.f32 %v2962_v43, %v2934_v13 }
 0xa3e   : > { %v3803_v6 = vpop.f32.mrb[52].mxu0 }
 0xa3f   : > { %v2937_v48 = vmul.f32 %v4264_v27, %v3803_v6  ;;  %v2841_v44 = vpop.f32.mrb[53].mxu0  ;;  %v3105_v6 = vlaneseq }
 0xa40   : > { %v2936_v17 = vmul.f32 %v4265_v11, %v2841_v44  ;;  %v3086_v44 = vpop.permute.xlu1 %3085 }
 0xa41   : > { %v2967_v36 = vadd.f32 %v2965_v26, %v2937_v48  ;;  %v3106_v27 = vshrl.u32 %v3105_v6, 7  ;;  %v3414_v48 = vld [vmem:[%s5958_s10 + $0x1] ss:$0 sm:$0xff] }
 0xa42   : > { %v2966_v56 = vadd.f32 %v2964_v58, %v2936_v17  ;;  %v3806_v38 = vpop.f32.mrb[54].mxu0 }
 0xa43   : > { %v2939_v39 = vmul.f32 %v4266_v1, %v3806_v38  ;;  %v2851_v62 = vpop.f32.mrb[55].mxu0  ;;  %v3107_v38 = vsub.s32 0, %v3106_v27 }
 0xa44   : > { %v2938_v61 = vmul.f32 %v4267_v41, %v2851_v62  ;;  %v3103_v41 = vpop.permute.xlu1 %3102 }
 0xa45   : > { %v2969_v30 = vadd.f32 %v2967_v36, %v2939_v39 }
 0xa46   : > { %v2968_v40 = vadd.f32 %v2966_v56, %v2938_v61  ;;  %v3809_v18 = vpop.f32.mrb[56].mxu0  ;;  %v3081_v56 = vpop.permute.xlu0 %3080 }
 0xa47   : > { %v2941_v37 = vmul.f32 %v4268_v2, %v3809_v18  ;;  %v2861_v22 = vpop.f32.mrb[57].mxu0 }
 0xa48   : > { %v2940_v9 = vmul.f32 %v4269_v12, %v2861_v22  ;;  %v3122_v22 = vpop.permute.xlu1 %3121 }
 0xa49   : > { %v2971_v24 = vadd.f32 %v2969_v30, %v2941_v37  ;;  %v3108_v30 = vrot.slane %v3103_v41, %v3107_v38 }
 0xa4a   : > { %v2970_v15 = vadd.f32 %v2968_v40, %v2940_v9  ;;  %v3812_v10 = vpop.f32.mrb[58].mxu0 }
 0xa4b   : > { %v2943_v16 = vmul.f32 %v4270_v51, %v3812_v10  ;;  %v2871_v34 = vpop.f32.mrb[59].mxu0  ;;  %4212 = vrcp.f32 %v3108_v30  ;;  %v3127_v10 = vrot.slane %v3122_v22, %v3107_v38 }
 0xa4c   : > { %v2942_v8 = vmul.f32 %v4271_v19, %v2871_v34  ;;  %v3118_v34 = vld [vmem:[%s453_s16] sm:$0x1] }
 0xa4d   : > { %v2973_v25 = vadd.f32 %v2971_v24, %v2943_v16 }
 0xa4e   : > { %v2972_v32 = vadd.f32 %v2970_v15, %v2942_v8  ;;  %v3815_v4 = vpop.f32.mrb[60].mxu0  ;;  %v3133_v15 = vpop.permute.xlu1 %3132 }
 0xa4f   : > { %v2945_v47 = vmul.f32 %v4272_v14, %v3815_v4  ;;  %v2881_v28 = vpop.f32.mrb[61].mxu0  ;;  %v3138_v8 = vrot.slane %v3133_v15, %v3107_v38 }
 0xa50   : > { %v2944_v53 = vmul.f32 %v4273_v45, %v2881_v28 }
 0xa51   : > { %v2975_v59 = vadd.f32 %v2973_v25, %v2945_v47  ;;  %v3128_v25 = vmul.f32 %v3127_v10, %v3118_v34 }
 0xa52   : > { %v2974_v21 = vadd.f32 %v2972_v32, %v2944_v53  ;;  %v3818_v23 = vpop.f32.mrb[62].mxu0 }
 0xa53   : > { %v2947_v55 = vmul.f32 %v4274_v5, %v3818_v23  ;;  %v2891_v57 = vpop.f32.mrb[63].mxu0 }
 0xa54   : > { %v2946_v20 = vmul.f32 %v4275_v50, %v2891_v57 }
 0xa55   : > { %v2977_v49 = vadd.f32 %v2975_v59, %v2947_v55  ;;  %v4213_v16 = vpop.eup %4212 }
 0xa56   : > { %v2976_v0 = vadd.f32 %v2974_v21, %v2946_v20  ;;  %v3821_v7 = vpop.f32.mrb[64].mxu0 }
 0xa57   : > { %v2949_v31 = vmul.f32 %v4276_v54, %v3821_v7  ;;  %v2901_v60 = vpop.f32.mrb[65].mxu0 }
 0xa58   : > { %v2948_v63 = vmul.f32 %v4277_v35, %v2901_v60 }
 0xa59   : > { %v2979_v3 = vadd.f32 %v2977_v49, %v2949_v31 }
 0xa5a   : > { %v2978_v43 = vadd.f32 %v2976_v0, %v2948_v63  ;;  %v3824_v46 = vpop.f32.mrb[66].mxu0 }
 0xa5b   : > { %v2951_v52 = vmul.f32 %v4278_v33, %v3824_v46  ;;  %v2911_v42 = vpop.f32.mrb[67].mxu0 }
 0xa5c   : > { %v2950_v13 = vmul.f32 %v4279_v29, %v2911_v42 }
 0xa5d   : > { %v2981_v26 = vadd.f32 %v2979_v3, %v2951_v52 }
 0xa5e   : > { %v2980_v58 = vadd.f32 %v2978_v43, %v2950_v13 }
 0xa60   : > { %3833 = vmatprep.mubr.msk.f32.mxu0 %vm501_vm0, %v2980_v58 }
 0xa61   : > { %3834 = vmatmul.mubr.msk.f32.vlgmr.msra.gmra.mrb[68].mxu0 %vm501_vm0, %v2981_v26 }
 0xb34   : > { %v3835_v11 = vpop.f32.mrb[68].mxu0 }
 0xb35   : > { %v3073_v17 = vadd.f32 %v3835_v11, %v3414_v48  ;;  %v3067_v36 = vpop.f32.mrb[69].mxu0 }
 0xb36   : > { %v3068_v1 = vadd.f32 %v3414_v48, %v3067_v36 }
 0xb37   : > { %v3089_v39 = vmul.f32 %v3086_v44, %v3073_v17 }
 0xb38   : > { %v3088_v62 = vmul.f32 %v3081_v56, %v3068_v1 }
 0xb39   : > { %v3091_v61 = vsel %vm501_vm0, %v3089_v39, 0.0 }
 0xb3a   : > { %v3090_v40 = vsel %vm501_vm0, %v3088_v62, 0.0 }
 0xb3b   : > { %v3092_v18 = vadd.f32 %v3091_v61, %v3090_v40 }
 0xb3d   : > { %v3093_v2 = vrot.slane %v3092_v18, 4 }
 0xb3f   : > { %v3094_v37 = vadd.f32 %v3093_v2, %v3092_v18 }
 0xb41   : > { %v3095_v12 = vrot.slane %v3094_v37, 2 }
 0xb43   : > { %v3096_v9 = vadd.f32 %v3095_v12, %v3094_v37 }
 0xb45   : > { %v3097_v24 = vrot.slane %v3096_v9, 1 }
 0xb47   : > { %v3098_v51 = vadd.f32 %v3097_v24, %v3096_v9 }
 0xb49   : > { %v3110_v19 = vmul.f32 %v4213_v16, %v3098_v51 }
 0xb4b   : > { %v3139_v32 = vmul.f32 %v3138_v8, %v3110_v19 }
 0xb4d   : > { %v3140_v4 = vadd.f32 %v3139_v32, %v3128_v25 }
 0xb4f   : > { %3142 = vst.msk [vmem:[%s432_s26] sm:$0x1] %vm3141_vm3, %v3140_v4 }
 0xb50   : > { %4293 = shalt.err (!%p4290_p3)
}
 0xb51   : > { %s4294_s14 = scalar_lea.hbm %s5906_s23, 16  ;;  %s4298_s17 = scalar_lea.hbm %s5959_s11, 128 }
 0xb52   : > { %p4295_p4 = scmp.ne.s32.totalorder %s5906_s23, %s4294_s14  ;;  %p4299_p9 = scmp.lt.u32.totalorder %s5906_s23, %s5959_s11 }
 0xb53   : > { %p4300_p10 = scmp.lt.u32.totalorder %s4298_s17, %s4294_s14  ;;  %p4302_p12 = scmp.lt.u32.totalorder %s4294_s14, %s5906_s23 }
 0xb54   : > { %p4296_p7 = pnand %p4295_p4, %p4449_p5 }
 0xb55   : > { %p4301_p11 = por %p4300_p10, %p4299_p9 }
 0xb56   : > { %p4297_p8 = pneg %p4296_p7 }
 0xb57   : > { %p4303_p13 = por %p4302_p12, %p4301_p11 }
 0xb59   : > { %p4304_p0 = pnand %p4303_p13, %p4297_p8 }
 0xb5b   : > { %4307 = shalt.err (!%p4304_p0)
}
 0xb5c   : > { %3888 = dma.vmem_to_hbm [thread:$0]  (%p4449_p5), %s5908_s25, 16, %s5906_s23, %s3144_s30  }
 0xb5d PF: > { %p3894_p1 = scmp.ge.s32.totalorder %s4342_s22, 2  ;;  %s3168_s1 = sand.u32 1, %s4330_s19  }
 0xb5e   : > { %s3169_s12 = scalar_lea.sflag [#allocation4], %s3168_s1 }
 0xb5f   : > { %p3891_p2 = pnand %p3894_p1, %p4453_p6 }
 0xb61   : > { %4325 = dma.done.wait (!%p3891_p2), %s3169_s12, 16  }
 0xb62   : > { %4327 = vsyncadd (!%p3891_p2), %s3169_s12, 4294967280  ;;  %p23_p3 = scmp.ge.s32.totalorder %s4436_s24, 10   ;;  %s5972_s19 = smov %s4334_s20 }
 0xb63   : > { %s5973_s20 = smov %s4338_s21  ;;  %s5974_s21 = smov %s4447_s27 }
 0xb64   : > { %s5975_s22 = smov %s4436_s24  ;;  %25 = sbr.rel (!%p23_p3) target bundleno = 6 (0x6), region = 115 }
 0xb6b   :  { %3173 = vsyncpa [#allocation4], 1 }
 0xb6c   :  { %3175 = vsyncpa [#allocation4 + $0x1], 1 }

</bundles_post_ra>
